<compile_context>
chip_gen: v7x
topology: tpu7x:2x2x1
jax: 0.10.0
libtpu: 0.0.40
codegen_flags: <defaults>
</compile_context>

<pallas_src>
import numpy as np
import jax
import jax.numpy as jnp
from jax.experimental import pallas as pl
from jax.experimental.pallas import tpu as pltpu

LEAKY_SLOPE = 0.2


# ----------------------------------------------------------------------------
# Host-side constant builders (0/1 time-transform matrices, flattened weights)
# ----------------------------------------------------------------------------
def _cpad(n):
    return -(-int(n) // 8) * 8


def _reflect(j, pad, T):
    s = j - pad
    if s < 0:
        s = -s
    if s >= T:
        s = 2 * (T - 1) - s
    return s


def _conv_sel(T_in, pad, stride, K, k):
    """(T_in, T_out) selector: (x @ S)[t] = reflect_pad(x)[stride*t + k]."""
    T_out = (T_in + 2 * pad - K) // stride + 1
    S = np.zeros((T_in, T_out), np.float32)
    for t in range(T_out):
        S[_reflect(stride * t + k, pad, T_in), t] = 1.0
    return S


def _dec_sel(t_in, pad, K, k):
    """(t_in, T_out) selector for Upsample(x2, nearest) -> ReflectionPad1d(pad) -> tap k."""
    T_up = 2 * t_in
    T_out = T_up + 2 * pad - K + 1
    S = np.zeros((t_in, T_out), np.float32)
    for t in range(T_out):
        u = _reflect(t + k, pad, T_up)
        S[u // 2, t] = 1.0
    return S


def _pool_sel(T, which):
    """ks=2 / s=2 pooling selectors: 'E' even cols, 'O' odd cols, 'A' = 0.5*(E+O)."""
    E = np.zeros((T, T // 2), np.float32)
    O = np.zeros((T, T // 2), np.float32)
    for t in range(T // 2):
        E[2 * t, t] = 1.0
        O[2 * t + 1, t] = 1.0
    return {"E": E, "O": O, "A": 0.5 * (E + O)}[which]


def _flat_w(w):
    """(Co, Ci, K) -> (cpad(Co), K*cpad(Ci)) with [co, k*Ci_p + ci] = w[co, ci, k]."""
    w = np.asarray(w, np.float32)
    Co, Ci, K = w.shape
    Ci_p = _cpad(Ci)
    out = np.zeros((_cpad(Co), K * Ci_p), np.float32)
    for k in range(K):
        out[:Co, k * Ci_p:k * Ci_p + Ci] = w[:, :, k]
    return out


def _col_b(b):
    b = np.asarray(b, np.float32)
    out = np.zeros((_cpad(b.shape[0]), 1), np.float32)
    out[: b.shape[0], 0] = b
    return out


class _Slab:
    """Packs many small 2-D f32 constants into one (8,128)-padded slab (one DMA)."""

    def __init__(self):
        self._arrs, self._handles, self._ncols = [], [], 0

    def add(self, arr):
        arr = np.asarray(arr, np.float32)
        assert arr.ndim == 2
        h = (self._ncols, arr.shape[0], arr.shape[1])
        self._arrs.append(arr)
        self._handles.append(h)
        self._ncols += -(-arr.shape[1] // 8) * 8          # 8-aligned column offsets
        return h

    def materialize(self):
        rows = -(-max(a.shape[0] for a in self._arrs) // 8) * 8
        cols = -(-self._ncols // 128) * 128
        slab = np.zeros((rows, cols), np.float32)
        for a, (off, r, c) in zip(self._arrs, self._handles):
            slab[:r, off:off + c] = a
        return jnp.asarray(slab)


# ----------------------------------------------------------------------------
# Build the packed constant slab + the Pallas kernel for batch-block size B
# ----------------------------------------------------------------------------
def _build(params, T_in, B):
    mot_p, body_p, view_p, de_p = (params["mot"], params["body"],
                                   params["view"], params["de"])
    C_in = int(mot_p[0]["w"].shape[1])
    C_bv = int(body_p["convs"][0]["w"].shape[1])
    assert C_bv == C_in - 2, "body/view encoders consume x[:, :-2, :]"
    assert int(view_p["convs"][0]["w"].shape[1]) == C_bv

    slab, cache = _Slab(), {}

    def shared(key, builder):
        if key not in cache:
            cache[key] = slab.add(builder())
        return cache[key]

    eyeB = np.eye(B, dtype=np.float32)
    kr = lambda S: np.kron(eyeB, S)        # block-diagonal over the B stacked samples

    plan = {"Cbv_p": _cpad(C_bv)}

    # --- motion encoder: [ReflectionPad, Conv1d(ks=8, s=2), LeakyReLU] x n --------
    mot, t = [], T_in
    for p in mot_p:
        Co, Ci, K = (int(v) for v in p["w"].shape)
        pad = (K - 2) // 2
        t_out = (t + 2 * pad - K) // 2 + 1
        S = [shared(("S", t, pad, 2, K, k),
                    lambda t=t, pad=pad, K=K, k=k: kr(_conv_sel(t, pad, 2, K, k)))
             for k in range(K)]
        mot.append(dict(w=slab.add(_flat_w(p["w"])), b=slab.add(_col_b(p["b"])), S=S))
        t = t_out
    plan["mot"] = mot
    T_m, C_m = t, int(mot_p[-1]["w"].shape[0])

    # --- fused body/view layer 0 (shared input / pad / kernel size) ---------------
    b0, v0 = body_p["convs"][0], view_p["convs"][0]
    K0 = int(b0["w"].shape[2])
    pad0 = (K0 - 1) // 2
    t0 = T_in + 2 * pad0 - K0 + 1
    assert t0 % 2 == 0
    plan["bv0"] = dict(
        w=slab.add(np.concatenate([_flat_w(b0["w"]), _flat_w(v0["w"])], axis=0)),
        b=slab.add(np.concatenate([_col_b(b0["b"]), _col_b(v0["b"])], axis=0)),
        S=[shared(("S", T_in, pad0, 1, K0, k),
                  lambda k=k: kr(_conv_sel(T_in, pad0, 1, K0, k))) for k in range(K0)])
    plan["bv0_split"] = _cpad(int(b0["w"].shape[0]))

    # --- remaining pooled-encoder layers, global pool, 1x1 compress conv ----------
    def pooled_branch(pe, mode):
        br = {}
        if mode == "max":
            br["p0E"] = shared(("E", t0), lambda: kr(_pool_sel(t0, "E")))
            br["p0O"] = shared(("O", t0), lambda: kr(_pool_sel(t0, "O")))
        else:
            br["p0A"] = shared(("A", t0), lambda: kr(_pool_sel(t0, "A")))
        layers, t = [], t0 // 2
        for p in pe["convs"][1:]:
            Co, Ci, K = (int(v) for v in p["w"].shape)
            pad = (K - 1) // 2
            tc = t + 2 * pad - K + 1
            assert tc % 2 == 0
            L = dict(w=slab.add(_flat_w(p["w"])), b=slab.add(_col_b(p["b"])),
                     S=[shared(("S", t, pad, 1, K, k),
                               lambda t=t, pad=pad, K=K, k=k: kr(_conv_sel(t, pad, 1, K, k)))
                        for k in range(K)])
            if mode == "max":
                L["pE"] = shared(("E", tc), lambda tc=tc: kr(_pool_sel(tc, "E")))
                L["pO"] = shared(("O", tc), lambda tc=tc: kr(_pool_sel(tc, "O")))
            else:
                L["pA"] = shared(("A", tc), lambda tc=tc: kr(_pool_sel(tc, "A")))
            layers.append(L)
            t = tc // 2
        br["layers"] = layers
        if mode == "max":
            assert t >= 1 and (t & (t - 1)) == 0, "global max-pool width must be 2^k"
            tree, w = [], t
            while w > 1:
                tree.append((shared(("E", w), lambda w=w: kr(_pool_sel(w, "E"))),
                             shared(("O", w), lambda w=w: kr(_pool_sel(w, "O")))))
                w //= 2
            br["gmax"] = tree
        else:
            br["gavg"] = shared(("Ag", t),
                                lambda t=t: kr(np.full((t, 1), 1.0 / t, np.float32)))
        br["c1w"] = slab.add(_flat_w(pe["conv1x1"]["w"]))
        br["c1b"] = slab.add(_col_b(pe["conv1x1"]["b"]))
        return br

    plan["body"] = pooled_branch(body_p, "max")
    plan["view"] = pooled_branch(view_p, "avg")
    C_b = int(body_p["conv1x1"]["w"].shape[0])

    # --- decoder: [Upsample x2, ReflectionPad, Conv1d, (Dropout), LeakyReLU] ------
    de, t = [], T_m
    for i, p in enumerate(de_p):
        w = np.asarray(p["w"], np.float32)
        Co, Ci, K = w.shape
        pad = (K - 1) // 2
        t_out = 2 * t + 2 * pad - K + 1
        L = dict(b=slab.add(_col_b(p["b"])), act=(i != len(de_p) - 1),
                 S=[shared(("D", t, pad, K, k),
                           lambda t=t, pad=pad, K=K, k=k: kr(_dec_sel(t, pad, K, k)))
                    for k in range(K)])
        if i == 0:
            # Time-constant body/view codes: their conv contribution folds into a
            # per-output-channel bias (sum_k W[:, code_ch, k]) @ code  (exact).
            L["w"] = slab.add(_flat_w(w[:, :C_m, :]))

            def fold(ws):
                s = ws.sum(axis=-1)
                out = np.zeros((_cpad(s.shape[0]), _cpad(s.shape[1])), np.float32)
                out[: s.shape[0], : s.shape[1]] = s
                return out

            L["ifb"] = slab.add(fold(w[:, C_m:C_m + C_b, :]))
            L["ifv"] = slab.add(fold(w[:, C_m + C_b:, :]))
            L["BC"] = slab.add(kr(np.ones((1, t_out), np.float32)))
        else:
            L["w"] = slab.add(_flat_w(w))
        de.append(L)
        t = t_out
    plan["de"] = de
    T_out, C_out = t, int(de_p[-1]["w"].shape[0])
    plan["C_out"] = C_out

    slab_arr = slab.materialize()

    # ------------------------------------------------------------------ kernel --
    def kernel(x_ref, slab_ref, o_ref):
        loaded = {}

        def ld(h):                                 # static slice of the packed slab
            if h not in loaded:
                off, r, c = h
                loaded[h] = slab_ref[0:r, off:off + c]
            return loaded[h]

        def mdot(a, b):
            return jnp.dot(a, b, preferred_element_type=jnp.float32)

        def leaky(v):
            return jnp.maximum(v, LEAKY_SLOPE * v)

        def conv(h, L):
            # channel im2col: K tap-selection dots stacked along sublanes, then one
            # matmul with the (Co, K*Ci) flattened weight (MXU does the accumulation).
            cols = [mdot(h, ld(s)) for s in L["S"]]
            return mdot(ld(L["w"]), jnp.concatenate(cols, axis=0))

        x = x_ref[...]                             # (C_in_p, B*T_in)

        # ---- motion encoder ----
        h = x
        for L in plan["mot"]:
            h = leaky(conv(h, L) + ld(L["b"]))
        m = h                                      # (C_m_p, B*T_m)

        # ---- fused body/view layer 0 on x[:, :-2, :] ----
        xb = x[: plan["Cbv_p"], :]
        h0 = leaky(conv(xb, plan["bv0"]) + ld(plan["bv0"]["b"]))
        hb = h0[: plan["bv0_split"], :]
        hv = h0[plan["bv0_split"]:, :]

        # body branch: MaxPool1d(2,2) between layers, global max pool, 1x1 conv
        bbr = plan["body"]
        hb = jnp.maximum(mdot(hb, ld(bbr["p0E"])), mdot(hb, ld(bbr["p0O"])))
        for L in bbr["layers"]:
            hb = leaky(conv(hb, L) + ld(L["b"]))
            hb = jnp.maximum(mdot(hb, ld(L["pE"])), mdot(hb, ld(L["pO"])))
        for e, o in bbr["gmax"]:
            hb = jnp.maximum(mdot(hb, ld(e)), mdot(hb, ld(o)))
        b_code = mdot(ld(bbr["c1w"]), hb) + ld(bbr["c1b"])        # (C_b_p, B)

        # view branch: AvgPool1d(2,2) between layers, global avg pool, 1x1 conv
        vbr = plan["view"]
        hv = mdot(hv, ld(vbr["p0A"]))
        for L in vbr["layers"]:
            hv = leaky(conv(hv, L) + ld(L["b"]))
            hv = mdot(hv, ld(L["pA"]))
        hv = mdot(hv, ld(vbr["gavg"]))
        v_code = mdot(ld(vbr["c1w"]), hv) + ld(vbr["c1b"])        # (C_v_p, B)

        # ---- decoder ----
        # TODO(synk): Dropout(p=0.2) after decoder convs 0/1 is identity (eval mode).
        h = m
        for i, L in enumerate(plan["de"]):
            acc = conv(h, L)
            if i == 0:
                cb = mdot(ld(L["ifb"]), b_code) + mdot(ld(L["ifv"]), v_code) + ld(L["b"])
                acc = acc + mdot(cb, ld(L["BC"]))   # broadcast codes+bias over time
            else:
                acc = acc + ld(L["b"])
            h = leaky(acc) if L["act"] else acc

        o_ref[...] = h[: plan["C_out"], :]

    info = dict(C_in=C_in, C_in_p=_cpad(C_in), C_out=C_out, T_out=T_out)
    return kernel, slab_arr, info


# ----------------------------------------------------------------------------
# Wrapper: batch blocking + lane-stacked layout + single fused pallas_call
# ----------------------------------------------------------------------------
def _choose_blocking(N, T_in):
    """Samples per grid step: fill up to a 128-lane vreg, keep >=2 steps for megacore."""
    max_b = max(1, 128 // max(T_in, 1))
    if N <= 1:
        return 1, 1
    n_blocks = max(2, -(-N // max_b))
    B = -(-N // n_blocks)
    return n_blocks, B


def make_autoencoder3x_forward(params, T_in):
    built = {}

    def fwd(x):
        N, C, T = x.shape
        assert T == T_in
        n_blocks, B = _choose_blocking(N, T_in)
        if B not in built:
            built[B] = _build(params, T_in, B)
        kernel, slab, info = built[B]
        C_in_p, C_out, T_out = info["C_in_p"], info["C_out"], info["T_out"]
        N_pad = n_blocks * B

        xx = x.astype(jnp.float32)
        xx = jnp.pad(xx, ((0, N_pad - N), (0, C_in_p - C), (0, 0)))
        # (N_pad, C, T) -> (n_blocks, C, B*T): batch stacked along the lane axis
        xx = (xx.reshape(n_blocks, B, C_in_p, T_in)
                .transpose(0, 2, 1, 3)
                .reshape(n_blocks, C_in_p, B * T_in))

        out = pl.pallas_call(
            kernel,
            out_shape=jax.ShapeDtypeStruct((n_blocks, C_out, B * T_out), jnp.float32),
            grid=(n_blocks,),
            in_specs=[pl.BlockSpec((None, C_in_p, B * T_in), lambda n: (n, 0, 0)),
                      pl.BlockSpec(slab.shape, lambda n: (0, 0))],
            out_specs=pl.BlockSpec((None, C_out, B * T_out), lambda n: (n, 0, 0)),
            compiler_params=pltpu.CompilerParams(
                dimension_semantics=("parallel",),
                vmem_limit_bytes=32 * 1024 * 1024),
        )(xx, slab)

        out = (out.reshape(n_blocks, C_out, B, T_out)
                  .transpose(0, 2, 1, 3)
                  .reshape(N_pad, C_out, T_out))
        return out[:N]

    return fwd


# ----------------------------------------------------------------------------
# Pure-JAX reference (PyTorch semantics) for the correctness check
# ----------------------------------------------------------------------------
def _ref_conv1d(x, w, b, *, stride, pad, slope=None):
    if pad > 0:
        x = jnp.pad(x, ((0, 0), (0, 0), (pad, pad)), mode="reflect")
    y = jax.lax.conv_general_dilated(x, w, window_strides=(stride,),
                                     padding="VALID",
                                     dimension_numbers=("NCH", "OIH", "NCH"))
    y = y + b[None, :, None]
    if slope is not None:
        y = jnp.where(y >= 0, y, slope * y)
    return y


def reference_forward(params, x):
    h = x
    for p in params["mot"]:
        h = _ref_conv1d(h, p["w"], p["b"], stride=2, pad=3, slope=LEAKY_SLOPE)
    m = h
    xb = x[:, :-2, :]

    def pooled(pe, mode):
        hh = xb
        for p in pe["convs"]:
            hh = _ref_conv1d(hh, p["w"], p["b"], stride=1, pad=3, slope=LEAKY_SLOPE)
            N, C, T = hh.shape
            hr = hh.reshape(N, C, T // 2, 2)
            hh = hr.max(-1) if mode == "max" else hr.mean(-1)
        g = hh.max(-1, keepdims=True) if mode == "max" else hh.mean(-1, keepdims=True)
        return _ref_conv1d(g, pe["conv1x1"]["w"], pe["conv1x1"]["b"], stride=1, pad=0)

    b_code = pooled(params["body"], "max")
    v_code = pooled(params["view"], "avg")
    Tm = m.shape[-1]
    d = jnp.concatenate(
        [m,
         jnp.broadcast_to(b_code, (b_code.shape[0], b_code.shape[1], Tm)),
         jnp.broadcast_to(v_code, (v_code.shape[0], v_code.shape[1], Tm))], axis=1)
    n = len(params["de"])
    h = d
    for i, p in enumerate(params["de"]):
        h = jnp.repeat(h, 2, axis=-1)
        slope = LEAKY_SLOPE if i != n - 1 else None
        h = _ref_conv1d(h, p["w"], p["b"], stride=1, pad=3, slope=slope)
    return h


# ----------------------------------------------------------------------------
# Deterministic parameter init (PyTorch Conv1d default: U(-1/sqrt(fan_in), ..))
# ----------------------------------------------------------------------------
def init_conv(key, c_in, c_out, k):
    kw, kb = jax.random.split(key)
    bound = 1.0 / float(c_in * k) ** 0.5
    w = jax.random.uniform(kw, (c_out, c_in, k), jnp.float32, -bound, bound)
    b = jax.random.uniform(kb, (c_out,), jnp.float32, -bound, bound)
    return {"w": w, "b": b}


def init_params(key, mot_ch, body_ch, view_ch, de_ch):
    assert mot_ch[0] == de_ch[-1]
    assert mot_ch[-1] + body_ch[-1] + view_ch[-1] == de_ch[0]
    keys = jax.random.split(key, 64)
    ki = iter(range(64))

    mot = [init_conv(keys[next(ki)], mot_ch[i], mot_ch[i + 1], 8)
           for i in range(len(mot_ch) - 1)]

    def pooled(ch):
        convs = [init_conv(keys[next(ki)], ch[i], ch[i + 1], 7)
                 for i in range(len(ch) - 2)]
        conv1x1 = init_conv(keys[next(ki)], ch[-2], ch[-1], 1)
        return {"convs": convs, "conv1x1": conv1x1}

    body = pooled(body_ch)
    view = pooled(view_ch)

    de = [init_conv(keys[next(ki)], de_ch[i], de_ch[i + 1], 7)
          for i in range(len(de_ch) - 1)]

    return {"mot": mot, "body": body, "view": view, "de": de}


# ----------------------------------------------------------------------------
if __name__ == "__main__":
    # Structurally valid channel config:
    #   mot_en_channels[0] == de_channels[-1]  (10 == 10)
    #   mot[-1] + body[-1] + view[-1] == de[0] (32 + 8 + 8 == 48)
    mot_en_channels = (10, 16, 32)
    body_en_channels = (8, 16, 24, 8)
    view_en_channels = (8, 16, 24, 8)
    de_channels = (48, 24, 10)

    key = jax.random.PRNGKey(0)
    kp, kx = jax.random.split(key)
    params = init_params(kp, mot_en_channels, body_en_channels,
                         view_en_channels, de_channels)

    fwd = jax.jit(make_autoencoder3x_forward(params, T_in=16))

    # N=2 exercises the 2-step grid (one sample/block, both v7x TensorCores);
    # N=8 exercises the batch-stacked lane-dense path (B=4 samples per block).
    for N in (2, 8):
        x = jax.random.normal(jax.random.fold_in(kx, N), (N, 10, 16), dtype=jnp.float32)
        out = jax.block_until_ready(fwd(x))
        ref = reference_forward(params, x)
        assert out.shape == (N, 10, 16), out.shape
        assert bool(jnp.all(jnp.isfinite(out)))
        max_err = float(jnp.max(jnp.abs(out - ref)))
        assert max_err < 1e-3, f"N={N}: mismatch vs reference: {max_err}"
    print("KERNEL_OK")
</pallas_src>

<mosaic_0001>
module attributes {stable_mosaic.version = 11 : i64} {
  func.func @kernel(%arg0: i32, %arg1: memref<1x16x16xf32, #tpu.memory_space<vmem>>, %arg2: memref<32x1664xf32, #tpu.memory_space<vmem>>, %arg3: memref<1x10x16xf32, #tpu.memory_space<vmem>>) attributes {dimension_semantics = [#tpu.dimension_semantics<parallel>], iteration_bounds = array<i64: 2>, scalar_prefetch = 0 : i64, scratch_operands = 0 : i64, tpu.core_type = #tpu.core_type<tc>, window_params = [{transform_indices = @transform_0, window_bounds = array<i64: 1, 16, 16>}, {pipeline_mode = #tpu.pipeline_mode<synchronous>, transform_indices = @transform_1, window_bounds = array<i64: 32, 1664>}, {transform_indices = @transform_2, window_bounds = array<i64: 1, 10, 16>}]} {
    %c0 = arith.constant 0 : index
    %c0_0 = arith.constant 0 : index
    %c0_1 = arith.constant 0 : index
    %0 = vector.load %arg1[%c0, %c0_0, %c0_1] : memref<1x16x16xf32, #tpu.memory_space<vmem>>, vector<1x16x16xf32>
    %1 = vector.shape_cast %0 : vector<1x16x16xf32> to vector<16x16xf32>
    %c0_2 = arith.constant 0 : index
    %c0_3 = arith.constant 0 : index
    %2 = vector.load %arg2[%c0_2, %c0_3] : memref<32x1664xf32, #tpu.memory_space<vmem>>, vector<16x8xf32>
    %cst = arith.constant dense<0.000000e+00> : vector<16x8xf32>
    %3 = tpu.matmul %1, %2, %cst {dimension_numbers = #tpu.dot_dimension_numbers<[1], [0], [0], [1], [0, 0, 1, 1], [], []>} : vector<16x16xf32>, vector<16x8xf32>, vector<16x8xf32> -> vector<16x8xf32>
    %c0_4 = arith.constant 0 : index
    %c8 = arith.constant 8 : index
    %4 = vector.load %arg2[%c0_4, %c8] : memref<32x1664xf32, #tpu.memory_space<vmem>>, vector<16x8xf32>
    %cst_5 = arith.constant dense<0.000000e+00> : vector<16x8xf32>
    %5 = tpu.matmul %1, %4, %cst_5 {dimension_numbers = #tpu.dot_dimension_numbers<[1], [0], [0], [1], [0, 0, 1, 1], [], []>} : vector<16x16xf32>, vector<16x8xf32>, vector<16x8xf32> -> vector<16x8xf32>
    %c0_6 = arith.constant 0 : index
    %c16 = arith.constant 16 : index
    %6 = vector.load %arg2[%c0_6, %c16] : memref<32x1664xf32, #tpu.memory_space<vmem>>, vector<16x8xf32>
    %cst_7 = arith.constant dense<0.000000e+00> : vector<16x8xf32>
    %7 = tpu.matmul %1, %6, %cst_7 {dimension_numbers = #tpu.dot_dimension_numbers<[1], [0], [0], [1], [0, 0, 1, 1], [], []>} : vector<16x16xf32>, vector<16x8xf32>, vector<16x8xf32> -> vector<16x8xf32>
    %c0_8 = arith.constant 0 : index
    %c24 = arith.constant 24 : index
    %8 = vector.load %arg2[%c0_8, %c24] : memref<32x1664xf32, #tpu.memory_space<vmem>>, vector<16x8xf32>
    %cst_9 = arith.constant dense<0.000000e+00> : vector<16x8xf32>
    %9 = tpu.matmul %1, %8, %cst_9 {dimension_numbers = #tpu.dot_dimension_numbers<[1], [0], [0], [1], [0, 0, 1, 1], [], []>} : vector<16x16xf32>, vector<16x8xf32>, vector<16x8xf32> -> vector<16x8xf32>
    %c0_10 = arith.constant 0 : index
    %c32 = arith.constant 32 : index
    %10 = vector.load %arg2[%c0_10, %c32] : memref<32x1664xf32, #tpu.memory_space<vmem>>, vector<16x8xf32>
    %cst_11 = arith.constant dense<0.000000e+00> : vector<16x8xf32>
    %11 = tpu.matmul %1, %10, %cst_11 {dimension_numbers = #tpu.dot_dimension_numbers<[1], [0], [0], [1], [0, 0, 1, 1], [], []>} : vector<16x16xf32>, vector<16x8xf32>, vector<16x8xf32> -> vector<16x8xf32>
    %c0_12 = arith.constant 0 : index
    %c40 = arith.constant 40 : index
    %12 = vector.load %arg2[%c0_12, %c40] : memref<32x1664xf32, #tpu.memory_space<vmem>>, vector<16x8xf32>
    %cst_13 = arith.constant dense<0.000000e+00> : vector<16x8xf32>
    %13 = tpu.matmul %1, %12, %cst_13 {dimension_numbers = #tpu.dot_dimension_numbers<[1], [0], [0], [1], [0, 0, 1, 1], [], []>} : vector<16x16xf32>, vector<16x8xf32>, vector<16x8xf32> -> vector<16x8xf32>
    %c0_14 = arith.constant 0 : index
    %c48 = arith.constant 48 : index
    %14 = vector.load %arg2[%c0_14, %c48] : memref<32x1664xf32, #tpu.memory_space<vmem>>, vector<16x8xf32>
    %cst_15 = arith.constant dense<0.000000e+00> : vector<16x8xf32>
    %15 = tpu.matmul %1, %14, %cst_15 {dimension_numbers = #tpu.dot_dimension_numbers<[1], [0], [0], [1], [0, 0, 1, 1], [], []>} : vector<16x16xf32>, vector<16x8xf32>, vector<16x8xf32> -> vector<16x8xf32>
    %c0_16 = arith.constant 0 : index
    %c56 = arith.constant 56 : index
    %16 = vector.load %arg2[%c0_16, %c56] : memref<32x1664xf32, #tpu.memory_space<vmem>>, vector<16x8xf32>
    %cst_17 = arith.constant dense<0.000000e+00> : vector<16x8xf32>
    %17 = tpu.matmul %1, %16, %cst_17 {dimension_numbers = #tpu.dot_dimension_numbers<[1], [0], [0], [1], [0, 0, 1, 1], [], []>} : vector<16x16xf32>, vector<16x8xf32>, vector<16x8xf32> -> vector<16x8xf32>
    %c0_18 = arith.constant 0 : index
    %c64 = arith.constant 64 : index
    %18 = vector.load %arg2[%c0_18, %c64] : memref<32x1664xf32, #tpu.memory_space<vmem>>, vector<16x128xf32>
    %19 = tpu.concatenate %3, %5, %7, %9, %11, %13, %15, %17 in 0 : vector<16x8xf32>, vector<16x8xf32>, vector<16x8xf32>, vector<16x8xf32>, vector<16x8xf32>, vector<16x8xf32>, vector<16x8xf32>, vector<16x8xf32> -> vector<128x8xf32>
    %cst_19 = arith.constant dense<0.000000e+00> : vector<16x8xf32>
    %20 = tpu.matmul %18, %19, %cst_19 {dimension_numbers = #tpu.dot_dimension_numbers<[1], [0], [0], [1], [0, 0, 1, 1], [], []>} : vector<16x128xf32>, vector<128x8xf32>, vector<16x8xf32> -> vector<16x8xf32>
    %c0_20 = arith.constant 0 : index
    %c192 = arith.constant 192 : index
    %21 = vector.load %arg2[%c0_20, %c192] : memref<32x1664xf32, #tpu.memory_space<vmem>>, vector<16x1xf32>
    %22 = vector.broadcast %21 : vector<16x1xf32> to vector<16x8xf32>
    %23 = arith.addf %20, %22 : vector<16x8xf32>
    %cst_21 = arith.constant 2.000000e-01 : f32
    %24 = vector.broadcast %cst_21 : f32 to vector<16x8xf32>
    %25 = arith.mulf %24, %23 : vector<16x8xf32>
    %26 = arith.maximumf %23, %25 : vector<16x8xf32>
    %c0_22 = arith.constant 0 : index
    %c200 = arith.constant 200 : index
    %27 = vector.load %arg2[%c0_22, %c200] : memref<32x1664xf32, #tpu.memory_space<vmem>>, vector<8x4xf32>
    %cst_23 = arith.constant dense<0.000000e+00> : vector<16x4xf32>
    %28 = tpu.matmul %26, %27, %cst_23 {dimension_numbers = #tpu.dot_dimension_numbers<[1], [0], [0], [1], [0, 0, 1, 1], [], []>} : vector<16x8xf32>, vector<8x4xf32>, vector<16x4xf32> -> vector<16x4xf32>
    %c0_24 = arith.constant 0 : index
    %c208 = arith.constant 208 : index
    %29 = vector.load %arg2[%c0_24, %c208] : memref<32x1664xf32, #tpu.memory_space<vmem>>, vector<8x4xf32>
    %cst_25 = arith.constant dense<0.000000e+00> : vector<16x4xf32>
    %30 = tpu.matmul %26, %29, %cst_25 {dimension_numbers = #tpu.dot_dimension_numbers<[1], [0], [0], [1], [0, 0, 1, 1], [], []>} : vector<16x8xf32>, vector<8x4xf32>, vector<16x4xf32> -> vector<16x4xf32>
    %c0_26 = arith.constant 0 : index
    %c216 = arith.constant 216 : index
    %31 = vector.load %arg2[%c0_26, %c216] : memref<32x1664xf32, #tpu.memory_space<vmem>>, vector<8x4xf32>
    %cst_27 = arith.constant dense<0.000000e+00> : vector<16x4xf32>
    %32 = tpu.matmul %26, %31, %cst_27 {dimension_numbers = #tpu.dot_dimension_numbers<[1], [0], [0], [1], [0, 0, 1, 1], [], []>} : vector<16x8xf32>, vector<8x4xf32>, vector<16x4xf32> -> vector<16x4xf32>
    %c0_28 = arith.constant 0 : index
    %c224 = arith.constant 224 : index
    %33 = vector.load %arg2[%c0_28, %c224] : memref<32x1664xf32, #tpu.memory_space<vmem>>, vector<8x4xf32>
    %cst_29 = arith.constant dense<0.000000e+00> : vector<16x4xf32>
    %34 = tpu.matmul %26, %33, %cst_29 {dimension_numbers = #tpu.dot_dimension_numbers<[1], [0], [0], [1], [0, 0, 1, 1], [], []>} : vector<16x8xf32>, vector<8x4xf32>, vector<16x4xf32> -> vector<16x4xf32>
    %c0_30 = arith.constant 0 : index
    %c232 = arith.constant 232 : index
    %35 = vector.load %arg2[%c0_30, %c232] : memref<32x1664xf32, #tpu.memory_space<vmem>>, vector<8x4xf32>
    %cst_31 = arith.constant dense<0.000000e+00> : vector<16x4xf32>
    %36 = tpu.matmul %26, %35, %cst_31 {dimension_numbers = #tpu.dot_dimension_numbers<[1], [0], [0], [1], [0, 0, 1, 1], [], []>} : vector<16x8xf32>, vector<8x4xf32>, vector<16x4xf32> -> vector<16x4xf32>
    %c0_32 = arith.constant 0 : index
    %c240 = arith.constant 240 : index
    %37 = vector.load %arg2[%c0_32, %c240] : memref<32x1664xf32, #tpu.memory_space<vmem>>, vector<8x4xf32>
    %cst_33 = arith.constant dense<0.000000e+00> : vector<16x4xf32>
    %38 = tpu.matmul %26, %37, %cst_33 {dimension_numbers = #tpu.dot_dimension_numbers<[1], [0], [0], [1], [0, 0, 1, 1], [], []>} : vector<16x8xf32>, vector<8x4xf32>, vector<16x4xf32> -> vector<16x4xf32>
    %c0_34 = arith.constant 0 : index
    %c248 = arith.constant 248 : index
    %39 = vector.load %arg2[%c0_34, %c248] : memref<32x1664xf32, #tpu.memory_space<vmem>>, vector<8x4xf32>
    %cst_35 = arith.constant dense<0.000000e+00> : vector<16x4xf32>
    %40 = tpu.matmul %26, %39, %cst_35 {dimension_numbers = #tpu.dot_dimension_numbers<[1], [0], [0], [1], [0, 0, 1, 1], [], []>} : vector<16x8xf32>, vector<8x4xf32>, vector<16x4xf32> -> vector<16x4xf32>
    %c0_36 = arith.constant 0 : index
    %c256 = arith.constant 256 : index
    %41 = vector.load %arg2[%c0_36, %c256] : memref<32x1664xf32, #tpu.memory_space<vmem>>, vector<8x4xf32>
    %cst_37 = arith.constant dense<0.000000e+00> : vector<16x4xf32>
    %42 = tpu.matmul %26, %41, %cst_37 {dimension_numbers = #tpu.dot_dimension_numbers<[1], [0], [0], [1], [0, 0, 1, 1], [], []>} : vector<16x8xf32>, vector<8x4xf32>, vector<16x4xf32> -> vector<16x4xf32>
    %c0_38 = arith.constant 0 : index
    %c264 = arith.constant 264 : index
    %43 = vector.load %arg2[%c0_38, %c264] : memref<32x1664xf32, #tpu.memory_space<vmem>>, vector<32x128xf32>
    %44 = tpu.concatenate %28, %30, %32, %34, %36, %38, %40, %42 in 0 : vector<16x4xf32>, vector<16x4xf32>, vector<16x4xf32>, vector<16x4xf32>, vector<16x4xf32>, vector<16x4xf32>, vector<16x4xf32>, vector<16x4xf32> -> vector<128x4xf32>
    %cst_39 = arith.constant dense<0.000000e+00> : vector<32x4xf32>
    %45 = tpu.matmul %43, %44, %cst_39 {dimension_numbers = #tpu.dot_dimension_numbers<[1], [0], [0], [1], [0, 0, 1, 1], [], []>} : vector<32x128xf32>, vector<128x4xf32>, vector<32x4xf32> -> vector<32x4xf32>
    %c0_40 = arith.constant 0 : index
    %c392 = arith.constant 392 : index
    %46 = vector.load %arg2[%c0_40, %c392] : memref<32x1664xf32, #tpu.memory_space<vmem>>, vector<32x1xf32>
    %47 = vector.broadcast %46 : vector<32x1xf32> to vector<32x4xf32>
    %48 = arith.addf %45, %47 : vector<32x4xf32>
    %cst_41 = arith.constant 2.000000e-01 : f32
    %49 = vector.broadcast %cst_41 : f32 to vector<32x4xf32>
    %50 = arith.mulf %49, %48 : vector<32x4xf32>
    %51 = arith.maximumf %48, %50 : vector<32x4xf32>
    %52 = vector.extract_strided_slice %1 {offsets = [0, 0], sizes = [8, 16], strides = [1, 1]} : vector<16x16xf32> to vector<8x16xf32>
    %c0_42 = arith.constant 0 : index
    %c464 = arith.constant 464 : index
    %53 = vector.load %arg2[%c0_42, %c464] : memref<32x1664xf32, #tpu.memory_space<vmem>>, vector<16x16xf32>
    %cst_43 = arith.constant dense<0.000000e+00> : vector<8x16xf32>
    %54 = tpu.matmul %52, %53, %cst_43 {dimension_numbers = #tpu.dot_dimension_numbers<[1], [0], [0], [1], [0, 0, 1, 1], [], []>} : vector<8x16xf32>, vector<16x16xf32>, vector<8x16xf32> -> vector<8x16xf32>
    %c0_44 = arith.constant 0 : index
    %c480 = arith.constant 480 : index
    %55 = vector.load %arg2[%c0_44, %c480] : memref<32x1664xf32, #tpu.memory_space<vmem>>, vector<16x16xf32>
    %cst_45 = arith.constant dense<0.000000e+00> : vector<8x16xf32>
    %56 = tpu.matmul %52, %55, %cst_45 {dimension_numbers = #tpu.dot_dimension_numbers<[1], [0], [0], [1], [0, 0, 1, 1], [], []>} : vector<8x16xf32>, vector<16x16xf32>, vector<8x16xf32> -> vector<8x16xf32>
    %c0_46 = arith.constant 0 : index
    %c496 = arith.constant 496 : index
    %57 = vector.load %arg2[%c0_46, %c496] : memref<32x1664xf32, #tpu.memory_space<vmem>>, vector<16x16xf32>
    %cst_47 = arith.constant dense<0.000000e+00> : vector<8x16xf32>
    %58 = tpu.matmul %52, %57, %cst_47 {dimension_numbers = #tpu.dot_dimension_numbers<[1], [0], [0], [1], [0, 0, 1, 1], [], []>} : vector<8x16xf32>, vector<16x16xf32>, vector<8x16xf32> -> vector<8x16xf32>
    %c0_48 = arith.constant 0 : index
    %c512 = arith.constant 512 : index
    %59 = vector.load %arg2[%c0_48, %c512] : memref<32x1664xf32, #tpu.memory_space<vmem>>, vector<16x16xf32>
    %cst_49 = arith.constant dense<0.000000e+00> : vector<8x16xf32>
    %60 = tpu.matmul %52, %59, %cst_49 {dimension_numbers = #tpu.dot_dimension_numbers<[1], [0], [0], [1], [0, 0, 1, 1], [], []>} : vector<8x16xf32>, vector<16x16xf32>, vector<8x16xf32> -> vector<8x16xf32>
    %c0_50 = arith.constant 0 : index
    %c528 = arith.constant 528 : index
    %61 = vector.load %arg2[%c0_50, %c528] : memref<32x1664xf32, #tpu.memory_space<vmem>>, vector<16x16xf32>
    %cst_51 = arith.constant dense<0.000000e+00> : vector<8x16xf32>
    %62 = tpu.matmul %52, %61, %cst_51 {dimension_numbers = #tpu.dot_dimension_numbers<[1], [0], [0], [1], [0, 0, 1, 1], [], []>} : vector<8x16xf32>, vector<16x16xf32>, vector<8x16xf32> -> vector<8x16xf32>
    %c0_52 = arith.constant 0 : index
    %c544 = arith.constant 544 : index
    %63 = vector.load %arg2[%c0_52, %c544] : memref<32x1664xf32, #tpu.memory_space<vmem>>, vector<16x16xf32>
    %cst_53 = arith.constant dense<0.000000e+00> : vector<8x16xf32>
    %64 = tpu.matmul %52, %63, %cst_53 {dimension_numbers = #tpu.dot_dimension_numbers<[1], [0], [0], [1], [0, 0, 1, 1], [], []>} : vector<8x16xf32>, vector<16x16xf32>, vector<8x16xf32> -> vector<8x16xf32>
    %c0_54 = arith.constant 0 : index
    %c560 = arith.constant 560 : index
    %65 = vector.load %arg2[%c0_54, %c560] : memref<32x1664xf32, #tpu.memory_space<vmem>>, vector<16x16xf32>
    %cst_55 = arith.constant dense<0.000000e+00> : vector<8x16xf32>
    %66 = tpu.matmul %52, %65, %cst_55 {dimension_numbers = #tpu.dot_dimension_numbers<[1], [0], [0], [1], [0, 0, 1, 1], [], []>} : vector<8x16xf32>, vector<16x16xf32>, vector<8x16xf32> -> vector<8x16xf32>
    %c0_56 = arith.constant 0 : index
    %c400 = arith.constant 400 : index
    %67 = vector.load %arg2[%c0_56, %c400] : memref<32x1664xf32, #tpu.memory_space<vmem>>, vector<32x56xf32>
    %68 = tpu.concatenate %54, %56, %58, %60, %62, %64, %66 in 0 : vector<8x16xf32>, vector<8x16xf32>, vector<8x16xf32>, vector<8x16xf32>, vector<8x16xf32>, vector<8x16xf32>, vector<8x16xf32> -> vector<56x16xf32>
    %cst_57 = arith.constant dense<0.000000e+00> : vector<32x16xf32>
    %69 = tpu.matmul %67, %68, %cst_57 {dimension_numbers = #tpu.dot_dimension_numbers<[1], [0], [0], [1], [0, 0, 1, 1], [], []>} : vector<32x56xf32>, vector<56x16xf32>, vector<32x16xf32> -> vector<32x16xf32>
    %c0_58 = arith.constant 0 : index
    %c456 = arith.constant 456 : index
    %70 = vector.load %arg2[%c0_58, %c456] : memref<32x1664xf32, #tpu.memory_space<vmem>>, vector<32x1xf32>
    %71 = vector.broadcast %70 : vector<32x1xf32> to vector<32x16xf32>
    %72 = arith.addf %69, %71 : vector<32x16xf32>
    %cst_59 = arith.constant 2.000000e-01 : f32
    %73 = vector.broadcast %cst_59 : f32 to vector<32x16xf32>
    %74 = arith.mulf %73, %72 : vector<32x16xf32>
    %75 = arith.maximumf %72, %74 : vector<32x16xf32>
    %76 = vector.extract_strided_slice %75 {offsets = [0, 0], sizes = [16, 16], strides = [1, 1]} : vector<32x16xf32> to vector<16x16xf32>
    %77 = vector.extract_strided_slice %75 {offsets = [16, 0], sizes = [16, 16], strides = [1, 1]} : vector<32x16xf32> to vector<16x16xf32>
    %c0_60 = arith.constant 0 : index
    %c576 = arith.constant 576 : index
    %78 = vector.load %arg2[%c0_60, %c576] : memref<32x1664xf32, #tpu.memory_space<vmem>>, vector<16x8xf32>
    %cst_61 = arith.constant dense<0.000000e+00> : vector<16x8xf32>
    %79 = tpu.matmul %76, %78, %cst_61 {dimension_numbers = #tpu.dot_dimension_numbers<[1], [0], [0], [1], [0, 0, 1, 1], [], []>} : vector<16x16xf32>, vector<16x8xf32>, vector<16x8xf32> -> vector<16x8xf32>
    %c0_62 = arith.constant 0 : index
    %c584 = arith.constant 584 : index
    %80 = vector.load %arg2[%c0_62, %c584] : memref<32x1664xf32, #tpu.memory_space<vmem>>, vector<16x8xf32>
    %cst_63 = arith.constant dense<0.000000e+00> : vector<16x8xf32>
    %81 = tpu.matmul %76, %80, %cst_63 {dimension_numbers = #tpu.dot_dimension_numbers<[1], [0], [0], [1], [0, 0, 1, 1], [], []>} : vector<16x16xf32>, vector<16x8xf32>, vector<16x8xf32> -> vector<16x8xf32>
    %82 = arith.maximumf %79, %81 : vector<16x8xf32>
    %c0_64 = arith.constant 0 : index
    %c712 = arith.constant 712 : index
    %83 = vector.load %arg2[%c0_64, %c712] : memref<32x1664xf32, #tpu.memory_space<vmem>>, vector<8x8xf32>
    %cst_65 = arith.constant dense<0.000000e+00> : vector<16x8xf32>
    %84 = tpu.matmul %82, %83, %cst_65 {dimension_numbers = #tpu.dot_dimension_numbers<[1], [0], [0], [1], [0, 0, 1, 1], [], []>} : vector<16x8xf32>, vector<8x8xf32>, vector<16x8xf32> -> vector<16x8xf32>
    %c0_66 = arith.constant 0 : index
    %c720 = arith.constant 720 : index
    %85 = vector.load %arg2[%c0_66, %c720] : memref<32x1664xf32, #tpu.memory_space<vmem>>, vector<8x8xf32>
    %cst_67 = arith.constant dense<0.000000e+00> : vector<16x8xf32>
    %86 = tpu.matmul %82, %85, %cst_67 {dimension_numbers = #tpu.dot_dimension_numbers<[1], [0], [0], [1], [0, 0, 1, 1], [], []>} : vector<16x8xf32>, vector<8x8xf32>, vector<16x8xf32> -> vector<16x8xf32>
    %c0_68 = arith.constant 0 : index
    %c728 = arith.constant 728 : index
    %87 = vector.load %arg2[%c0_68, %c728] : memref<32x1664xf32, #tpu.memory_space<vmem>>, vector<8x8xf32>
    %cst_69 = arith.constant dense<0.000000e+00> : vector<16x8xf32>
    %88 = tpu.matmul %82, %87, %cst_69 {dimension_numbers = #tpu.dot_dimension_numbers<[1], [0], [0], [1], [0, 0, 1, 1], [], []>} : vector<16x8xf32>, vector<8x8xf32>, vector<16x8xf32> -> vector<16x8xf32>
    %c0_70 = arith.constant 0 : index
    %c736 = arith.constant 736 : index
    %89 = vector.load %arg2[%c0_70, %c736] : memref<32x1664xf32, #tpu.memory_space<vmem>>, vector<8x8xf32>
    %cst_71 = arith.constant dense<0.000000e+00> : vector<16x8xf32>
    %90 = tpu.matmul %82, %89, %cst_71 {dimension_numbers = #tpu.dot_dimension_numbers<[1], [0], [0], [1], [0, 0, 1, 1], [], []>} : vector<16x8xf32>, vector<8x8xf32>, vector<16x8xf32> -> vector<16x8xf32>
    %c0_72 = arith.constant 0 : index
    %c744 = arith.constant 744 : index
    %91 = vector.load %arg2[%c0_72, %c744] : memref<32x1664xf32, #tpu.memory_space<vmem>>, vector<8x8xf32>
    %cst_73 = arith.constant dense<0.000000e+00> : vector<16x8xf32>
    %92 = tpu.matmul %82, %91, %cst_73 {dimension_numbers = #tpu.dot_dimension_numbers<[1], [0], [0], [1], [0, 0, 1, 1], [], []>} : vector<16x8xf32>, vector<8x8xf32>, vector<16x8xf32> -> vector<16x8xf32>
    %c0_74 = arith.constant 0 : index
    %c752 = arith.constant 752 : index
    %93 = vector.load %arg2[%c0_74, %c752] : memref<32x1664xf32, #tpu.memory_space<vmem>>, vector<8x8xf32>
    %cst_75 = arith.constant dense<0.000000e+00> : vector<16x8xf32>
    %94 = tpu.matmul %82, %93, %cst_75 {dimension_numbers = #tpu.dot_dimension_numbers<[1], [0], [0], [1], [0, 0, 1, 1], [], []>} : vector<16x8xf32>, vector<8x8xf32>, vector<16x8xf32> -> vector<16x8xf32>
    %c0_76 = arith.constant 0 : index
    %c760 = arith.constant 760 : index
    %95 = vector.load %arg2[%c0_76, %c760] : memref<32x1664xf32, #tpu.memory_space<vmem>>, vector<8x8xf32>
    %cst_77 = arith.constant dense<0.000000e+00> : vector<16x8xf32>
    %96 = tpu.matmul %82, %95, %cst_77 {dimension_numbers = #tpu.dot_dimension_numbers<[1], [0], [0], [1], [0, 0, 1, 1], [], []>} : vector<16x8xf32>, vector<8x8xf32>, vector<16x8xf32> -> vector<16x8xf32>
    %c0_78 = arith.constant 0 : index
    %c592 = arith.constant 592 : index
    %97 = vector.load %arg2[%c0_78, %c592] : memref<32x1664xf32, #tpu.memory_space<vmem>>, vector<24x112xf32>
    %98 = tpu.concatenate %84, %86, %88, %90, %92, %94, %96 in 0 : vector<16x8xf32>, vector<16x8xf32>, vector<16x8xf32>, vector<16x8xf32>, vector<16x8xf32>, vector<16x8xf32>, vector<16x8xf32> -> vector<112x8xf32>
    %cst_79 = arith.constant dense<0.000000e+00> : vector<24x8xf32>
    %99 = tpu.matmul %97, %98, %cst_79 {dimension_numbers = #tpu.dot_dimension_numbers<[1], [0], [0], [1], [0, 0, 1, 1], [], []>} : vector<24x112xf32>, vector<112x8xf32>, vector<24x8xf32> -> vector<24x8xf32>
    %c0_80 = arith.constant 0 : index
    %c704 = arith.constant 704 : index
    %100 = vector.load %arg2[%c0_80, %c704] : memref<32x1664xf32, #tpu.memory_space<vmem>>, vector<24x1xf32>
    %101 = vector.broadcast %100 : vector<24x1xf32> to vector<24x8xf32>
    %102 = arith.addf %99, %101 : vector<24x8xf32>
    %cst_81 = arith.constant 2.000000e-01 : f32
    %103 = vector.broadcast %cst_81 : f32 to vector<24x8xf32>
    %104 = arith.mulf %103, %102 : vector<24x8xf32>
    %105 = arith.maximumf %102, %104 : vector<24x8xf32>
    %c0_82 = arith.constant 0 : index
    %c768 = arith.constant 768 : index
    %106 = vector.load %arg2[%c0_82, %c768] : memref<32x1664xf32, #tpu.memory_space<vmem>>, vector<8x4xf32>
    %cst_83 = arith.constant dense<0.000000e+00> : vector<24x4xf32>
    %107 = tpu.matmul %105, %106, %cst_83 {dimension_numbers = #tpu.dot_dimension_numbers<[1], [0], [0], [1], [0, 0, 1, 1], [], []>} : vector<24x8xf32>, vector<8x4xf32>, vector<24x4xf32> -> vector<24x4xf32>
    %c0_84 = arith.constant 0 : index
    %c776 = arith.constant 776 : index
    %108 = vector.load %arg2[%c0_84, %c776] : memref<32x1664xf32, #tpu.memory_space<vmem>>, vector<8x4xf32>
    %cst_85 = arith.constant dense<0.000000e+00> : vector<24x4xf32>
    %109 = tpu.matmul %105, %108, %cst_85 {dimension_numbers = #tpu.dot_dimension_numbers<[1], [0], [0], [1], [0, 0, 1, 1], [], []>} : vector<24x8xf32>, vector<8x4xf32>, vector<24x4xf32> -> vector<24x4xf32>
    %110 = arith.maximumf %107, %109 : vector<24x4xf32>
    %c0_86 = arith.constant 0 : index
    %c784 = arith.constant 784 : index
    %111 = vector.load %arg2[%c0_86, %c784] : memref<32x1664xf32, #tpu.memory_space<vmem>>, vector<4x2xf32>
    %cst_87 = arith.constant dense<0.000000e+00> : vector<24x2xf32>
    %112 = tpu.matmul %110, %111, %cst_87 {dimension_numbers = #tpu.dot_dimension_numbers<[1], [0], [0], [1], [0, 0, 1, 1], [], []>} : vector<24x4xf32>, vector<4x2xf32>, vector<24x2xf32> -> vector<24x2xf32>
    %c0_88 = arith.constant 0 : index
    %c792 = arith.constant 792 : index
    %113 = vector.load %arg2[%c0_88, %c792] : memref<32x1664xf32, #tpu.memory_space<vmem>>, vector<4x2xf32>
    %cst_89 = arith.constant dense<0.000000e+00> : vector<24x2xf32>
    %114 = tpu.matmul %110, %113, %cst_89 {dimension_numbers = #tpu.dot_dimension_numbers<[1], [0], [0], [1], [0, 0, 1, 1], [], []>} : vector<24x4xf32>, vector<4x2xf32>, vector<24x2xf32> -> vector<24x2xf32>
    %115 = arith.maximumf %112, %114 : vector<24x2xf32>
    %c0_90 = arith.constant 0 : index
    %c800 = arith.constant 800 : index
    %116 = vector.load %arg2[%c0_90, %c800] : memref<32x1664xf32, #tpu.memory_space<vmem>>, vector<2x1xf32>
    %cst_91 = arith.constant dense<0.000000e+00> : vector<24x1xf32>
    %117 = tpu.matmul %115, %116, %cst_91 {dimension_numbers = #tpu.dot_dimension_numbers<[1], [0], [0], [1], [0, 0, 1, 1], [], []>} : vector<24x2xf32>, vector<2x1xf32>, vector<24x1xf32> -> vector<24x1xf32>
    %c0_92 = arith.constant 0 : index
    %c808 = arith.constant 808 : index
    %118 = vector.load %arg2[%c0_92, %c808] : memref<32x1664xf32, #tpu.memory_space<vmem>>, vector<2x1xf32>
    %cst_93 = arith.constant dense<0.000000e+00> : vector<24x1xf32>
    %119 = tpu.matmul %115, %118, %cst_93 {dimension_numbers = #tpu.dot_dimension_numbers<[1], [0], [0], [1], [0, 0, 1, 1], [], []>} : vector<24x2xf32>, vector<2x1xf32>, vector<24x1xf32> -> vector<24x1xf32>
    %120 = arith.maximumf %117, %119 : vector<24x1xf32>
    %c0_94 = arith.constant 0 : index
    %c816 = arith.constant 816 : index
    %121 = vector.load %arg2[%c0_94, %c816] : memref<32x1664xf32, #tpu.memory_space<vmem>>, vector<8x24xf32>
    %cst_95 = arith.constant dense<0.000000e+00> : vector<8x1xf32>
    %122 = tpu.matmul %121, %120, %cst_95 {dimension_numbers = #tpu.dot_dimension_numbers<[1], [0], [0], [1], [0, 0, 1, 1], [], []>} : vector<8x24xf32>, vector<24x1xf32>, vector<8x1xf32> -> vector<8x1xf32>
    %c0_96 = arith.constant 0 : index
    %c840 = arith.constant 840 : index
    %123 = vector.load %arg2[%c0_96, %c840] : memref<32x1664xf32, #tpu.memory_space<vmem>>, vector<8x1xf32>
    %124 = arith.addf %122, %123 : vector<8x1xf32>
    %c0_97 = arith.constant 0 : index
    %c848 = arith.constant 848 : index
    %125 = vector.load %arg2[%c0_97, %c848] : memref<32x1664xf32, #tpu.memory_space<vmem>>, vector<16x8xf32>
    %cst_98 = arith.constant dense<0.000000e+00> : vector<16x8xf32>
    %126 = tpu.matmul %77, %125, %cst_98 {dimension_numbers = #tpu.dot_dimension_numbers<[1], [0], [0], [1], [0, 0, 1, 1], [], []>} : vector<16x16xf32>, vector<16x8xf32>, vector<16x8xf32> -> vector<16x8xf32>
    %cst_99 = arith.constant dense<0.000000e+00> : vector<16x8xf32>
    %127 = tpu.matmul %126, %83, %cst_99 {dimension_numbers = #tpu.dot_dimension_numbers<[1], [0], [0], [1], [0, 0, 1, 1], [], []>} : vector<16x8xf32>, vector<8x8xf32>, vector<16x8xf32> -> vector<16x8xf32>
    %cst_100 = arith.constant dense<0.000000e+00> : vector<16x8xf32>
    %128 = tpu.matmul %126, %85, %cst_100 {dimension_numbers = #tpu.dot_dimension_numbers<[1], [0], [0], [1], [0, 0, 1, 1], [], []>} : vector<16x8xf32>, vector<8x8xf32>, vector<16x8xf32> -> vector<16x8xf32>
    %cst_101 = arith.constant dense<0.000000e+00> : vector<16x8xf32>
    %129 = tpu.matmul %126, %87, %cst_101 {dimension_numbers = #tpu.dot_dimension_numbers<[1], [0], [0], [1], [0, 0, 1, 1], [], []>} : vector<16x8xf32>, vector<8x8xf32>, vector<16x8xf32> -> vector<16x8xf32>
    %cst_102 = arith.constant dense<0.000000e+00> : vector<16x8xf32>
    %130 = tpu.matmul %126, %89, %cst_102 {dimension_numbers = #tpu.dot_dimension_numbers<[1], [0], [0], [1], [0, 0, 1, 1], [], []>} : vector<16x8xf32>, vector<8x8xf32>, vector<16x8xf32> -> vector<16x8xf32>
    %cst_103 = arith.constant dense<0.000000e+00> : vector<16x8xf32>
    %131 = tpu.matmul %126, %91, %cst_103 {dimension_numbers = #tpu.dot_dimension_numbers<[1], [0], [0], [1], [0, 0, 1, 1], [], []>} : vector<16x8xf32>, vector<8x8xf32>, vector<16x8xf32> -> vector<16x8xf32>
    %cst_104 = arith.constant dense<0.000000e+00> : vector<16x8xf32>
    %132 = tpu.matmul %126, %93, %cst_104 {dimension_numbers = #tpu.dot_dimension_numbers<[1], [0], [0], [1], [0, 0, 1, 1], [], []>} : vector<16x8xf32>, vector<8x8xf32>, vector<16x8xf32> -> vector<16x8xf32>
    %cst_105 = arith.constant dense<0.000000e+00> : vector<16x8xf32>
    %133 = tpu.matmul %126, %95, %cst_105 {dimension_numbers = #tpu.dot_dimension_numbers<[1], [0], [0], [1], [0, 0, 1, 1], [], []>} : vector<16x8xf32>, vector<8x8xf32>, vector<16x8xf32> -> vector<16x8xf32>
    %c0_106 = arith.constant 0 : index
    %c856 = arith.constant 856 : index
    %134 = vector.load %arg2[%c0_106, %c856] : memref<32x1664xf32, #tpu.memory_space<vmem>>, vector<24x112xf32>
    %135 = tpu.concatenate %127, %128, %129, %130, %131, %132, %133 in 0 : vector<16x8xf32>, vector<16x8xf32>, vector<16x8xf32>, vector<16x8xf32>, vector<16x8xf32>, vector<16x8xf32>, vector<16x8xf32> -> vector<112x8xf32>
    %cst_107 = arith.constant dense<0.000000e+00> : vector<24x8xf32>
    %136 = tpu.matmul %134, %135, %cst_107 {dimension_numbers = #tpu.dot_dimension_numbers<[1], [0], [0], [1], [0, 0, 1, 1], [], []>} : vector<24x112xf32>, vector<112x8xf32>, vector<24x8xf32> -> vector<24x8xf32>
    %c0_108 = arith.constant 0 : index
    %c968 = arith.constant 968 : index
    %137 = vector.load %arg2[%c0_108, %c968] : memref<32x1664xf32, #tpu.memory_space<vmem>>, vector<24x1xf32>
    %138 = vector.broadcast %137 : vector<24x1xf32> to vector<24x8xf32>
    %139 = arith.addf %136, %138 : vector<24x8xf32>
    %cst_109 = arith.constant 2.000000e-01 : f32
    %140 = vector.broadcast %cst_109 : f32 to vector<24x8xf32>
    %141 = arith.mulf %140, %139 : vector<24x8xf32>
    %142 = arith.maximumf %139, %141 : vector<24x8xf32>
    %c0_110 = arith.constant 0 : index
    %c976 = arith.constant 976 : index
    %143 = vector.load %arg2[%c0_110, %c976] : memref<32x1664xf32, #tpu.memory_space<vmem>>, vector<8x4xf32>
    %cst_111 = arith.constant dense<0.000000e+00> : vector<24x4xf32>
    %144 = tpu.matmul %142, %143, %cst_111 {dimension_numbers = #tpu.dot_dimension_numbers<[1], [0], [0], [1], [0, 0, 1, 1], [], []>} : vector<24x8xf32>, vector<8x4xf32>, vector<24x4xf32> -> vector<24x4xf32>
    %c0_112 = arith.constant 0 : index
    %c984 = arith.constant 984 : index
    %145 = vector.load %arg2[%c0_112, %c984] : memref<32x1664xf32, #tpu.memory_space<vmem>>, vector<4x1xf32>
    %cst_113 = arith.constant dense<0.000000e+00> : vector<24x1xf32>
    %146 = tpu.matmul %144, %145, %cst_113 {dimension_numbers = #tpu.dot_dimension_numbers<[1], [0], [0], [1], [0, 0, 1, 1], [], []>} : vector<24x4xf32>, vector<4x1xf32>, vector<24x1xf32> -> vector<24x1xf32>
    %c0_114 = arith.constant 0 : index
    %c992 = arith.constant 992 : index
    %147 = vector.load %arg2[%c0_114, %c992] : memref<32x1664xf32, #tpu.memory_space<vmem>>, vector<8x24xf32>
    %cst_115 = arith.constant dense<0.000000e+00> : vector<8x1xf32>
    %148 = tpu.matmul %147, %146, %cst_115 {dimension_numbers = #tpu.dot_dimension_numbers<[1], [0], [0], [1], [0, 0, 1, 1], [], []>} : vector<8x24xf32>, vector<24x1xf32>, vector<8x1xf32> -> vector<8x1xf32>
    %c0_116 = arith.constant 0 : index
    %c1016 = arith.constant 1016 : index
    %149 = vector.load %arg2[%c0_116, %c1016] : memref<32x1664xf32, #tpu.memory_space<vmem>>, vector<8x1xf32>
    %150 = arith.addf %148, %149 : vector<8x1xf32>
    %c0_117 = arith.constant 0 : index
    %c1032 = arith.constant 1032 : index
    %151 = vector.load %arg2[%c0_117, %c1032] : memref<32x1664xf32, #tpu.memory_space<vmem>>, vector<4x8xf32>
    %cst_118 = arith.constant dense<0.000000e+00> : vector<32x8xf32>
    %152 = tpu.matmul %51, %151, %cst_118 {dimension_numbers = #tpu.dot_dimension_numbers<[1], [0], [0], [1], [0, 0, 1, 1], [], []>} : vector<32x4xf32>, vector<4x8xf32>, vector<32x8xf32> -> vector<32x8xf32>
    %c0_119 = arith.constant 0 : index
    %c1040 = arith.constant 1040 : index
    %153 = vector.load %arg2[%c0_119, %c1040] : memref<32x1664xf32, #tpu.memory_space<vmem>>, vector<4x8xf32>
    %cst_120 = arith.constant dense<0.000000e+00> : vector<32x8xf32>
    %154 = tpu.matmul %51, %153, %cst_120 {dimension_numbers = #tpu.dot_dimension_numbers<[1], [0], [0], [1], [0, 0, 1, 1], [], []>} : vector<32x4xf32>, vector<4x8xf32>, vector<32x8xf32> -> vector<32x8xf32>
    %c0_121 = arith.constant 0 : index
    %c1048 = arith.constant 1048 : index
    %155 = vector.load %arg2[%c0_121, %c1048] : memref<32x1664xf32, #tpu.memory_space<vmem>>, vector<4x8xf32>
    %cst_122 = arith.constant dense<0.000000e+00> : vector<32x8xf32>
    %156 = tpu.matmul %51, %155, %cst_122 {dimension_numbers = #tpu.dot_dimension_numbers<[1], [0], [0], [1], [0, 0, 1, 1], [], []>} : vector<32x4xf32>, vector<4x8xf32>, vector<32x8xf32> -> vector<32x8xf32>
    %c0_123 = arith.constant 0 : index
    %c1056 = arith.constant 1056 : index
    %157 = vector.load %arg2[%c0_123, %c1056] : memref<32x1664xf32, #tpu.memory_space<vmem>>, vector<4x8xf32>
    %cst_124 = arith.constant dense<0.000000e+00> : vector<32x8xf32>
    %158 = tpu.matmul %51, %157, %cst_124 {dimension_numbers = #tpu.dot_dimension_numbers<[1], [0], [0], [1], [0, 0, 1, 1], [], []>} : vector<32x4xf32>, vector<4x8xf32>, vector<32x8xf32> -> vector<32x8xf32>
    %c0_125 = arith.constant 0 : index
    %c1064 = arith.constant 1064 : index
    %159 = vector.load %arg2[%c0_125, %c1064] : memref<32x1664xf32, #tpu.memory_space<vmem>>, vector<4x8xf32>
    %cst_126 = arith.constant dense<0.000000e+00> : vector<32x8xf32>
    %160 = tpu.matmul %51, %159, %cst_126 {dimension_numbers = #tpu.dot_dimension_numbers<[1], [0], [0], [1], [0, 0, 1, 1], [], []>} : vector<32x4xf32>, vector<4x8xf32>, vector<32x8xf32> -> vector<32x8xf32>
    %c0_127 = arith.constant 0 : index
    %c1072 = arith.constant 1072 : index
    %161 = vector.load %arg2[%c0_127, %c1072] : memref<32x1664xf32, #tpu.memory_space<vmem>>, vector<4x8xf32>
    %cst_128 = arith.constant dense<0.000000e+00> : vector<32x8xf32>
    %162 = tpu.matmul %51, %161, %cst_128 {dimension_numbers = #tpu.dot_dimension_numbers<[1], [0], [0], [1], [0, 0, 1, 1], [], []>} : vector<32x4xf32>, vector<4x8xf32>, vector<32x8xf32> -> vector<32x8xf32>
    %c0_129 = arith.constant 0 : index
    %c1080 = arith.constant 1080 : index
    %163 = vector.load %arg2[%c0_129, %c1080] : memref<32x1664xf32, #tpu.memory_space<vmem>>, vector<4x8xf32>
    %cst_130 = arith.constant dense<0.000000e+00> : vector<32x8xf32>
    %164 = tpu.matmul %51, %163, %cst_130 {dimension_numbers = #tpu.dot_dimension_numbers<[1], [0], [0], [1], [0, 0, 1, 1], [], []>} : vector<32x4xf32>, vector<4x8xf32>, vector<32x8xf32> -> vector<32x8xf32>
    %c0_131 = arith.constant 0 : index
    %c1088 = arith.constant 1088 : index
    %165 = vector.load %arg2[%c0_131, %c1088] : memref<32x1664xf32, #tpu.memory_space<vmem>>, vector<24x224xf32>
    %166 = tpu.concatenate %152, %154, %156, %158, %160, %162, %164 in 0 : vector<32x8xf32>, vector<32x8xf32>, vector<32x8xf32>, vector<32x8xf32>, vector<32x8xf32>, vector<32x8xf32>, vector<32x8xf32> -> vector<224x8xf32>
    %cst_132 = arith.constant dense<0.000000e+00> : vector<24x8xf32>
    %167 = tpu.matmul %165, %166, %cst_132 {dimension_numbers = #tpu.dot_dimension_numbers<[1], [0], [0], [1], [0, 0, 1, 1], [], []>} : vector<24x224xf32>, vector<224x8xf32>, vector<24x8xf32> -> vector<24x8xf32>
    %c0_133 = arith.constant 0 : index
    %c1312 = arith.constant 1312 : index
    %168 = vector.load %arg2[%c0_133, %c1312] : memref<32x1664xf32, #tpu.memory_space<vmem>>, vector<24x8xf32>
    %cst_134 = arith.constant dense<0.000000e+00> : vector<24x1xf32>
    %169 = tpu.matmul %168, %124, %cst_134 {dimension_numbers = #tpu.dot_dimension_numbers<[1], [0], [0], [1], [0, 0, 1, 1], [], []>} : vector<24x8xf32>, vector<8x1xf32>, vector<24x1xf32> -> vector<24x1xf32>
    %c0_135 = arith.constant 0 : index
    %c1320 = arith.constant 1320 : index
    %170 = vector.load %arg2[%c0_135, %c1320] : memref<32x1664xf32, #tpu.memory_space<vmem>>, vector<24x8xf32>
    %cst_136 = arith.constant dense<0.000000e+00> : vector<24x1xf32>
    %171 = tpu.matmul %170, %150, %cst_136 {dimension_numbers = #tpu.dot_dimension_numbers<[1], [0], [0], [1], [0, 0, 1, 1], [], []>} : vector<24x8xf32>, vector<8x1xf32>, vector<24x1xf32> -> vector<24x1xf32>
    %172 = arith.addf %169, %171 : vector<24x1xf32>
    %c0_137 = arith.constant 0 : index
    %c1024 = arith.constant 1024 : index
    %173 = vector.load %arg2[%c0_137, %c1024] : memref<32x1664xf32, #tpu.memory_space<vmem>>, vector<24x1xf32>
    %174 = arith.addf %172, %173 : vector<24x1xf32>
    %c0_138 = arith.constant 0 : index
    %c1328 = arith.constant 1328 : index
    %175 = vector.load %arg2[%c0_138, %c1328] : memref<32x1664xf32, #tpu.memory_space<vmem>>, vector<1x8xf32>
    %cst_139 = arith.constant dense<0.000000e+00> : vector<24x8xf32>
    %176 = tpu.matmul %174, %175, %cst_139 {dimension_numbers = #tpu.dot_dimension_numbers<[1], [0], [0], [1], [0, 0, 1, 1], [], []>} : vector<24x1xf32>, vector<1x8xf32>, vector<24x8xf32> -> vector<24x8xf32>
    %177 = arith.addf %167, %176 : vector<24x8xf32>
    %cst_140 = arith.constant 2.000000e-01 : f32
    %178 = vector.broadcast %cst_140 : f32 to vector<24x8xf32>
    %179 = arith.mulf %178, %177 : vector<24x8xf32>
    %180 = arith.maximumf %177, %179 : vector<24x8xf32>
    %c0_141 = arith.constant 0 : index
    %c1344 = arith.constant 1344 : index
    %181 = vector.load %arg2[%c0_141, %c1344] : memref<32x1664xf32, #tpu.memory_space<vmem>>, vector<8x16xf32>
    %cst_142 = arith.constant dense<0.000000e+00> : vector<24x16xf32>
    %182 = tpu.matmul %180, %181, %cst_142 {dimension_numbers = #tpu.dot_dimension_numbers<[1], [0], [0], [1], [0, 0, 1, 1], [], []>} : vector<24x8xf32>, vector<8x16xf32>, vector<24x16xf32> -> vector<24x16xf32>
    %c0_143 = arith.constant 0 : index
    %c1360 = arith.constant 1360 : index
    %183 = vector.load %arg2[%c0_143, %c1360] : memref<32x1664xf32, #tpu.memory_space<vmem>>, vector<8x16xf32>
    %cst_144 = arith.constant dense<0.000000e+00> : vector<24x16xf32>
    %184 = tpu.matmul %180, %183, %cst_144 {dimension_numbers = #tpu.dot_dimension_numbers<[1], [0], [0], [1], [0, 0, 1, 1], [], []>} : vector<24x8xf32>, vector<8x16xf32>, vector<24x16xf32> -> vector<24x16xf32>
    %c0_145 = arith.constant 0 : index
    %c1376 = arith.constant 1376 : index
    %185 = vector.load %arg2[%c0_145, %c1376] : memref<32x1664xf32, #tpu.memory_space<vmem>>, vector<8x16xf32>
    %cst_146 = arith.constant dense<0.000000e+00> : vector<24x16xf32>
    %186 = tpu.matmul %180, %185, %cst_146 {dimension_numbers = #tpu.dot_dimension_numbers<[1], [0], [0], [1], [0, 0, 1, 1], [], []>} : vector<24x8xf32>, vector<8x16xf32>, vector<24x16xf32> -> vector<24x16xf32>
    %c0_147 = arith.constant 0 : index
    %c1392 = arith.constant 1392 : index
    %187 = vector.load %arg2[%c0_147, %c1392] : memref<32x1664xf32, #tpu.memory_space<vmem>>, vector<8x16xf32>
    %cst_148 = arith.constant dense<0.000000e+00> : vector<24x16xf32>
    %188 = tpu.matmul %180, %187, %cst_148 {dimension_numbers = #tpu.dot_dimension_numbers<[1], [0], [0], [1], [0, 0, 1, 1], [], []>} : vector<24x8xf32>, vector<8x16xf32>, vector<24x16xf32> -> vector<24x16xf32>
    %c0_149 = arith.constant 0 : index
    %c1408 = arith.constant 1408 : index
    %189 = vector.load %arg2[%c0_149, %c1408] : memref<32x1664xf32, #tpu.memory_space<vmem>>, vector<8x16xf32>
    %cst_150 = arith.constant dense<0.000000e+00> : vector<24x16xf32>
    %190 = tpu.matmul %180, %189, %cst_150 {dimension_numbers = #tpu.dot_dimension_numbers<[1], [0], [0], [1], [0, 0, 1, 1], [], []>} : vector<24x8xf32>, vector<8x16xf32>, vector<24x16xf32> -> vector<24x16xf32>
    %c0_151 = arith.constant 0 : index
    %c1424 = arith.constant 1424 : index
    %191 = vector.load %arg2[%c0_151, %c1424] : memref<32x1664xf32, #tpu.memory_space<vmem>>, vector<8x16xf32>
    %cst_152 = arith.constant dense<0.000000e+00> : vector<24x16xf32>
    %192 = tpu.matmul %180, %191, %cst_152 {dimension_numbers = #tpu.dot_dimension_numbers<[1], [0], [0], [1], [0, 0, 1, 1], [], []>} : vector<24x8xf32>, vector<8x16xf32>, vector<24x16xf32> -> vector<24x16xf32>
    %c0_153 = arith.constant 0 : index
    %c1440 = arith.constant 1440 : index
    %193 = vector.load %arg2[%c0_153, %c1440] : memref<32x1664xf32, #tpu.memory_space<vmem>>, vector<8x16xf32>
    %cst_154 = arith.constant dense<0.000000e+00> : vector<24x16xf32>
    %194 = tpu.matmul %180, %193, %cst_154 {dimension_numbers = #tpu.dot_dimension_numbers<[1], [0], [0], [1], [0, 0, 1, 1], [], []>} : vector<24x8xf32>, vector<8x16xf32>, vector<24x16xf32> -> vector<24x16xf32>
    %c0_155 = arith.constant 0 : index
    %c1456 = arith.constant 1456 : index
    %195 = vector.load %arg2[%c0_155, %c1456] : memref<32x1664xf32, #tpu.memory_space<vmem>>, vector<16x168xf32>
    %196 = tpu.concatenate %182, %184, %186, %188, %190, %192, %194 in 0 : vector<24x16xf32>, vector<24x16xf32>, vector<24x16xf32>, vector<24x16xf32>, vector<24x16xf32>, vector<24x16xf32>, vector<24x16xf32> -> vector<168x16xf32>
    %cst_156 = arith.constant dense<0.000000e+00> : vector<16x16xf32>
    %197 = tpu.matmul %195, %196, %cst_156 {dimension_numbers = #tpu.dot_dimension_numbers<[1], [0], [0], [1], [0, 0, 1, 1], [], []>} : vector<16x168xf32>, vector<168x16xf32>, vector<16x16xf32> -> vector<16x16xf32>
    %c0_157 = arith.constant 0 : index
    %c1336 = arith.constant 1336 : index
    %198 = vector.load %arg2[%c0_157, %c1336] : memref<32x1664xf32, #tpu.memory_space<vmem>>, vector<16x1xf32>
    %199 = vector.broadcast %198 : vector<16x1xf32> to vector<16x16xf32>
    %200 = arith.addf %197, %199 : vector<16x16xf32>
    %201 = vector.extract_strided_slice %200 {offsets = [0, 0], sizes = [10, 16], strides = [1, 1]} : vector<16x16xf32> to vector<10x16xf32>
    %c0_158 = arith.constant 0 : index
    %c0_159 = arith.constant 0 : index
    %c0_160 = arith.constant 0 : index
    %202 = vector.load %arg3[%c0_158, %c0_159, %c0_160] : memref<1x10x16xf32, #tpu.memory_space<vmem>>, vector<1x10x16xf32>
    %203 = vector.shape_cast %202 : vector<1x10x16xf32> to vector<10x16xf32>
    %204 = vector.shape_cast %201 : vector<10x16xf32> to vector<1x10x16xf32>
    tpu.vector_store %arg3[%c0_158, %c0_159, %c0_160], %204 {strides = array<i32>} : memref<1x10x16xf32, #tpu.memory_space<vmem>>, vector<1x10x16xf32>,
    return
  }
  func.func @transform_0(%arg0: i32) -> (i32, i32, i32) {
    %c0_i32 = arith.constant 0 : i32
    %c0_i32_0 = arith.constant 0 : i32
    %c0_i32_1 = arith.constant 0 : i32
    return %arg0, %c0_i32, %c0_i32_0 : i32, i32, i32
  }
  func.func @transform_1(%arg0: i32) -> (i32, i32) {
    %c0_i32 = arith.constant 0 : i32
    %c0_i32_0 = arith.constant 0 : i32
    %c0_i32_1 = arith.constant 0 : i32
    return %c0_i32, %c0_i32_0 : i32, i32
  }
  func.func @transform_2(%arg0: i32) -> (i32, i32, i32) {
    %c0_i32 = arith.constant 0 : i32
    %c0_i32_0 = arith.constant 0 : i32
    %c0_i32_1 = arith.constant 0 : i32
    return %arg0, %c0_i32, %c0_i32_0 : i32, i32, i32
  }
}

</mosaic_0001>

<bundles_post_ra>
// kernel: fwd.1
= control target key start
LH: loop header
LB: loop body
LE: loop exit
PB: predicated region body
PF: predicated region fallthrough
CT: control target
= control target key end

     0   :  { %7 = vsyncpa [#allocation3], 0  ;;  %s8414_s9 = smov 0   ;;  %s9427_s0 = inlined_call_operand.vmem [shape: f32[2,16,16], index: 0, kind: input, shape index: {}]   ;;  %s9428_s1 = inlined_call_operand.hbm [shape: f32[32,1664], index: 1, kind: input, shape index: {}]   ;;  %s9429_s2 = inlined_call_operand.vmem [shape: f32[2,10,16], index: 2, kind: output, shape index: {}]  }
   0x1 LB: > { %s8420_s10 = sadd.s32 4294967295, %s8372_s9   ;;  %p6700_p0 = scmp.ge.s32.totalorder %s8372_s9, 1  ;;  %s8372_s9 = sphi %s8414_s9, %s13_s9  }
   0x2   : > { %p91_p1 = scmp.lt.s32.totalorder %s8372_s9, 3  ;;  %s8374_s11 = smov [#allocation2]  }
   0x3   : > { %s103_s12 = sshll.u32 %s8374_s11, 4  ;;  %p9430_p3 = scmp.eq.s32.totalorder %s8420_s10, 0  ;;  %s104_s12 = int_to_ptr.vmem [resolvable:$true] %s103_s12 }
   0x4   : > { %p8424_p2 = pnand %p6700_p0, %p91_p1  ;;  %s8334_s17 = scalar_lea.hbm %s9428_s1, 6656 }
   0x5   : > { %p8335_p6 = scmp.ne.s32.totalorder %s9428_s1, %s8334_s17  ;;  %p8341_p10 = scmp.lt.u32.totalorder %s8334_s17, %s9428_s1 }
   0x6   : > { %s9432_s13 = scalar_select %p8424_p2, 1, 0 }
   0x7   : > { %p8173_p4 = pneg %p8424_p2 }
   0x9   : > { %p8433_p5 = pnand %p9430_p3, %p8173_p4 }
   0xb   : > { %p8336_p7 = pneg %p8433_p5 }
   0xd   : > { %p8337_p8 = pnand %p8336_p7, %p8335_p6 }
   0xf   : > { %p8338_p9 = pneg %p8337_p8 }
  0x11   : > { %p8343_p11 = pnand %p8341_p10, %p8338_p9 }
  0x13   : > { %8346 = shalt.err (!%p8343_p11)
}
  0x14   : > { %s8347_s22 = scalar_lea.vmem %s104_s12, 6656  ;;  %p8355_p1 = scmp.lt.s32.totalorder %s104_s12, %s104_s12 }
  0x15   : > { %p8348_p12 = scmp.ne.s32.totalorder %s104_s12, %s8347_s22  ;;  %p8356_p4 = scmp.lt.s32.totalorder %s8347_s22, %s8347_s22 }
  0x17   : > { %p8350_p13 = pnand %p8348_p12, %p8336_p7  ;;  %p8357_p3 = por %p8356_p4, %p8355_p1 }
  0x19   : > { %p8351_p0 = pneg %p8350_p13 }
  0x1b   : > { %p8358_p2 = pnand %p8357_p3, %p8351_p0 }
  0x1d   : > { %8361 = shalt.err (!%p8358_p2)
}
  0x1e   : > { %s8375_s23 = smov 1664   ;;  %s8376_s24 = smov 104  }
  0x1f   : > { %8176 = dma.hbm_to_vmem [thread:$0]  (!%p8433_p5), %s9428_s1, 6656, %s104_s12, [#allocation3], %s8375_s23, %s8375_s23, %s8376_s24  }
  0x20   : > { %p9434_p6 = scmp.ne.s32.totalorder %s9432_s13, 0 }
  0x21   : > { %p9435_p8 = scmp.eq.s32.totalorder (!%p9434_p6), %s8420_s10, 0 }
  0x22   : > { %127 = sbr.rel (%p9434_p6) target bundleno = 4782 (0x12ae), region = 28 }
  0x29   : > { %8367 = dma.done.wait (%p9435_p8), [#allocation3], 6656   ;;  %p9436_p7 = pmov %p9435_p8 }
  0x2a   : > { %p149_p2 = scmp.lt.s32.totalorder %s8420_s10, 1  ;;  %v161_v0 = vld [vmem:[#allocation2] sm:$0xff]  ;;  %v162_v1 = vld [vmem:[#allocation2 + $0x68] sm:$0xff]  ;;  %vm163_vm0 = vcmask 130048   ;;  %s8377_s3 = smov 120   ;;  %v8489_v7 = vld [vmem:[#allocation2 + $0x70] sm:$0xff] }
  0x2b   : > { %8369 = vsyncadd (%p9436_p7), [#allocation3], 4294960640  ;;  %v8212_v2 = vpack.i.bf16 %v162_v1, %v161_v0  ;;  %v7902_v3 = vpack.c.bf16 %v162_v1, %v161_v0  ;;  %s8378_s4 = smov 104   ;;  %s8379_s5 = smov 112   ;;  %v8487_v6 = vld [vmem:[#allocation2 + $0x8] sm:$0xff]  ;;  %v8252_v9 = vpack.i.bf16 %v8489_v7, %v162_v1  ;;  %vm838_vm1 = vcmask 523264  }
  0x2c   : > { %s9438_s10 = smov (!%p149_p2, %s8420_s10), 1  ;;  %s8380_s6 = smov 96   ;;  %v8247_v8 = vpack.i.bf16 %v8487_v6, %v161_v0  ;;  %v8385_v45 = vmov 64   ;;  %v8533_v46 = vld [vmem:[#allocation2 + $0x18] sm:$0xff]  ;;  %v8535_v47 = vld [vmem:[#allocation2 + $0x80] sm:$0xff]  ;;  %v8543_v49 = vld [vmem:[#allocation2 + $0x88] sm:$0xff] }
  0x2d   : > { %s6896_s27 = sshll.u32 %s9438_s10, 4  ;;  %8213 = vrot.lane.b32.xlu0 %v8212_v2, %s8377_s3  ;;  %8223 = vrot.lane.b32.xlu1 %v8212_v2, %s8378_s4  ;;  %s8381_s7 = smov 88   ;;  %v8541_v48 = vld [vmem:[#allocation2 + $0x20] sm:$0xff]  ;;  %v8259_v50 = vpack.i.bf16 %v8535_v47, %v8533_v46  ;;  %vm927_vm2 = vcmask 64512   ;;  %vm8394_vm3 = vmmov 0   ;;  %vm2261_vm4 = vcmask 457728  }
  0x2e   : > { %s153_s30 = scalar_lea.vmem %s9427_s0, %s6896_s27  ;;  %7903 = vmatprep.subr.bf16.mxu1 %v7902_v3  ;;  %s8382_s8 = smov 80   ;;  %8258 = vset.pattern.permute.xlu0 %v8385_v45  ;;  %v8552_v51 = vpack.i.bf16 %v8543_v49, %v8541_v48  ;;  %vm1601_vm5 = vcmask 982016   ;;  %vm3123_vm6 = vcmask 392192   ;;  %vm3127_vm7 = vcmask 916480  }
  0x2f   : > { %v8469_v4 = vld [vmem:[%s153_s30] sm:$0xff]  ;;  %7905 = vmatpush3.bf16.msra.mxu1 %v7902_v3  ;;  %v8475_v5 = vld [vmem:[%s153_s30 + $0x8] sm:$0xff]  ;;  %s8383_s11 = smov 72   ;;  %s8384_s12 = smov 64   ;;  %8257 = vset.pattern.permute.xlu1 %v8385_v45  ;;  %vm3411_vm8 = vcmask 1043456   ;;  %vm3401_vm9 = vcmask 31744  }
  0x30   : > { %7231 = vmatprep.mubr.msk.f32.mxu1 %vm163_vm0, %v8469_v4  ;;  %7245 = vmatprep.mubr.msk.f32.mxu0 %vm163_vm0, %v8469_v4  ;;  %s8386_s13 = smov 56   ;;  %s8387_s14 = smov 40   ;;  %vm3595_vm10 = vcmask 1041408   ;;  %vm3585_vm11 = vcmask 15360   ;;  %vm3770_vm12 = vcmask 195584   ;;  %vm4501_vm13 = vcmask 326656  }
  0x31   : > { %8218 = vrot.lane.b32.xlu0 %v8212_v2, %s8379_s5  ;;  %8228 = vrot.lane.b32.xlu1 %v8212_v2, %s8380_s6  ;;  %s8388_s15 = smov 48   ;;  %s8389_s16 = smov 24   ;;  %vm5716_vm14 = vcmask 1040384   ;;  %vm5706_vm15 = vcmask 7168  }
  0x32   : > { %7232 = vmatmul.mubr.msk.f32.vlgmr.msra.gmra.mrb[0].mxu1 %vm163_vm0, %v8475_v5  ;;  %s8390_s17 = smov 32   ;;  %s8391_s18 = smov 8  }
  0x33   : > { %7238 = vmatprep.mubr.msk.f32.mxu1 %vm163_vm0, %v8469_v4  ;;  %s8392_s19 = smov 16   ;;  %s158_s22 = scalar_lea.vmem %s9429_s2, %s6896_s27 }
  0x35   : > { %8233 = vrot.lane.b32.xlu0 %v8212_v2, %s8381_s7  ;;  %8238 = vrot.lane.b32.xlu1 %v8212_v2, %s8382_s8 }
  0x39   : > { %8243 = vrot.lane.b32.xlu0 %v8212_v2, %s8383_s11  ;;  %8248 = vrot.lane.b32.xlu1 %v8247_v8, %s8384_s12 }
  0x3d   : > { %8253 = vrot.lane.b32.xlu0 %v8252_v9, %s8384_s12  ;;  %820 = vperm.xlu1 %8257, %v8487_v6  }
  0x41   : > { %825 = vperm.xlu0 %8258, %v8489_v7   ;;  %924 = vrot.lane.b32.xlu1 %v8487_v6, %s8386_s13 }
  0x45   : > { %1087 = vrot.lane.b32.xlu0 %v8487_v6, %s8387_s14  ;;  %1009 = vrot.lane.b32.xlu1 %v8487_v6, %s8388_s15 }
  0x49   : > { %1243 = vrot.lane.b32.xlu0 %v8487_v6, %s8389_s16  ;;  %1165 = vrot.lane.b32.xlu1 %v8487_v6, %s8390_s17 }
  0x4d   : > { %1399 = vrot.lane.b32.xlu0 %v8487_v6, %s8391_s18  ;;  %1321 = vrot.lane.b32.xlu1 %v8487_v6, %s8392_s19 }
  0x51   : > { %8265 = vrot.lane.b32.xlu0 %v8259_v50, %s8390_s17  ;;  %8260 = vrot.lane.b32.xlu1 %v8259_v50, %s8388_s15 }
  0x55   : > { %8275 = vrot.lane.b32.xlu0 %v8552_v51, %s8379_s5  ;;  %8270 = vrot.lane.b32.xlu1 %v8259_v50, %s8392_s19 }
  0x59   : > { %8285 = vrot.lane.b32.xlu0 %v8552_v51, %s8382_s8  ;;  %8280 = vrot.lane.b32.xlu1 %v8552_v51, %s8380_s6 }
  0x5d   : > { %2255 = vrot.lane.b32.xlu0 %v8535_v47, %s8379_s5  ;;  %2253 = vrot.lane.b32.xlu1 %v8533_v46, %s8379_s5 }
  0x9f   : > { %v8214_v10 = vpop.permute.xlu0 %8213  ;;  %v8224_v11 = vpop.permute.xlu1 %8223 }
  0xa0   : > { %v8216_v12 = vunpack.i.h.bf16 %v8214_v10  ;;  %v8215_v13 = vunpack.i.l.bf16 %v8214_v10  ;;  %v8226_v14 = vunpack.i.h.bf16 %v8224_v11  ;;  %v8225_v15 = vunpack.i.l.bf16 %v8224_v11 }
  0xa2   : > { %v7906_v16 = vpack.c.bf16 %v8216_v12, %v8215_v13  ;;  %v7914_v17 = vpack.c.bf16 %v8226_v14, %v8225_v15 }
  0xa3   : > { %v8219_v18 = vpop.permute.xlu0 %8218  ;;  %v8229_v19 = vpop.permute.xlu1 %8228 }
  0xa4   : > { %7907 = vmatprep.subr.bf16.mxu1 %v7906_v16  ;;  %v8221_v20 = vunpack.i.h.bf16 %v8219_v18  ;;  %v8220_v21 = vunpack.i.l.bf16 %v8219_v18  ;;  %v8231_v22 = vunpack.i.h.bf16 %v8229_v19  ;;  %v8230_v23 = vunpack.i.l.bf16 %v8229_v19 }
  0xa5   : > { %7909 = vmatpush3.bf16.msra.mxu1 %v7906_v16 }
  0xa6   : > { %v7910_v24 = vpack.c.bf16 %v8221_v20, %v8220_v21  ;;  %7915 = vmatprep.subr.bf16.mxu1 %v7914_v17  ;;  %v7918_v25 = vpack.c.bf16 %v8231_v22, %v8230_v23 }
  0xa7   : > { %v8234_v26 = vpop.permute.xlu0 %8233  ;;  %v8239_v27 = vpop.permute.xlu1 %8238 }
  0xa8   : > { %7239 = vmatmul.mubr.msk.f32.vlgmr.msra.gmra.mrb[2].mxu1 %vm163_vm0, %v8475_v5  ;;  %7911 = vmatprep.subr.bf16.mxu0 %v7910_v24  ;;  %v8236_v28 = vunpack.i.h.bf16 %v8234_v26  ;;  %v8235_v29 = vunpack.i.l.bf16 %v8234_v26  ;;  %v8241_v30 = vunpack.i.h.bf16 %v8239_v27  ;;  %v8240_v31 = vunpack.i.l.bf16 %v8239_v27 }
  0xa9   : > { %7913 = vmatpush3.bf16.msra.mxu0 %v7910_v24  ;;  %7917 = vmatpush3.bf16.msra.mxu1 %v7914_v17 }
  0xaa   : > { %7252 = vmatprep.mubr.msk.f32.mxu1 %vm163_vm0, %v8469_v4  ;;  %7919 = vmatprep.subr.bf16.mxu0 %v7918_v25  ;;  %v7922_v32 = vpack.c.bf16 %v8236_v28, %v8235_v29  ;;  %v7926_v34 = vpack.c.bf16 %v8241_v30, %v8240_v31 }
  0xab   : > { %v8244_v33 = vpop.permute.xlu0 %8243  ;;  %v8249_v41 = vpop.permute.xlu1 %8248 }
  0xac   : > { %7246 = vmatmul.mubr.msk.f32.vlgmr.msra.gmra.mrb[0].mxu0 %vm163_vm0, %v8475_v5  ;;  %7253 = vmatmul.mubr.msk.f32.vlgmr.msra.gmra.mrb[4].mxu1 %vm163_vm0, %v8475_v5  ;;  %v8246_v35 = vunpack.i.h.bf16 %v8244_v33  ;;  %v8245_v36 = vunpack.i.l.bf16 %v8244_v33  ;;  %v8251_v42 = vunpack.i.h.bf16 %v8249_v41  ;;  %v8250_v43 = vunpack.i.l.bf16 %v8249_v41 }
  0xad   : > { %7921 = vmatpush3.bf16.msra.mxu0 %v7918_v25  ;;  %7259 = vmatprep.mubr.msk.f32.mxu0 %vm163_vm0, %v8469_v4 }
  0xae   : > { %7923 = vmatprep.subr.bf16.mxu1 %v7922_v32  ;;  %7266 = vmatprep.mubr.msk.f32.mxu1 %vm163_vm0, %v8469_v4  ;;  %v7930_v37 = vpack.c.bf16 %v8246_v35, %v8245_v36  ;;  %v839_v44 = vsel %vm838_vm1, %v8250_v43, %v8251_v42  ;;  %v8395_v42 = vmov 0.0  }
  0xaf   : > { %7925 = vmatpush3.bf16.msra.mxu1 %v7922_v32  ;;  %7927 = vmatprep.subr.bf16.mxu0 %v7926_v34  ;;  %v8254_v10 = vpop.permute.xlu0 %8253  ;;  %v8578_v32 = vld [vmem:[#allocation2 + $0x10] sm:$0xff] }
  0xb0   : > { %7260 = vmatmul.mubr.msk.f32.vlgmr.msra.gmra.mrb[2].mxu0 %vm163_vm0, %v8475_v5  ;;  %7931 = vmatprep.subr.bf16.mxu1 %v7930_v37  ;;  %v8256_v11 = vunpack.i.h.bf16 %v8254_v10  ;;  %v8255_v12 = vunpack.i.l.bf16 %v8254_v10 }
  0xb1   : > { %7929 = vmatpush3.bf16.msra.mxu0 %v7926_v34  ;;  %7273 = vmatprep.mubr.msk.f32.mxu0 %vm163_vm0, %v8469_v4 }
  0xb2   : > { %7267 = vmatmul.mubr.msk.f32.vlgmr.msra.gmra.mrb[6].mxu1 %vm163_vm0, %v8475_v5  ;;  %v840_v13 = vsel %vm838_vm1, %v8255_v12, %v8256_v11 }
  0xb3   : > { %7933 = vmatpush3.bf16.msra.mxu1 %v7930_v37  ;;  %7280 = vmatprep.mubr.msk.f32.mxu1 %vm163_vm0, %v8469_v4 }
  0xb4   : > { %7274 = vmatmul.mubr.msk.f32.vlgmr.msra.gmra.mrb[4].mxu0 %vm163_vm0, %v8475_v5 }
  0xb5   : > { %7315 = vmatprep.mubr.f32.mxu0 %v839_v44 }
  0xb6   : > { %7281 = vmatmul.mubr.msk.f32.vlgmr.msra.gmra.mrb[8].mxu1 %vm163_vm0, %v8475_v5 }
  0xbc   : > { %v821_v14 = vpop.permute.xlu1 %820 }
  0xc0   : > { %v925_v15 = vpop.permute.xlu1 %924  ;;  %v826_v17 = vpop.permute.xlu0 %825 }
  0xc1   : > { %7318 = vmatprep.subr.mxu1 %v925_v15 }
  0xc2   : > { %7319 = vmatpush3.msra.mxu1 %v925_v15 }
  0xc4   : > { %v1010_v16 = vpop.permute.xlu1 %1009  ;;  %v1088_v26 = vpop.permute.xlu0 %1087 }
  0xc5   : > { %7323 = vmatprep.subr.mxu1 %v1010_v16 }
  0xc8   : > { %v1166_v27 = vpop.permute.xlu1 %1165  ;;  %v1244_v28 = vpop.permute.xlu0 %1243 }
  0xcc   : > { %v1322_v29 = vpop.permute.xlu1 %1321  ;;  %v1400_v30 = vpop.permute.xlu0 %1399 }
  0xd0   : > { %v8261_v31 = vpop.permute.xlu1 %8260  ;;  %v8266_v35 = vpop.permute.xlu0 %8265 }
  0xd1   : > { %v8263_v33 = vunpack.i.h.bf16 %v8261_v31  ;;  %v8262_v34 = vunpack.i.l.bf16 %v8261_v31  ;;  %v8268_v37 = vunpack.i.h.bf16 %v8266_v35 }
  0xd3   : > { %v7999_v36 = vpack.c.bf16 %v8263_v33, %v8262_v34 }
 0x105   : > { %v7233_v38 = vpop.f32.mrb[0].mxu1 }
 0x106   : > { %v236_v39 = vpop.f32.mrb[1].mxu1 }
 0x107   : > { %v7934_v40 = vpack.c.bf16 %v7233_v38, %v236_v39  ;;  %v8267_v38 = vunpack.i.l.bf16 %v8266_v35  ;;  %v8393_v39 = vmov 0.0|0.0  }
 0x109   : > { %7935 = vmatprep.subr.bf16.mxu0 %v7934_v40  ;;  %v8002_v41 = vpack.c.bf16 %v8268_v37, %v8267_v38 }
 0x10a   : > { %7937 = vmatpush3.bf16.msra.mxu0 %v7934_v40  ;;  %v8271_v40 = vpop.permute.xlu1 %8270 }
 0x10b   : > { %v8273_v43 = vunpack.i.h.bf16 %v8271_v40  ;;  %v8272_v44 = vunpack.i.l.bf16 %v8271_v40 }
 0x10d   : > { %v8005_v50 = vpack.c.bf16 %v8273_v43, %v8272_v44 }
 0x17b   : > { %v7240_v52 = vpop.f32.mrb[2].mxu1 }
 0x17c   : > { %v319_v53 = vpop.f32.mrb[3].mxu1 }
 0x17d   : > { %v7938_v54 = vpack.c.bf16 %v7240_v52, %v319_v53  ;;  %v8276_v52 = vpop.permute.xlu0 %8275 }
 0x17e   : > { %v8278_v53 = vunpack.i.h.bf16 %v8276_v52 }
 0x17f   : > { %v7247_v55 = vpop.f32.mrb[0].mxu0  ;;  %7939 = vmatprep.subr.bf16.mxu0 %v7938_v54  ;;  %v7254_v56 = vpop.f32.mrb[4].mxu1 }
 0x180   : > { %v400_v57 = vpop.f32.mrb[1].mxu0  ;;  %7941 = vmatpush3.bf16.msra.mxu0 %v7938_v54  ;;  %v481_v58 = vpop.f32.mrb[5].mxu1  ;;  %v8277_v54 = vunpack.i.l.bf16 %v8276_v52 }
 0x181   : > { %v7942_v59 = vpack.c.bf16 %v7247_v55, %v400_v57  ;;  %v7946_v60 = vpack.c.bf16 %v7254_v56, %v481_v58  ;;  %v8008_v55 = vpack.c.bf16 %v8543_v49, %v8541_v48  ;;  %v8281_v56 = vpop.permute.xlu1 %8280 }
 0x182   : > { %v8011_v57 = vpack.c.bf16 %v8278_v53, %v8277_v54  ;;  %v8283_v58 = vunpack.i.h.bf16 %v8281_v56 }
 0x183   : > { %7943 = vmatprep.subr.bf16.mxu0 %v7942_v59  ;;  %v7261_v61 = vpop.f32.mrb[2].mxu0 }
 0x184   : > { %7945 = vmatpush3.bf16.msra.mxu0 %v7942_v59  ;;  %v562_v62 = vpop.f32.mrb[3].mxu0  ;;  %v8282_v59 = vunpack.i.l.bf16 %v8281_v56 }
 0x185   : > { %7947 = vmatprep.subr.bf16.mxu0 %v7946_v60  ;;  %v7950_v63 = vpack.c.bf16 %v7261_v61, %v562_v62  ;;  %v7268_v0 = vpop.f32.mrb[6].mxu1 }
 0x186   : > { %v643_v1 = vpop.f32.mrb[7].mxu1  ;;  %v8014_v61 = vpack.c.bf16 %v8283_v58, %v8282_v59 }
 0x187   : > { %v7954_v2 = vpack.c.bf16 %v7268_v0, %v643_v1  ;;  %v7275_v3 = vpop.f32.mrb[4].mxu0  ;;  %v2254_v1 = vpop.permute.xlu1 %2253 }
 0x188   : > { %7949 = vmatpush3.bf16.msra.mxu0 %v7946_v60  ;;  %v724_v5 = vpop.f32.mrb[5].mxu0  ;;  %v8286_v60 = vpop.permute.xlu0 %8285 }
 0x189   : > { %7951 = vmatprep.subr.bf16.mxu0 %v7950_v63  ;;  %v7958_v6 = vpack.c.bf16 %v7275_v3, %v724_v5  ;;  %v7282_v7 = vpop.f32.mrb[8].mxu1  ;;  %v8288_v62 = vunpack.i.h.bf16 %v8286_v60  ;;  %v8625_v3 = vld [vmem:[#allocation2 + $0xe8] sm:$0xff]  ;;  %v8396_v5 = vmov 72  }
 0x18a   : > { %v805_v8 = vpop.f32.mrb[9].mxu1  ;;  %8289 = vset.pattern.permute.xlu1 %v8396_v5  ;;  %8290 = vset.pattern.permute.xlu0 %v8396_v5 }
 0x18b   : > { %v7962_v9 = vpack.c.bf16 %v7282_v7, %v805_v8  ;;  %2238 = vperm.xlu1 %8289, %v8533_v46   ;;  %2242 = vperm.xlu0 %8290, %v8535_v47   ;;  %v1555_v7 = vld [vmem:[#allocation2 + $0x78] sm:$0xff]  ;;  %v1559_v8 = vld [vmem:[#allocation2 + $0x148] sm:$0xff] }
 0x18c   : > { %7953 = vmatpush3.bf16.msra.mxu0 %v7950_v63  ;;  %v8287_v63 = vunpack.i.l.bf16 %v8286_v60  ;;  %v8296_v10 = vpack.i.bf16 %v8535_v47, %v1555_v7  ;;  %v2256_v59 = vpop.permute.xlu0 %2255 }
 0x18d   : > { %7955 = vmatprep.subr.bf16.mxu0 %v7954_v2 }
 0x18e   : > { %v8017_v0 = vpack.c.bf16 %v8288_v62, %v8287_v63 }
 0x18f   : > { %8321 = vset.pattern.permute.xlu1 %v8385_v45  ;;  %8322 = vset.pattern.permute.xlu0 %v8385_v45 }
 0x190   : > { %7957 = vmatpush3.bf16.msra.mxu0 %v7954_v2  ;;  %v1557_v2 = vld [vmem:[#allocation2 + $0xe0] sm:$0xff] }
 0x191   : > { %7959 = vmatprep.subr.bf16.mxu0 %v7958_v6 }
 0x194   : > { %7961 = vmatpush3.bf16.msra.mxu0 %v7958_v6  ;;  %v8291_v6 = vpack.i.bf16 %v8533_v46, %v8578_v32 }
 0x195   : > { %7963 = vmatprep.subr.bf16.mxu0 %v7962_v9 }
 0x196   : > { %8292 = vrot.lane.b32.xlu1 %v8291_v6, %s8377_s3 }
 0x198   : > { %7965 = vmatpush3.bf16.msra.mxu0 %v7962_v9  ;;  %v8634_v9 = vld [vmem:[#allocation2 + $0x150] sm:$0xff] }
 0x199   : > { %v8311_v11 = vpack.i.bf16 %v8634_v9, %v1559_v8 }
 0x19a   : > { %8297 = vrot.lane.b32.xlu1 %v8296_v10, %s8377_s3 }
 0x19b   : > { %7316 = vmatmul.mubr.f32.vlgmr.msra.gmra.mrb[6].mxu0 %v840_v13 }
 0x19e   : > { %8307 = vrot.lane.b32.xlu1 %v8552_v51, %s8384_s12 }
 0x1a2   : > { %8317 = vrot.lane.b32.xlu1 %v8552_v51, %s8386_s13 }
 0x1a6   : > { %2257 = vrot.lane.b32.xlu1 %v8625_v3, %s8379_s5 }
 0x20a   : > { %v8651_v60 = vpop.permute.xlu1 %2238 }
 0x26e   : > { %v7317_v18 = vpop.f32.mrb[6].mxu0 }
 0x26f   : > { %v915_v19 = vadd.f32 %v7317_v18, %v826_v17  ;;  %v909_v20 = vpop.f32.mrb[7].mxu0 }
 0x270   : > { %v910_v21 = vadd.f32 %v909_v20, %v821_v14 }
 0x271   : > { %v919_v22 = vmul.f32 0.2, %v915_v19 }
 0x272   : > { %v918_v23 = vmul.f32 0.2, %v910_v21 }
 0x273   : > { %v921_v25 = vmax.f32 %v915_v19, %v919_v22 }
 0x274   : > { %v920_v24 = vmax.f32 %v910_v21, %v918_v23 }
 0x276   : > { %7320 = vmatprep.mubr.msk.f32.mxu1 %vm927_vm2, %v920_v24 }
 0x277   : > { %7321 = vmatmul.mubr.msk.f32.vlgmr.msra.gmra.mrb[10].mxu1 %vm927_vm2, %v921_v25 }
 0x278   : > { %7325 = vmatprep.mubr.msk.f32.mxu1 %vm927_vm2, %v920_v24  ;;  %7324 = vmatpush3.msra.mxu1 %v1010_v16 }
 0x279   : > { %7328 = vmatprep.subr.mxu1 %v1088_v26 }
 0x27b   : > { %7326 = vmatmul.mubr.msk.f32.vlgmr.msra.gmra.mrb[12].mxu1 %vm927_vm2, %v921_v25 }
 0x27c   : > { %7330 = vmatprep.mubr.msk.f32.mxu1 %vm927_vm2, %v920_v24  ;;  %7329 = vmatpush3.msra.mxu1 %v1088_v26 }
 0x27d   : > { %7333 = vmatprep.subr.mxu1 %v1166_v27 }
 0x27f   : > { %7331 = vmatmul.mubr.msk.f32.vlgmr.msra.gmra.mrb[14].mxu1 %vm927_vm2, %v921_v25 }
 0x280   : > { %7335 = vmatprep.mubr.msk.f32.mxu1 %vm927_vm2, %v920_v24  ;;  %7334 = vmatpush3.msra.mxu1 %v1166_v27 }
 0x281   : > { %7338 = vmatprep.subr.mxu1 %v1244_v28 }
 0x283   : > { %7336 = vmatmul.mubr.msk.f32.vlgmr.msra.gmra.mrb[16].mxu1 %vm927_vm2, %v921_v25 }
 0x284   : > { %7340 = vmatprep.mubr.msk.f32.mxu1 %vm927_vm2, %v920_v24  ;;  %7339 = vmatpush3.msra.mxu1 %v1244_v28 }
 0x285   : > { %7343 = vmatprep.subr.mxu1 %v1322_v29 }
 0x287   : > { %7341 = vmatmul.mubr.msk.f32.vlgmr.msra.gmra.mrb[18].mxu1 %vm927_vm2, %v921_v25 }
 0x288   : > { %7345 = vmatprep.mubr.msk.f32.mxu1 %vm927_vm2, %v920_v24  ;;  %7344 = vmatpush3.msra.mxu1 %v1322_v29 }
 0x289   : > { %7348 = vmatprep.subr.mxu1 %v1400_v30 }
 0x28b   : > { %7346 = vmatmul.mubr.msk.f32.vlgmr.msra.gmra.mrb[20].mxu1 %vm927_vm2, %v921_v25 }
 0x28c   : > { %7350 = vmatprep.mubr.msk.f32.mxu1 %vm927_vm2, %v920_v24  ;;  %7349 = vmatpush3.msra.mxu1 %v1400_v30 }
 0x28d   : > { %7353 = vmatprep.subr.mxu1 %v8578_v32 }
 0x28f   : > { %7351 = vmatmul.mubr.msk.f32.vlgmr.msra.gmra.mrb[22].mxu1 %vm927_vm2, %v921_v25 }
 0x290   : > { %7355 = vmatprep.mubr.msk.f32.mxu1 %vm927_vm2, %v920_v24  ;;  %7354 = vmatpush3.msra.mxu1 %v8578_v32 }
 0x291   : > { %7998 = vmatprep.subr.bf16.mxu1 %v8393_v39 }
 0x293   : > { %7356 = vmatmul.mubr.msk.f32.vlgmr.msra.gmra.mrb[24].mxu1 %vm927_vm2, %v921_v25 }
 0x294   : > { %8000 = vmatpush3.bf16.msra.mxu1 %v7999_v36  ;;  %7400 = vmatprep.mubr.msk.f32.mxu1 %vm8394_vm3, %v8395_v42 }
 0x295   : > { %8001 = vmatprep.subr.bf16.mxu1 %v8393_v39 }
 0x297   : > { %7401 = vmatmul.mubr.msk.f32.vlgmr.msra.gmra.mrb[26].mxu1 %vm163_vm0, %v8469_v4 }
 0x298   : > { %8003 = vmatpush3.bf16.msra.mxu1 %v8002_v41  ;;  %7407 = vmatprep.mubr.msk.f32.mxu1 %vm8394_vm3, %v8395_v42 }
 0x299   : > { %8004 = vmatprep.subr.bf16.mxu1 %v8393_v39 }
 0x29b   : > { %7408 = vmatmul.mubr.msk.f32.vlgmr.msra.gmra.mrb[28].mxu1 %vm163_vm0, %v8469_v4 }
 0x29c   : > { %8006 = vmatpush3.bf16.msra.mxu1 %v8005_v50  ;;  %7414 = vmatprep.mubr.msk.f32.mxu1 %vm8394_vm3, %v8395_v42 }
 0x29d   : > { %8007 = vmatprep.subr.bf16.mxu1 %v8393_v39 }
 0x29f   : > { %7415 = vmatmul.mubr.msk.f32.vlgmr.msra.gmra.mrb[30].mxu1 %vm163_vm0, %v8469_v4 }
 0x2a0   : > { %8009 = vmatpush3.bf16.msra.mxu1 %v8008_v55  ;;  %7421 = vmatprep.mubr.msk.f32.mxu1 %vm8394_vm3, %v8395_v42 }
 0x2a1   : > { %8010 = vmatprep.subr.bf16.mxu1 %v8393_v39 }
 0x2a3   : > { %7422 = vmatmul.mubr.msk.f32.vlgmr.msra.gmra.mrb[32].mxu1 %vm163_vm0, %v8469_v4 }
 0x2a4   : > { %8012 = vmatpush3.bf16.msra.mxu1 %v8011_v57  ;;  %7428 = vmatprep.mubr.msk.f32.mxu1 %vm8394_vm3, %v8395_v42 }
 0x2a5   : > { %8013 = vmatprep.subr.bf16.mxu1 %v8393_v39 }
 0x2a7   : > { %7429 = vmatmul.mubr.msk.f32.vlgmr.msra.gmra.mrb[34].mxu1 %vm163_vm0, %v8469_v4 }
 0x2a8   : > { %8015 = vmatpush3.bf16.msra.mxu1 %v8014_v61  ;;  %7435 = vmatprep.mubr.msk.f32.mxu1 %vm8394_vm3, %v8395_v42  ;;  %v8293_v61 = vpop.permute.xlu1 %8292 }
 0x2a9   : > { %8016 = vmatprep.subr.bf16.mxu1 %v8393_v39  ;;  %v8295_v62 = vunpack.i.h.bf16 %v8293_v61  ;;  %v8294_v63 = vunpack.i.l.bf16 %v8293_v61 }
 0x2ab   : > { %7436 = vmatmul.mubr.msk.f32.vlgmr.msra.gmra.mrb[36].mxu1 %vm163_vm0, %v8469_v4 }
 0x2ac   : > { %8018 = vmatpush3.bf16.msra.mxu1 %v8017_v0  ;;  %7442 = vmatprep.mubr.msk.f32.mxu1 %vm8394_vm3, %v8395_v42  ;;  %v1602_v0 = vsel %vm1601_vm5, %v8294_v63, %v8295_v62 }
 0x2ad   : > { %7390 = vmatprep.mubr.f32.mxu0 %v1602_v0 }
 0x2af   : > { %7443 = vmatmul.mubr.msk.f32.vlgmr.msra.gmra.mrb[38].mxu1 %vm163_vm0, %v8469_v4  ;;  %v8301_v4 = vpack.i.bf16 %v8625_v3, %v1557_v2 }
 0x2b0   : > { %7459 = vmatprep.mubr.msk.f32.mxu1 %vm2261_vm4, %v2254_v1  ;;  %v8298_v1 = vpop.permute.xlu1 %8297 }
 0x2b1   : > { %8302 = vrot.lane.b32.xlu0 %v8301_v4, %s8377_s3  ;;  %v8300_v2 = vunpack.i.h.bf16 %v8298_v1  ;;  %v8299_v6 = vunpack.i.l.bf16 %v8298_v1 }
 0x2b3   : > { %v1603_v4 = vsel %vm1601_vm5, %v8299_v6, %v8300_v2 }
 0x2b4   : > { %v8308_v7 = vpop.permute.xlu1 %8307 }
 0x2b5   : > { %8312 = vrot.lane.b32.xlu0 %v8311_v11, %s8377_s3  ;;  %v8310_v8 = vunpack.i.h.bf16 %v8308_v7  ;;  %v8309_v10 = vunpack.i.l.bf16 %v8308_v7 }
 0x2b7   : > { %v8031_v11 = vpack.c.bf16 %v8310_v8, %v8309_v10 }
 0x34a   : > { %v7322_v12 = vpop.f32.mrb[10].mxu1 }
 0x34b   : > { %v1000_v13 = vpop.f32.mrb[11].mxu1 }
 0x34c   : > { %v7966_v14 = vpack.c.bf16 %v7322_v12, %v1000_v13  ;;  %v8655_v12 = vpop.permute.xlu0 %2242 }
 0x34e   : > { %v7327_v15 = vpop.f32.mrb[12].mxu1  ;;  %7967 = vmatprep.subr.bf16.mxu0 %v7966_v14 }
 0x34f   : > { %v1078_v16 = vpop.f32.mrb[13].mxu1  ;;  %7969 = vmatpush3.bf16.msra.mxu0 %v7966_v14 }
 0x350   : > { %v7970_v45 = vpack.c.bf16 %v7327_v15, %v1078_v16  ;;  %v8303_v13 = vpop.permute.xlu0 %8302 }
 0x351   : > { %v8305_v15 = vunpack.i.h.bf16 %v8303_v13  ;;  %v8304_v16 = vunpack.i.l.bf16 %v8303_v13 }
 0x352   : > { %v7332_v17 = vpop.f32.mrb[14].mxu1  ;;  %7971 = vmatprep.subr.bf16.mxu0 %v7970_v45 }
 0x353   : > { %v1156_v18 = vpop.f32.mrb[15].mxu1  ;;  %7973 = vmatpush3.bf16.msra.mxu0 %v7970_v45 }
 0x354   : > { %v7974_v19 = vpack.c.bf16 %v7332_v17, %v1156_v18  ;;  %v8313_v14 = vpop.permute.xlu0 %8312  ;;  %v1604_v18 = vsel %vm1601_vm5, %v8304_v16, %v8305_v15 }
 0x355   : > { %v8315_v45 = vunpack.i.h.bf16 %v8313_v14  ;;  %v8314_v17 = vunpack.i.l.bf16 %v8313_v14 }
 0x356   : > { %v7337_v20 = vpop.f32.mrb[16].mxu1  ;;  %7975 = vmatprep.subr.bf16.mxu0 %v7974_v19 }
 0x357   : > { %v1234_v21 = vpop.f32.mrb[17].mxu1  ;;  %7977 = vmatpush3.bf16.msra.mxu0 %v7974_v19  ;;  %v1605_v19 = vsel %vm1601_vm5, %v8314_v17, %v8315_v45 }
 0x358   : > { %v7978_v51 = vpack.c.bf16 %v7337_v20, %v1234_v21  ;;  %v2533_v20 = vld [vmem:[#allocation2 + $0x28] sm:$0xff]  ;;  %v8318_v21 = vpop.permute.xlu1 %8317 }
 0x359   : > { %2619 = vrot.lane.b32.xlu1 %v2533_v20, %s8388_s15  ;;  %2535 = vrot.lane.b32.xlu0 %v2533_v20, %s8386_s13 }
 0x35a   : > { %v7342_v22 = vpop.f32.mrb[18].mxu1  ;;  %7979 = vmatprep.subr.bf16.mxu0 %v7978_v51 }
 0x35b   : > { %v1312_v23 = vpop.f32.mrb[19].mxu1  ;;  %7981 = vmatpush3.bf16.msra.mxu0 %v7978_v51  ;;  %v8320_v51 = vunpack.i.h.bf16 %v8318_v21 }
 0x35c   : > { %v7982_v24 = vpack.c.bf16 %v7342_v22, %v1312_v23  ;;  %v8319_v22 = vunpack.i.l.bf16 %v8318_v21 }
 0x35d   : > { %2775 = vrot.lane.b32.xlu1 %v2533_v20, %s8390_s17  ;;  %2259 = vrot.lane.b32.xlu0 %v8634_v9, %s8379_s5 }
 0x35e   : > { %v7347_v25 = vpop.f32.mrb[20].mxu1  ;;  %7983 = vmatprep.subr.bf16.mxu0 %v7982_v24  ;;  %v8661_v23 = vpack.c.bf16 %v8320_v51, %v8319_v22 }
 0x35f   : > { %v1390_v26 = vpop.f32.mrb[21].mxu1  ;;  %7985 = vmatpush3.bf16.msra.mxu0 %v7982_v24  ;;  %v2258_v24 = vpop.permute.xlu1 %2257 }
 0x360   : > { %v7986_v27 = vpack.c.bf16 %v7347_v25, %v1390_v26  ;;  %v3091_v25 = vld [vmem:[#allocation2 + $0xf0] sm:$0xff] }
 0x361   : > { %2931 = vrot.lane.b32.xlu1 %v2533_v20, %s8392_s19  ;;  %2697 = vrot.lane.b32.xlu0 %v2533_v20, %s8387_s14  ;;  %v3090_v26 = vld [vmem:[#allocation2 + $0x90] sm:$0xff] }
 0x362   : > { %v7352_v28 = vpop.f32.mrb[22].mxu1  ;;  %7987 = vmatprep.subr.bf16.mxu0 %v7986_v27 }
 0x363   : > { %v1468_v29 = vpop.f32.mrb[23].mxu1  ;;  %7989 = vmatpush3.bf16.msra.mxu0 %v7986_v27  ;;  %v3092_v27 = vld [vmem:[#allocation2 + $0xf8] sm:$0xff] }
 0x364   : > { %v7990_v30 = vpack.c.bf16 %v7352_v28, %v1468_v29  ;;  %v3581_v28 = vld [vmem:[#allocation2 + $0x30] sm:$0x3]  ;;  %v3844_v29 = vld [vmem:[#allocation2 + $0x98] sm:$0xff] }
 0x365   : > { %3111 = vrot.lane.b32.xlu1 %v8541_v48, %s8388_s15  ;;  %2853 = vrot.lane.b32.xlu0 %v2533_v20, %s8389_s16  ;;  %v8680_v48 = vld [vmem:[#allocation2 + $0x30] sm:$0xff] }
 0x366   : > { %v7357_v31 = vpop.f32.mrb[24].mxu1  ;;  %7991 = vmatprep.subr.bf16.mxu0 %v7990_v30 }
 0x367   : > { %v1544_v32 = vpop.f32.mrb[25].mxu1  ;;  %7993 = vmatpush3.bf16.msra.mxu0 %v7990_v30  ;;  %v8325_v30 = vpack.i.bf16 %v3844_v29, %v8680_v48 }
 0x368   : > { %v7994_v33 = vpack.c.bf16 %v7357_v31, %v1544_v32  ;;  %v8696_v31 = vld [vmem:[#allocation2 + $0x38] sm:$0xff]  ;;  %v4469_v32 = vld [vmem:[#allocation2 + $0x100] sm:$0xff] }
 0x369   : > { %3115 = vrot.lane.b32.xlu1 %v8543_v49, %s8388_s15  ;;  %3009 = vrot.lane.b32.xlu0 %v2533_v20, %s8391_s18  ;;  %v3397_v49 = vld [vmem:[#allocation2 + $0x30] sm:$0xf] }
 0x36a   : > { %7995 = vmatprep.subr.bf16.mxu0 %v7994_v33  ;;  %v1779_v34 = vpop.f32.mrb[26].mxu1 }
 0x36b   : > { %7997 = vmatpush3.bf16.msra.mxu0 %v7994_v33  ;;  %v7402_v35 = vpop.f32.mrb[27].mxu1  ;;  %v4470_v33 = vld [vmem:[#allocation2 + $0x108] sm:$0xff] }
 0x36c   : > { %8032 = vmatprep.subr.bf16.mxu0 %v8031_v11  ;;  %v8397_v35 = vmov 8  }
 0x36d   : > { %3119 = vrot.lane.b32.xlu1 %v3091_v25, %s8388_s15  ;;  %3113 = vrot.lane.b32.xlu0 %v2533_v20, %s8388_s15 }
 0x36e   : > { %v1855_v36 = vpop.f32.mrb[28].mxu1  ;;  %7391 = vmatmul.mubr.f32.vlgmr.msra.gmra.mrb[8].mxu0 %v1603_v4 }
 0x36f   : > { %v8019_v37 = vpack.c.bf16 %v1855_v36, %v1779_v34  ;;  %v7409_v38 = vpop.f32.mrb[29].mxu1  ;;  %8034 = vmatpush3.bf16.msra.mxu0 %v8031_v11  ;;  %7393 = vmatprep.mubr.f32.mxu0 %v1604_v18  ;;  %v4691_v34 = vld [vmem:[#allocation2 + $0x38] sm:$0xf] }
 0x370   : > { %8036 = vmatprep.subr.bf16.mxu0 %v8661_v23 }
 0x371   : > { %8020 = vmatprep.subr.bf16.mxu1 %v8019_v37  ;;  %3095 = vperm.xlu1 %8321, %v2533_v20  }
 0x372   : > { %v1931_v40 = vpop.f32.mrb[30].mxu1  ;;  %8022 = vmatpush3.bf16.msra.mxu1 %v8019_v37  ;;  %7394 = vmatmul.mubr.f32.gmra.mrb[10].mxu0 %v1605_v19 }
 0x373   : > { %v7416_v41 = vpop.f32.mrb[31].mxu1  ;;  %3117 = vrot.lane.b32.xlu0 %v3090_v26, %s8388_s15 }
 0x375   : > { %3105 = vperm.xlu1 %8321, %v3092_v27  }
 0x376   : > { %v2003_v43 = vpop.f32.mrb[32].mxu1 }
 0x377   : > { %v8023_v44 = vpack.c.bf16 %v2003_v43, %v1931_v40  ;;  %v7423_v50 = vpop.f32.mrb[33].mxu1  ;;  %3121 = vrot.lane.b32.xlu0 %v3092_v27, %s8388_s15 }
 0x379   : > { %8024 = vmatprep.subr.bf16.mxu1 %v8023_v44  ;;  %3311 = vrot.lane.b32.xlu1 %v8680_v48, %s8377_s3 }
 0x37a   : > { %v2081_v52 = vpop.f32.mrb[34].mxu1  ;;  %8026 = vmatpush3.bf16.msra.mxu1 %v8023_v44  ;;  %8324 = vset.pattern.permute.xlu1 %v8396_v5 }
 0x37b   : > { %v7430_v53 = vpop.f32.mrb[35].mxu1  ;;  %3100 = vperm.xlu0 %8322, %v3090_v26  }
 0x37d   : > { %3494 = vrot.lane.b32.xlu1 %v3397_v49, %s8378_s4 }
 0x37e   : > { %v2157_v54 = vpop.f32.mrb[36].mxu1 }
 0x37f   : > { %v8027_v55 = vpack.c.bf16 %v2157_v54, %v2081_v52  ;;  %v7437_v56 = vpop.f32.mrb[37].mxu1  ;;  %3399 = vrot.lane.b32.xlu0 %v3397_v49, %s8379_s5 }
 0x380   : > { %8323 = vset.pattern.permute.xlu0 %v8396_v5  ;;  %v4468_v5 = vld [vmem:[#allocation2 + $0xa0] sm:$0xff] }
 0x381   : > { %8028 = vmatprep.subr.bf16.mxu1 %v8027_v55  ;;  %3678 = vrot.lane.b32.xlu1 %v3581_v28, %s8381_s7 }
 0x382   : > { %8030 = vmatpush3.bf16.msra.mxu1 %v8027_v55  ;;  %v2233_v57 = vpop.f32.mrb[38].mxu1 }
 0x383   : > { %v7444_v58 = vpop.f32.mrb[39].mxu1  ;;  %7457 = vmatprep.subr.mxu1 %v2233_v57  ;;  %3583 = vrot.lane.b32.xlu0 %v3581_v28, %s8380_s6 }
 0x385   : > { %2250 = vperm.xlu1 %8324, %v8634_v9  }
 0x386   : > { %7458 = vmatpush3.msra.mxu1 %v2233_v57 }
 0x387   : > { %7460 = vmatmul.mubr.msk.f32.vlgmr.msra.gmra.mrb[40].mxu1 %vm2261_vm4, %v2256_v59  ;;  %2246 = vperm.xlu0 %8323, %v8625_v3  }
 0x388   : > { %7462 = vmatprep.mubr.msk.f32.mxu1 %vm2261_vm4, %v2258_v24 }
 0x389   : > { %8326 = vrot.lane.b32.xlu1 %v8325_v30, %s8388_s15 }
 0x38b   : > { %3765 = vrot.lane.b32.xlu0 %v8680_v48, %s8382_s8 }
 0x38d   : > { %4489 = vrot.lane.b32.xlu1 %v8680_v48, %s8387_s14 }
 0x38f   : > { %4491 = vrot.lane.b32.xlu0 %v8696_v31, %s8387_s14 }
 0x391   : > { %4493 = vrot.lane.b32.xlu1 %v3844_v29, %s8387_s14 }
 0x393   : > { %4495 = vrot.lane.b32.xlu0 %v4468_v5, %s8387_s14 }
 0x395   : > { %4497 = vrot.lane.b32.xlu1 %v4469_v32, %s8387_s14 }
 0x397   : > { %4499 = vrot.lane.b32.xlu0 %v4470_v33, %s8387_s14 }
 0x399   : > { %4473 = vperm.xlu1 %8324, %v8696_v31  }
 0x39b   : > { %4478 = vperm.xlu0 %8323, %v4468_v5  }
 0x39d   : > { %4483 = vperm.xlu1 %8324, %v4470_v33  }
 0x39f   : > { %4599 = vrot.lane.b32.xlu0 %v8696_v31, %s8388_s15 }
 0x3a0   : > { %8331 = vset.pattern.permute.xlu0 %v8397_v35 }
 0x3a1   : > { %4693 = vrot.lane.b32.xlu1 %v4691_v34, %s8387_s14 }
 0x3a2   : > { %8330 = vset.pattern.permute.xlu1 %v8397_v35 }
 0x3a3   : > { %4786 = vrot.lane.b32.xlu0 %v8696_v31, %s8390_s17 }
 0x3a5   : > { %1563 = vperm.xlu1 %8330, %v8533_v46  }
 0x3a7   : > { %1568 = vperm.xlu0 %8331, %v8535_v47  }
 0x3a9   : > { %1573 = vperm.xlu1 %8330, %v8625_v3  }
 0x3ad   : > { %1578 = vperm.xlu1 %8330, %v8634_v9  }
 0x3cb   : > { %v8716_v36 = vpop.permute.xlu1 %2619  ;;  %v8718_v37 = vpop.permute.xlu0 %2535 }
 0x3cc   : > { %7484 = vmatprep.subr.mxu1 %v8716_v36 }
 0x3cd   : > { %7485 = vmatpush3.msra.mxu1 %v8716_v36 }
 0x3cf   : > { %v8722_v38 = vpop.permute.xlu1 %2775  ;;  %v2260_v40 = vpop.permute.xlu0 %2259 }
 0x3d0   : > { %7463 = vmatmul.mubr.msk.f32.gmra.mrb[42].mxu1 %vm2261_vm4, %v2260_v40  ;;  %7494 = vmatprep.subr.mxu1 %v8722_v38  ;;  %vm5832_vm4 = vcmask 785408  }
 0x3d3   : > { %v8736_v53 = vpop.permute.xlu0 %2697  ;;  %v8746_v57 = vpop.permute.xlu1 %2931 }
 0x3d7   : > { %v8760_v7 = vpop.permute.xlu0 %2853 }
 0x3db   : > { %v8776_v10 = vpop.permute.xlu0 %3009 }
 0x3df   : > { %v3114_v5 = vpop.permute.xlu0 %3113 }
 0x3e5   : > { %v3118_v33 = vpop.permute.xlu0 %3117 }
 0x3e9   : > { %v3122_v35 = vpop.permute.xlu0 %3121 }
 0x441   : > { %v8734_v52 = vpop.f32.mrb[8].mxu0 }
 0x442   : > { %v8738_v54 = vpop.f32.mrb[9].mxu0 }
 0x445   : > { %v8742_v55 = vpop.f32.mrb[10].mxu0 }
 0x446   : > { %v8744_v56 = vpop.f32.mrb[11].mxu0 }
 0x45a   : > { %v7461_v46 = vpop.f32.mrb[40].mxu1 }
 0x45b   : > { %v2342_v47 = vadd.f32 %v7461_v46, %v8655_v12  ;;  %v2336_v3 = vpop.f32.mrb[41].mxu1 }
 0x45c   : > { %v2337_v9 = vadd.f32 %v2336_v3, %v8651_v60  ;;  %v8752_v60 = vpop.permute.xlu1 %3111 }
 0x45d   : > { %v2356_v41 = vmul.f32 0.2, %v2342_v47  ;;  %v3124_v32 = vsel %vm3123_vm6, %v8752_v60, %v3114_v5 }
 0x45e   : > { %v2355_v43 = vmul.f32 0.2, %v2337_v9 }
 0x45f   : > { %v2360_v50 = vmax.f32 %v2342_v47, %v2356_v41 }
 0x460   : > { %v2359_v44 = vmax.f32 %v2337_v9, %v2355_v43  ;;  %v8754_v61 = vpop.permute.xlu1 %3115  ;;  %v3101_v9 = vpop.permute.xlu0 %3100 }
 0x461   : > { %v3125_v34 = vsel %vm3123_vm6, %v8754_v61, %v3118_v33 }
 0x462   : > { %7469 = vmatprep.mubr.msk.f32.mxu0 %vm163_vm0, %v2359_v44 }
 0x463   : > { %7470 = vmatmul.mubr.msk.f32.vlgmr.msra.gmra.mrb[12].mxu0 %vm163_vm0, %v2360_v50 }
 0x464   : > { %8038 = vmatpush3.bf16.msra.mxu0 %v8661_v23  ;;  %7476 = vmatprep.mubr.msk.f32.mxu0 %vm163_vm0, %v2359_v44  ;;  %v8756_v0 = vpop.permute.xlu1 %3119 }
 0x465   : > { %7479 = vmatprep.subr.mxu0 %v8718_v37  ;;  %v3126_v40 = vsel %vm3123_vm6, %v8756_v0, %v3122_v35 }
 0x467   : > { %7477 = vmatmul.mubr.msk.f32.vlgmr.msra.gmra.mrb[14].mxu0 %vm163_vm0, %v2360_v50 }
 0x468   : > { %7480 = vmatpush3.msra.mxu0 %v8718_v37  ;;  %v8762_v8 = vpop.permute.xlu1 %3095 }
 0x469   : > { %7489 = vmatprep.subr.mxu0 %v8736_v53 }
 0x46c   : > { %v8778_v11 = vpop.permute.xlu1 %3105 }
 0x470   : > { %v3312_v12 = vpop.permute.xlu1 %3311 }
 0x474   : > { %v3495_v61 = vpop.permute.xlu1 %3494 }
 0x4a3   : > { %v8748_v58 = vpop.f32.mrb[42].mxu1 }
 0x4a4   : > { %v8750_v59 = vpop.f32.mrb[43].mxu1 }
 0x536   : > { %v7471_v62 = vpop.f32.mrb[12].mxu0 }
 0x537   : > { %v2441_v63 = vpop.f32.mrb[13].mxu0 }
 0x53a   : > { %v7478_v1 = vpop.f32.mrb[14].mxu0 }
 0x53b   : > { %v2532_v2 = vmax.f32 %v7471_v62, %v7478_v1  ;;  %v2522_v6 = vpop.f32.mrb[15].mxu0 }
 0x53c   : > { %v2531_v4 = vmax.f32 %v2441_v63, %v2522_v6  ;;  %v3400_v63 = vpop.permute.xlu0 %3399 }
 0x53e   : > { %7481 = vmatprep.mubr.msk.f32.mxu0 %vm927_vm2, %v2531_v4  ;;  %7486 = vmatprep.mubr.msk.f32.mxu1 %vm927_vm2, %v2531_v4 }
 0x53f   : > { %7482 = vmatmul.mubr.msk.f32.vlgmr.msra.gmra.mrb[16].mxu0 %vm927_vm2, %v2532_v2  ;;  %7487 = vmatmul.mubr.msk.f32.vlgmr.msra.gmra.mrb[44].mxu1 %vm927_vm2, %v2532_v2 }
 0x540   : > { %7491 = vmatprep.mubr.msk.f32.mxu0 %vm927_vm2, %v2531_v4  ;;  %7496 = vmatprep.mubr.msk.f32.mxu1 %vm927_vm2, %v2531_v4 }
 0x541   : > { %7490 = vmatpush3.msra.mxu0 %v8736_v53  ;;  %7495 = vmatpush3.msra.mxu1 %v8722_v38 }
 0x542   : > { %7499 = vmatprep.subr.mxu0 %v8760_v7  ;;  %7504 = vmatprep.subr.mxu1 %v8746_v57 }
 0x543   : > { %7492 = vmatmul.mubr.msk.f32.vlgmr.msra.gmra.mrb[18].mxu0 %vm927_vm2, %v2532_v2  ;;  %7497 = vmatmul.mubr.msk.f32.vlgmr.msra.gmra.mrb[46].mxu1 %vm927_vm2, %v2532_v2 }
 0x544   : > { %7501 = vmatprep.mubr.msk.f32.mxu0 %vm927_vm2, %v2531_v4  ;;  %7506 = vmatprep.mubr.msk.f32.mxu1 %vm927_vm2, %v2531_v4 }
 0x545   : > { %7500 = vmatpush3.msra.mxu0 %v8760_v7  ;;  %7505 = vmatpush3.msra.mxu1 %v8746_v57 }
 0x546   : > { %7509 = vmatprep.subr.mxu0 %v8776_v10  ;;  %8039 = vmatprep.subr.bf16.mxu1 %v8393_v39 }
 0x547   : > { %7502 = vmatmul.mubr.msk.f32.vlgmr.msra.gmra.mrb[20].mxu0 %vm927_vm2, %v2532_v2  ;;  %7507 = vmatmul.mubr.msk.f32.vlgmr.msra.gmra.mrb[48].mxu1 %vm927_vm2, %v2532_v2 }
 0x548   : > { %7511 = vmatprep.mubr.msk.f32.mxu0 %vm927_vm2, %v2531_v4  ;;  %7510 = vmatpush3.msra.mxu0 %v8776_v10 }
 0x549   : > { %7542 = vmatprep.mubr.msk.f32.mxu1 %vm8394_vm3, %v8395_v42  ;;  %7562 = vmatprep.subr.mxu0 %v8395_v42 }
 0x54b   : > { %7512 = vmatmul.mubr.msk.f32.vlgmr.msra.gmra.mrb[22].mxu0 %vm927_vm2, %v2532_v2 }
 0x54c   : > { %7563 = vmatpush3.msra.mxu0 %v3312_v12  ;;  %7564 = vmatprep.mubr.msk.f32.mxu0 %vm8394_vm3, %v8395_v42 }
 0x54d   : > { %7573 = vmatprep.subr.mxu0 %v8395_v42 }
 0x612   : > { %v7483_v13 = vpop.f32.mrb[16].mxu0  ;;  %v7488_v14 = vpop.f32.mrb[44].mxu1 }
 0x613   : > { %v2610_v15 = vpop.f32.mrb[17].mxu0  ;;  %v2688_v16 = vpop.f32.mrb[45].mxu1 }
 0x614   : > { %v8040_v45 = vpack.c.bf16 %v7483_v13, %v2610_v15  ;;  %v8043_v17 = vpack.c.bf16 %v7488_v14, %v2688_v16  ;;  %v3679_v16 = vpop.permute.xlu1 %3678 }
 0x616   : > { %v7493_v18 = vpop.f32.mrb[18].mxu0  ;;  %v7498_v19 = vpop.f32.mrb[46].mxu1  ;;  %8041 = vmatpush3.bf16.msra.mxu1 %v8040_v45 }
 0x617   : > { %v2766_v20 = vpop.f32.mrb[19].mxu0  ;;  %v2844_v21 = vpop.f32.mrb[47].mxu1  ;;  %8042 = vmatprep.subr.bf16.mxu1 %v8393_v39 }
 0x618   : > { %v8046_v51 = vpack.c.bf16 %v7493_v18, %v2766_v20  ;;  %v8049_v22 = vpack.c.bf16 %v7498_v19, %v2844_v21  ;;  %v3584_v45 = vpop.permute.xlu0 %3583 }
 0x61a   : > { %v7503_v23 = vpop.f32.mrb[20].mxu0  ;;  %v7508_v24 = vpop.f32.mrb[48].mxu1  ;;  %8044 = vmatpush3.bf16.msra.mxu1 %v8043_v17 }
 0x61b   : > { %v2922_v25 = vpop.f32.mrb[21].mxu0  ;;  %v3000_v26 = vpop.f32.mrb[49].mxu1  ;;  %8045 = vmatprep.subr.bf16.mxu1 %v8393_v39 }
 0x61c   : > { %v8052_v27 = vpack.c.bf16 %v7503_v23, %v2922_v25  ;;  %v8055_v49 = vpack.c.bf16 %v7508_v24, %v3000_v26 }
 0x61e   : > { %v7513_v28 = vpop.f32.mrb[22].mxu0  ;;  %8047 = vmatpush3.bf16.msra.mxu1 %v8046_v51 }
 0x61f   : > { %v3078_v29 = vpop.f32.mrb[23].mxu0  ;;  %8048 = vmatprep.subr.bf16.mxu1 %v8393_v39 }
 0x620   : > { %v8058_v30 = vpack.c.bf16 %v7513_v28, %v3078_v29 }
 0x622   : > { %8050 = vmatpush3.bf16.msra.mxu1 %v8049_v22 }
 0x623   : > { %8051 = vmatprep.subr.bf16.mxu1 %v8393_v39 }
 0x626   : > { %8053 = vmatpush3.bf16.msra.mxu1 %v8052_v27 }
 0x627   : > { %8054 = vmatprep.subr.bf16.mxu1 %v8393_v39 }
 0x62a   : > { %8056 = vmatpush3.bf16.msra.mxu1 %v8055_v49 }
 0x62b   : > { %8057 = vmatprep.subr.bf16.mxu1 %v8393_v39 }
 0x62e   : > { %8059 = vmatpush3.bf16.msra.mxu1 %v8058_v30 }
 0x62f   : > { %7551 = vmatprep.subr.mxu1 %v8395_v42 }
 0x631   : > { %7543 = vmatmul.mubr.msk.f32.vlgmr.msra.gmra.mrb[50].mxu1 %vm3127_vm7, %v3124_v32 }
 0x632   : > { %7545 = vmatprep.mubr.msk.f32.mxu1 %vm8394_vm3, %v8395_v42  ;;  %7552 = vmatpush3.msra.mxu1 %v8680_v48 }
 0x633   : > { %7584 = vmatprep.subr.mxu1 %v8395_v42 }
 0x635   : > { %7546 = vmatmul.mubr.msk.f32.gmra.mrb[52].mxu1 %vm3127_vm7, %v3125_v34 }
 0x636   : > { %7548 = vmatprep.mubr.msk.f32.mxu1 %vm8394_vm3, %v8395_v42 }
 0x639   : > { %7549 = vmatmul.mubr.msk.f32.gmra.mrb[54].mxu1 %vm3127_vm7, %v3126_v40 }
 0x63a   : > { %7553 = vmatprep.mubr.msk.f32.mxu1 %vm8394_vm3, %v8395_v42 }
 0x704   : > { %v3200_v46 = vpop.f32.mrb[50].mxu1 }
 0x705   : > { %v3201_v47 = vadd.f32 %v3200_v46, %v8762_v8  ;;  %v7544_v3 = vpop.f32.mrb[51].mxu1 }
 0x706   : > { %v4863_v3 = vld [vmem:[#allocation2 + $0x40] sm:$0xf] }
 0x707   : > { %v3214_v41 = vmul.f32 0.2, %v3201_v47  ;;  %4966 = vrot.lane.b32.xlu1 %v4863_v3, %s8379_s5  ;;  %4865 = vrot.lane.b32.xlu0 %v4863_v3, %s8377_s3 }
 0x708   : > { %v3205_v43 = vpop.f32.mrb[52].mxu1 }
 0x709   : > { %v3217_v44 = vmax.f32 %v3201_v47, %v3214_v41  ;;  %v3206_v50 = vadd.f32 %v3205_v43, %v3101_v9  ;;  %v7547_v60 = vpop.f32.mrb[53].mxu1  ;;  %v2251_v9 = vpop.permute.xlu1 %2250 }
 0x70b   : > { %v3215_v62 = vmul.f32 0.2, %v3206_v50  ;;  %7554 = vmatmul.mubr.msk.f32.vlgmr.msra.gmra.mrb[56].mxu1 %vm927_vm2, %v3217_v44  ;;  %7565 = vmatmul.mubr.msk.f32.vlgmr.msra.gmra.mrb[24].mxu0 %vm927_vm2, %v3217_v44 }
 0x70c   : > { %v3210_v0 = vpop.f32.mrb[54].mxu1  ;;  %7556 = vmatprep.mubr.msk.f32.mxu1 %vm8394_vm3, %v8395_v42  ;;  %7567 = vmatprep.mubr.msk.f32.mxu0 %vm8394_vm3, %v8395_v42 }
 0x70d   : > { %v3218_v1 = vmax.f32 %v3206_v50, %v3215_v62  ;;  %v3211_v2 = vadd.f32 %v3210_v0, %v8778_v11  ;;  %v7550_v6 = vpop.f32.mrb[55].mxu1  ;;  %7574 = vmatpush3.msk.msra.mxu0 %vm3411_vm8, %v3400_v63  ;;  %7585 = vmatpush3.msk.msra.mxu1 %vm3411_vm8, %v3495_v61  ;;  %v2247_v61 = vpop.permute.xlu0 %2246 }
 0x70e   : > { %7606 = vmatprep.subr.mxu1 %v8395_v42  ;;  %7595 = vmatprep.subr.mxu0 %v8395_v42  ;;  %v8327_v62 = vpop.permute.xlu1 %8326 }
 0x70f   : > { %v3216_v4 = vmul.f32 0.2, %v3211_v2  ;;  %7557 = vmatmul.mubr.msk.f32.gmra.mrb[58].mxu1 %vm927_vm2, %v3218_v1  ;;  %7568 = vmatmul.mubr.msk.f32.gmra.mrb[26].mxu0 %vm927_vm2, %v3218_v1  ;;  %v2347_v1 = vadd.f32 %v8750_v59, %v2247_v61 }
 0x710   : > { %7559 = vmatprep.mubr.msk.f32.mxu1 %vm8394_vm3, %v8395_v42  ;;  %7570 = vmatprep.mubr.msk.f32.mxu0 %vm8394_vm3, %v8395_v42 }
 0x711   : > { %v3219_v8 = vmax.f32 %v3211_v2, %v3216_v4  ;;  %5144 = vrot.lane.b32.xlu1 %v4863_v3, %s8380_s6  ;;  %5055 = vrot.lane.b32.xlu0 %v4863_v3, %s8378_s4  ;;  %v8329_v4 = vunpack.i.h.bf16 %v8327_v62 }
 0x713   : > { %7560 = vmatmul.mubr.msk.f32.gmra.mrb[60].mxu1 %vm927_vm2, %v3219_v8  ;;  %7571 = vmatmul.mubr.msk.f32.gmra.mrb[28].mxu0 %vm927_vm2, %v3219_v8  ;;  %v8328_v8 = vunpack.i.l.bf16 %v8327_v62 }
 0x714   : > { %7575 = vmatprep.mubr.msk.f32.mxu0 %vm8394_vm3, %v8395_v42  ;;  %7586 = vmatprep.mubr.msk.f32.mxu1 %vm8394_vm3, %v8395_v42 }
 0x715   : > { %5322 = vrot.lane.b32.xlu1 %v4863_v3, %s8382_s8  ;;  %5233 = vrot.lane.b32.xlu0 %v4863_v3, %s8381_s7 }
 0x719   : > { %3767 = vrot.lane.b32.xlu1 %v8680_v48, %s8386_s13  ;;  %5411 = vrot.lane.b32.xlu0 %v4863_v3, %s8383_s11 }
 0x71d   : > { %4788 = vrot.lane.b32.xlu0 %v8696_v31, %s8391_s18  ;;  %v2352_v31 = vadd.f32 %v8748_v58, %v2251_v9 }
 0x71f   : > { %v2358_v59 = vmul.f32 0.2, %v2352_v31 }
 0x721   : > { %v2362_v58 = vmax.f32 %v2352_v31, %v2358_v59 }
 0x7de   : > { %v3296_v11 = vpop.f32.mrb[56].mxu1  ;;  %v3380_v12 = vpop.f32.mrb[24].mxu0 }
 0x7df   : > { %v3394_v13 = vmax.f32 %v3296_v11, %v3380_v12  ;;  %v7555_v14 = vpop.f32.mrb[57].mxu1  ;;  %v7566_v15 = vpop.f32.mrb[25].mxu0 }
 0x7e0   : > { %v2357_v14 = vmul.f32 0.2, %v2347_v1 }
 0x7e1   : > { %7576 = vmatmul.mubr.msk.f32.vlgmr.msra.gmra.mrb[30].mxu0 %vm3401_vm9, %v3394_v13  ;;  %7587 = vmatmul.mubr.msk.f32.vlgmr.msra.gmra.mrb[62].mxu1 %vm3401_vm9, %v3394_v13 }
 0x7e2   : > { %7607 = vmatpush3.msk.msra.mxu1 %vm3595_vm10, %v3679_v16  ;;  %v3301_v17 = vpop.f32.mrb[58].mxu1  ;;  %v3385_v18 = vpop.f32.mrb[26].mxu0  ;;  %7578 = vmatprep.mubr.msk.f32.mxu0 %vm8394_vm3, %v8395_v42 }
 0x7e3   : > { %v3395_v19 = vmax.f32 %v3301_v17, %v3385_v18  ;;  %7638 = vmatprep.subr.mxu1 %v8716_v36  ;;  %v7558_v20 = vpop.f32.mrb[59].mxu1  ;;  %v7569_v21 = vpop.f32.mrb[27].mxu0  ;;  %7589 = vmatprep.mubr.msk.f32.mxu1 %vm8394_vm3, %v8395_v42  ;;  %v8063_v17 = vpack.c.bf16 %v8329_v4, %v8328_v8 }
 0x7e4   : > { %7596 = vmatpush3.msk.msra.mxu0 %vm3595_vm10, %v3584_v45  ;;  %v3766_v18 = vpop.permute.xlu0 %3765 }
 0x7e5   : > { %7579 = vmatmul.mubr.msk.f32.gmra.mrb[32].mxu0 %vm3401_vm9, %v3395_v19  ;;  %7590 = vmatmul.mubr.msk.f32.gmra.mrb[64].mxu1 %vm3401_vm9, %v3395_v19  ;;  %v2361_v19 = vmax.f32 %v2347_v1, %v2357_v14 }
 0x7e6   : > { %v3306_v51 = vpop.f32.mrb[60].mxu1  ;;  %v3390_v22 = vpop.f32.mrb[28].mxu0  ;;  %7581 = vmatprep.mubr.msk.f32.mxu0 %vm8394_vm3, %v8395_v42  ;;  %7592 = vmatprep.mubr.msk.f32.mxu1 %vm8394_vm3, %v8395_v42 }
 0x7e7   : > { %v3396_v23 = vmax.f32 %v3306_v51, %v3390_v22  ;;  %v7561_v24 = vpop.f32.mrb[61].mxu1  ;;  %v7572_v25 = vpop.f32.mrb[29].mxu0  ;;  %8060 = vmatprep.subr.bf16.mxu0 %v8393_v39 }
 0x7e8   : > { %v8898_v20 = vpop.permute.xlu0 %4491 }
 0x7e9   : > { %7582 = vmatmul.mubr.msk.f32.gmra.mrb[34].mxu0 %vm3401_vm9, %v3396_v23  ;;  %7593 = vmatmul.mubr.msk.f32.gmra.mrb[66].mxu1 %vm3401_vm9, %v3396_v23 }
 0x7ea   : > { %7597 = vmatprep.mubr.msk.f32.mxu0 %vm8394_vm3, %v8395_v42  ;;  %7608 = vmatprep.mubr.msk.f32.mxu1 %vm8394_vm3, %v8395_v42 }
 0x7ec   : > { %v8902_v51 = vpop.permute.xlu0 %4495 }
 0x7f0   : > { %v8906_v25 = vpop.permute.xlu0 %4499 }
 0x8b4   : > { %v3480_v26 = vpop.f32.mrb[30].mxu0  ;;  %v3564_v27 = vpop.f32.mrb[62].mxu1 }
 0x8b5   : > { %v3578_v49 = vmax.f32 %v3480_v26, %v3564_v27  ;;  %v7577_v28 = vpop.f32.mrb[31].mxu0  ;;  %v7588_v29 = vpop.f32.mrb[63].mxu1 }
 0x8b7   : > { %7598 = vmatmul.mubr.msk.f32.vlgmr.msra.gmra.mrb[36].mxu0 %vm3585_vm11, %v3578_v49  ;;  %7609 = vmatmul.mubr.msk.f32.vlgmr.msra.gmra.mrb[68].mxu1 %vm3585_vm11, %v3578_v49 }
 0x8b8   : > { %7639 = vmatpush3.msra.mxu1 %v8716_v36  ;;  %v3485_v30 = vpop.f32.mrb[32].mxu0  ;;  %v3569_v5 = vpop.f32.mrb[64].mxu1  ;;  %7600 = vmatprep.mubr.msk.f32.mxu0 %vm8394_vm3, %v8395_v42 }
 0x8b9   : > { %v3579_v32 = vmax.f32 %v3485_v30, %v3569_v5  ;;  %7648 = vmatprep.subr.mxu1 %v8722_v38  ;;  %v7580_v33 = vpop.f32.mrb[33].mxu0  ;;  %v7591_v34 = vpop.f32.mrb[65].mxu1  ;;  %7611 = vmatprep.mubr.msk.f32.mxu1 %vm8394_vm3, %v8395_v42 }
 0x8bb   : > { %7601 = vmatmul.mubr.msk.f32.gmra.mrb[38].mxu0 %vm3585_vm11, %v3579_v32  ;;  %7612 = vmatmul.mubr.msk.f32.gmra.mrb[70].mxu1 %vm3585_vm11, %v3579_v32 }
 0x8bc   : > { %v3490_v35 = vpop.f32.mrb[34].mxu0  ;;  %v3574_v40 = vpop.f32.mrb[66].mxu1  ;;  %7603 = vmatprep.mubr.msk.f32.mxu0 %vm8394_vm3, %v8395_v42  ;;  %7614 = vmatprep.mubr.msk.f32.mxu1 %vm8394_vm3, %v8395_v42 }
 0x8bd   : > { %v3580_v36 = vmax.f32 %v3490_v35, %v3574_v40  ;;  %v7583_v46 = vpop.f32.mrb[35].mxu0  ;;  %v7594_v47 = vpop.f32.mrb[67].mxu1 }
 0x8bf   : > { %7604 = vmatmul.mubr.msk.f32.gmra.mrb[40].mxu0 %vm3585_vm11, %v3580_v36  ;;  %7615 = vmatmul.mubr.msk.f32.gmra.mrb[72].mxu1 %vm3585_vm11, %v3580_v36 }
 0x8c0   : > { %7623 = vmatprep.mubr.msk.f32.mxu0 %vm8394_vm3, %v8395_v42 }
 0x98a   : > { %v3664_v41 = vpop.f32.mrb[36].mxu0  ;;  %v3748_v43 = vpop.f32.mrb[68].mxu1 }
 0x98b   : > { %v3762_v44 = vmax.f32 %v3664_v41, %v3748_v43  ;;  %v7599_v50 = vpop.f32.mrb[37].mxu0  ;;  %v7610_v60 = vpop.f32.mrb[69].mxu1 }
 0x98e   : > { %v3669_v63 = vpop.f32.mrb[38].mxu0  ;;  %v3753_v0 = vpop.f32.mrb[70].mxu1 }
 0x98f   : > { %v3763_v2 = vmax.f32 %v3669_v63, %v3753_v0  ;;  %v7602_v6 = vpop.f32.mrb[39].mxu0  ;;  %v7613_v48 = vpop.f32.mrb[71].mxu1 }
 0x991   : > { %v8061_v11 = vpack.c.bf16 %v3763_v2, %v3762_v44 }
 0x992   : > { %v3674_v12 = vpop.f32.mrb[40].mxu0  ;;  %v3758_v13 = vpop.f32.mrb[72].mxu1 }
 0x993   : > { %v3764_v15 = vmax.f32 %v3674_v12, %v3758_v13  ;;  %v7605_v16 = vpop.f32.mrb[41].mxu0  ;;  %v7616_v45 = vpop.f32.mrb[73].mxu1  ;;  %8062 = vmatpush3.bf16.msra.mxu0 %v8061_v11 }
 0x994   : > { %7621 = vmatprep.subr.mxu0 %v8395_v42 }
 0x997   : > { %7622 = vmatpush3.msra.mxu0 %v3764_v15 }
 0x998   : > { %7624 = vmatmul.mubr.msk.f32.vlgmr.msra.gmra.mrb[42].mxu0 %vm3770_vm12, %v3766_v18  ;;  %8064 = vmatprep.subr.bf16.mxu0 %v8063_v17 }
 0x999   : > { %8066 = vmatpush3.bf16.msra.mxu0 %v8063_v17  ;;  %7630 = vmatprep.mubr.msk.f32.mxu0 %vm163_vm0, %v2361_v19 }
 0x99a   : > { %7633 = vmatprep.subr.mxu0 %v8718_v37 }
 0x99c   : > { %7631 = vmatmul.mubr.msk.f32.vlgmr.msra.gmra.mrb[44].mxu0 %vm163_vm0, %v2362_v58 }
 0x99d   : > { %7634 = vmatpush3.msra.mxu0 %v8718_v37  ;;  %v8920_v37 = vpop.permute.xlu0 %4478 }
 0x99e   : > { %7643 = vmatprep.subr.mxu0 %v8736_v53 }
 0xa6b   : > { %v8900_v21 = vpop.f32.mrb[42].mxu0 }
 0xa6c   : > { %v7625_v22 = vpop.f32.mrb[43].mxu0 }
 0xa6f   : > { %v7632_v23 = vpop.f32.mrb[44].mxu0 }
 0xa70   : > { %v3925_v24 = vpop.f32.mrb[45].mxu0 }
 0xa71   : > { %7635 = vmatprep.mubr.msk.f32.mxu0 %vm927_vm2, %v3925_v24  ;;  %7640 = vmatprep.mubr.msk.f32.mxu1 %vm927_vm2, %v3925_v24 }
 0xa72   : > { %7636 = vmatmul.mubr.msk.f32.vlgmr.msra.gmra.mrb[46].mxu0 %vm927_vm2, %v7632_v23  ;;  %7641 = vmatmul.mubr.msk.f32.vlgmr.msra.gmra.mrb[74].mxu1 %vm927_vm2, %v7632_v23 }
 0xa73   : > { %7644 = vmatpush3.msra.mxu0 %v8736_v53  ;;  %7649 = vmatpush3.msra.mxu1 %v8722_v38  ;;  %v4600_v38 = vpop.permute.xlu0 %4599  ;;  %v4490_v53 = vpop.permute.xlu1 %4489 }
 0xa74   : > { %7645 = vmatprep.mubr.msk.f32.mxu0 %vm927_vm2, %v3925_v24  ;;  %7650 = vmatprep.mubr.msk.f32.mxu1 %vm927_vm2, %v3925_v24  ;;  %v4502_v6 = vsel %vm4501_vm13, %v4490_v53, %v8898_v20 }
 0xa75   : > { %7653 = vmatprep.subr.mxu0 %v8760_v7  ;;  %7658 = vmatprep.subr.mxu1 %v8746_v57 }
 0xa76   : > { %7646 = vmatmul.mubr.msk.f32.vlgmr.msra.gmra.mrb[48].mxu0 %vm927_vm2, %v7632_v23  ;;  %7651 = vmatmul.mubr.msk.f32.vlgmr.msra.gmra.mrb[76].mxu1 %vm927_vm2, %v7632_v23 }
 0xa77   : > { %7654 = vmatpush3.msra.mxu0 %v8760_v7  ;;  %7659 = vmatpush3.msra.mxu1 %v8746_v57  ;;  %v4494_v57 = vpop.permute.xlu1 %4493  ;;  %v8948_v1 = vpop.permute.xlu0 %4786 }
 0xa78   : > { %7655 = vmatprep.mubr.msk.f32.mxu0 %vm927_vm2, %v3925_v24  ;;  %7660 = vmatprep.mubr.msk.f32.mxu1 %vm927_vm2, %v3925_v24  ;;  %v4503_v8 = vsel %vm4501_vm13, %v4494_v57, %v8902_v51 }
 0xa79   : > { %7663 = vmatprep.subr.mxu0 %v8776_v10  ;;  %8067 = vmatprep.subr.bf16.mxu1 %v8393_v39 }
 0xa7a   : > { %7656 = vmatmul.mubr.msk.f32.vlgmr.msra.gmra.mrb[50].mxu0 %vm927_vm2, %v7632_v23  ;;  %7661 = vmatmul.mubr.msk.f32.vlgmr.msra.gmra.mrb[78].mxu1 %vm927_vm2, %v7632_v23 }
 0xa7b   : > { %7664 = vmatpush3.msra.mxu0 %v8776_v10  ;;  %7665 = vmatprep.mubr.msk.f32.mxu0 %vm927_vm2, %v3925_v24  ;;  %v4498_v7 = vpop.permute.xlu1 %4497  ;;  %v1569_v48 = vpop.permute.xlu0 %1568 }
 0xa7c   : > { %7696 = vmatprep.mubr.msk.f32.mxu1 %vm8394_vm3, %v8395_v42  ;;  %7705 = vmatprep.subr.mxu0 %v8395_v42  ;;  %v1682_v31 = vadd.f32 %v8734_v52, %v1569_v48 }
 0xa7e   : > { %7666 = vmatmul.mubr.msk.f32.vlgmr.msra.gmra.mrb[52].mxu0 %vm927_vm2, %v7632_v23  ;;  %v1696_v14 = vmul.f32 0.2, %v1682_v31 }
 0xa7f   : > { %7706 = vmatpush3.msra.mxu0 %v4600_v38  ;;  %7707 = vmatprep.mubr.msk.f32.mxu0 %vm8394_vm3, %v8395_v42  ;;  %v8937_v10 = vpop.permute.xlu1 %4473 }
 0xa80   : > { %7716 = vmatprep.subr.mxu0 %v8395_v42  ;;  %v8975_v52 = vmax.f32 %v1682_v31, %v1696_v14  ;;  %v4866_v31 = vpop.permute.xlu0 %4865 }
 0xa83   : > { %v8939_v26 = vpop.permute.xlu1 %4483 }
 0xa87   : > { %v8941_v32 = vpop.permute.xlu1 %4693 }
 0xa8b   : > { %v1564_v43 = vpop.permute.xlu1 %1563 }
 0xa8c   : > { %v1677_v4 = vadd.f32 %v8738_v54, %v1564_v43  ;;  %v4504_v54 = vsel %vm4501_vm13, %v4498_v7, %v8906_v25 }
 0xa8e   : > { %v1695_v12 = vmul.f32 0.2, %v1677_v4 }
 0xa8f   : > { %v1574_v63 = vpop.permute.xlu1 %1573 }
 0xa90   : > { %v1687_v13 = vadd.f32 %v8744_v56, %v1574_v63  ;;  %v8970_v16 = vmax.f32 %v1677_v4, %v1695_v12  ;;  %v9069_v63 = vld [vmem:[#allocation2 + $0x50] sm:$0xff] }
 0xa91   : > { %5512 = vrot.lane.b32.xlu1 %v9069_v63, %s8381_s7  ;;  %5604 = vrot.lane.b32.xlu0 %v9069_v63, %s8380_s6 }
 0xa92   : > { %v1697_v45 = vmul.f32 0.2, %v1687_v13 }
 0xa93   : > { %v1579_v0 = vpop.permute.xlu1 %1578 }
 0xa94   : > { %v1692_v15 = vadd.f32 %v8742_v55, %v1579_v0  ;;  %v8977_v17 = vmax.f32 %v1687_v13, %v1697_v45  ;;  %v9075_v0 = vld [vmem:[#allocation2 + $0xb8] sm:$0xff] }
 0xa95   : > { %5514 = vrot.lane.b32.xlu1 %v9075_v0, %s8381_s7  ;;  %5606 = vrot.lane.b32.xlu0 %v9075_v0, %s8380_s6 }
 0xa96   : > { %v1698_v56 = vmul.f32 0.2, %v1692_v15 }
 0xa97   : > { %v4967_v2 = vpop.permute.xlu1 %4966 }
 0xa98   : > { %v8984_v55 = vmax.f32 %v1692_v15, %v1698_v56 }
 0xa9b   : > { %v5145_v11 = vpop.permute.xlu1 %5144 }
 0xa9f   : > { %v5323_v59 = vpop.permute.xlu1 %5322 }
 0xaa3   : > { %v3768_v15 = vpop.permute.xlu1 %3767 }
 0xaa4   : > { %v3840_v45 = vadd.f32 %v8900_v21, %v3768_v15 }
 0xb45   : > { %v7637_v27 = vpop.f32.mrb[46].mxu0  ;;  %v7642_v49 = vpop.f32.mrb[74].mxu1 }
 0xb46   : > { %v4006_v28 = vpop.f32.mrb[47].mxu0  ;;  %v4081_v29 = vpop.f32.mrb[75].mxu1 }
 0xb47   : > { %v8068_v30 = vpack.c.bf16 %v7637_v27, %v4006_v28  ;;  %v8071_v5 = vpack.c.bf16 %v7642_v49, %v4081_v29 }
 0xb49   : > { %v7647_v33 = vpop.f32.mrb[48].mxu0  ;;  %v7652_v34 = vpop.f32.mrb[76].mxu1  ;;  %8069 = vmatpush3.bf16.msra.mxu1 %v8068_v30 }
 0xb4a   : > { %v4156_v35 = vpop.f32.mrb[49].mxu0  ;;  %v4231_v40 = vpop.f32.mrb[77].mxu1  ;;  %8070 = vmatprep.subr.bf16.mxu1 %v8393_v39 }
 0xb4b   : > { %v8074_v36 = vpack.c.bf16 %v7647_v33, %v4156_v35  ;;  %v8077_v46 = vpack.c.bf16 %v7652_v34, %v4231_v40 }
 0xb4d   : > { %v7657_v47 = vpop.f32.mrb[50].mxu0  ;;  %v7662_v3 = vpop.f32.mrb[78].mxu1  ;;  %8072 = vmatpush3.bf16.msra.mxu1 %v8071_v5 }
 0xb4e   : > { %v4306_v9 = vpop.f32.mrb[51].mxu0  ;;  %v4381_v41 = vpop.f32.mrb[79].mxu1  ;;  %8073 = vmatprep.subr.bf16.mxu1 %v8393_v39 }
 0xb4f   : > { %v8080_v44 = vpack.c.bf16 %v7657_v47, %v4306_v9  ;;  %v8083_v50 = vpack.c.bf16 %v7662_v3, %v4381_v41 }
 0xb51   : > { %v7667_v60 = vpop.f32.mrb[52].mxu0  ;;  %8075 = vmatpush3.bf16.msra.mxu1 %v8074_v36 }
 0xb52   : > { %v4456_v61 = vpop.f32.mrb[53].mxu0  ;;  %8076 = vmatprep.subr.bf16.mxu1 %v8393_v39 }
 0xb53   : > { %v8086_v62 = vpack.c.bf16 %v7667_v60, %v4456_v61 }
 0xb55   : > { %8078 = vmatpush3.bf16.msra.mxu1 %v8077_v46 }
 0xb56   : > { %8079 = vmatprep.subr.bf16.mxu1 %v8393_v39 }
 0xb59   : > { %8081 = vmatpush3.bf16.msra.mxu1 %v8080_v44 }
 0xb5a   : > { %8082 = vmatprep.subr.bf16.mxu1 %v8393_v39 }
 0xb5d   : > { %8084 = vmatpush3.bf16.msra.mxu1 %v8083_v50 }
 0xb5e   : > { %8085 = vmatprep.subr.bf16.mxu1 %v8393_v39 }
 0xb61   : > { %8087 = vmatpush3.bf16.msra.mxu1 %v8086_v62 }
 0xb62   : > { %7744 = vmatprep.subr.msk.mxu1 %vm3411_vm8, %v4967_v2 }
 0xb64   : > { %7697 = vmatmul.mubr.msk.f32.vlgmr.msra.gmra.mrb[80].mxu1 %vm3127_vm7, %v4502_v6 }
 0xb65   : > { %7699 = vmatprep.mubr.msk.f32.mxu1 %vm8394_vm3, %v8395_v42  ;;  %7745 = vmatpush3.msk.msra.mxu1 %vm3411_vm8, %v4967_v2  ;;  %v9081_v2 = vld [vmem:[#allocation2 + $0x120] sm:$0xff] }
 0xb66   : > { %7760 = vmatprep.subr.msk.mxu1 %vm3411_vm8, %v5145_v11  ;;  %5516 = vrot.lane.b32.xlu1 %v9081_v2, %s8381_s7 }
 0xb67   : > { %5608 = vrot.lane.b32.xlu0 %v9081_v2, %s8380_s6 }
 0xb68   : > { %7700 = vmatmul.mubr.msk.f32.gmra.mrb[82].mxu1 %vm3127_vm7, %v4503_v8 }
 0xb69   : > { %7702 = vmatprep.mubr.msk.f32.mxu1 %vm8394_vm3, %v8395_v42 }
 0xb6c   : > { %7703 = vmatmul.mubr.msk.f32.gmra.mrb[84].mxu1 %vm3127_vm7, %v4504_v54  ;;  %v5056_v54 = vpop.permute.xlu0 %5055 }
 0xb6d   : > { %7746 = vmatprep.mubr.msk.f32.mxu1 %vm3401_vm9, %v8970_v16 }
 0xb70   : > { %7747 = vmatmul.mubr.msk.f32.vlgmr.msra.gmra.mrb[86].mxu1 %vm3401_vm9, %v8975_v52  ;;  %v5234_v14 = vpop.permute.xlu0 %5233 }
 0xb71   : > { %7749 = vmatprep.mubr.msk.f32.mxu1 %vm3401_vm9, %v8977_v17  ;;  %7761 = vmatpush3.msk.msra.mxu1 %vm3411_vm8, %v5145_v11 }
 0xb72   : > { %7776 = vmatprep.subr.msk.mxu1 %vm3411_vm8, %v5323_v59 }
 0xb74   : > { %7750 = vmatmul.mubr.msk.f32.gmra.mrb[88].mxu1 %vm3401_vm9, %v8984_v55 }
 0xb75   : > { %7762 = vmatprep.mubr.msk.f32.mxu1 %vm3401_vm9, %v8970_v16 }
 0xb78   : > { %7763 = vmatmul.mubr.msk.f32.vlgmr.msra.gmra.mrb[90].mxu1 %vm3401_vm9, %v8975_v52 }
 0xb79   : > { %7765 = vmatprep.mubr.msk.f32.mxu1 %vm3401_vm9, %v8977_v17  ;;  %7777 = vmatpush3.msk.msra.mxu1 %vm3411_vm8, %v5323_v59 }
 0xb7a   : > { %7792 = vmatprep.subr.mxu1 %v8395_v42 }
 0xb7c   : > { %7766 = vmatmul.mubr.msk.f32.gmra.mrb[92].mxu1 %vm3401_vm9, %v8984_v55 }
 0xb7d   : > { %7778 = vmatprep.mubr.msk.f32.mxu1 %vm3401_vm9, %v8970_v16 }
 0xb80   : > { %7779 = vmatmul.mubr.msk.f32.vlgmr.msra.gmra.mrb[94].mxu1 %vm3401_vm9, %v8975_v52 }
 0xb81   : > { %7781 = vmatprep.mubr.msk.f32.mxu1 %vm3401_vm9, %v8977_v17 }
 0xb84   : > { %7782 = vmatmul.mubr.msk.f32.gmra.mrb[96].mxu1 %vm3401_vm9, %v8984_v55 }
 0xb85   : > { %7794 = vmatprep.mubr.msk.f32.mxu1 %vm8394_vm3, %v8395_v42 }
 0xc37   : > { %v4577_v18 = vpop.f32.mrb[80].mxu1 }
 0xc38   : > { %v4578_v19 = vadd.f32 %v4577_v18, %v8937_v10  ;;  %v7698_v58 = vpop.f32.mrb[81].mxu1  ;;  %v5504_v18 = vld [vmem:[#allocation2 + $0xb0] sm:$0xff] }
 0xc39   : > { %v5507_v58 = vld [vmem:[#allocation2 + $0x118] sm:$0xff] }
 0xc3a   : > { %v4591_v20 = vmul.f32 0.2, %v4578_v19 }
 0xc3b   : > { %v4582_v51 = vpop.f32.mrb[82].mxu1 }
 0xc3c   : > { %v4594_v22 = vmax.f32 %v4578_v19, %v4591_v20  ;;  %v4583_v23 = vadd.f32 %v4582_v51, %v8920_v37  ;;  %v7701_v24 = vpop.f32.mrb[83].mxu1  ;;  %v9155_v19 = vld [vmem:[#allocation2 + $0xa8] sm:$0xff]  ;;  %v9160_v20 = vld [vmem:[#allocation2 + $0x110] sm:$0xff]  ;;  %v5513_v51 = vpop.permute.xlu1 %5512 }
 0xc3e   : > { %v4592_v25 = vmul.f32 0.2, %v4583_v23  ;;  %7708 = vmatmul.mubr.msk.f32.vlgmr.msra.gmra.mrb[54].mxu0 %vm927_vm2, %v4594_v22 }
 0xc3f   : > { %v4587_v38 = vpop.f32.mrb[84].mxu1  ;;  %7710 = vmatprep.mubr.msk.f32.mxu0 %vm8394_vm3, %v8395_v42  ;;  %7717 = vmatpush3.msk.msra.mxu0 %vm3411_vm8, %v8941_v32 }
 0xc40   : > { %v4595_v53 = vmax.f32 %v4583_v23, %v4592_v25  ;;  %v4588_v57 = vadd.f32 %v4587_v38, %v8939_v26  ;;  %v7704_v7 = vpop.f32.mrb[85].mxu1  ;;  %8088 = vmatprep.subr.bf16.mxu0 %v8393_v39  ;;  %v5515_v25 = vpop.permute.xlu1 %5514 }
 0xc42   : > { %v4593_v10 = vmul.f32 0.2, %v4588_v57  ;;  %7711 = vmatmul.mubr.msk.f32.gmra.mrb[56].mxu0 %vm927_vm2, %v4595_v53 }
 0xc43   : > { %v9019_v37 = vpop.f32.mrb[86].mxu1  ;;  %7713 = vmatprep.mubr.msk.f32.mxu0 %vm8394_vm3, %v8395_v42 }
 0xc44   : > { %v4596_v27 = vmax.f32 %v4588_v57, %v4593_v10  ;;  %v9023_v49 = vpop.f32.mrb[87].mxu1 }
 0xc45   : > { %v8098_v28 = vpack.c.bf16 %v9019_v37, %v9023_v49 }
 0xc46   : > { %7714 = vmatmul.mubr.msk.f32.gmra.mrb[58].mxu0 %vm927_vm2, %v4596_v27  ;;  %v5517_v27 = vpop.permute.xlu1 %5516 }
 0xc47   : > { %v9028_v26 = vpop.f32.mrb[88].mxu1  ;;  %7718 = vmatprep.mubr.msk.f32.mxu0 %vm8394_vm3, %v8395_v42 }
 0xc48   : > { %v9032_v29 = vpop.f32.mrb[89].mxu1 }
 0xc49   : > { %v8101_v30 = vpack.c.bf16 %v9028_v26, %v9032_v29 }
 0xc4b   : > { %v9036_v5 = vpop.f32.mrb[90].mxu1 }
 0xc4c   : > { %v9038_v32 = vpop.f32.mrb[91].mxu1 }
 0xc4d   : > { %v8110_v33 = vpack.c.bf16 %v9036_v5, %v9038_v32 }
 0xc4f   : > { %v9042_v34 = vpop.f32.mrb[92].mxu1 }
 0xc50   : > { %v9044_v35 = vpop.f32.mrb[93].mxu1 }
 0xc51   : > { %v8113_v40 = vpack.c.bf16 %v9042_v34, %v9044_v35 }
 0xc53   : > { %v9048_v36 = vpop.f32.mrb[94].mxu1 }
 0xc54   : > { %v9050_v46 = vpop.f32.mrb[95].mxu1 }
 0xc55   : > { %v8122_v47 = vpack.c.bf16 %v9048_v36, %v9050_v46  ;;  %v6518_v36 = vld [vmem:[#allocation2 + $0xc0] sm:$0xff]  ;;  %v6519_v46 = vld [vmem:[#allocation2 + $0xc8] sm:$0xff] }
 0xc57   : > { %v9054_v3 = vpop.f32.mrb[96].mxu1 }
 0xc58   : > { %v9056_v9 = vpop.f32.mrb[97].mxu1 }
 0xc59   : > { %v8125_v41 = vpack.c.bf16 %v9054_v3, %v9056_v9 }
 0xd11   : > { %v4677_v43 = vpop.f32.mrb[54].mxu0 }
 0xd12   : > { %v7709_v44 = vpop.f32.mrb[55].mxu0  ;;  %7719 = vmatmul.mubr.msk.f32.vlgmr.msra.gmra.mrb[60].mxu0 %vm3401_vm9, %v4677_v43 }
 0xd13   : > { %7721 = vmatprep.mubr.msk.f32.mxu0 %vm8394_vm3, %v8395_v42 }
 0xd15   : > { %v4682_v50 = vpop.f32.mrb[56].mxu0 }
 0xd16   : > { %v7712_v60 = vpop.f32.mrb[57].mxu0  ;;  %7722 = vmatmul.mubr.msk.f32.gmra.mrb[62].mxu0 %vm3401_vm9, %v4682_v50 }
 0xd17   : > { %7724 = vmatprep.mubr.msk.f32.mxu0 %vm8394_vm3, %v8395_v42 }
 0xd19   : > { %v4687_v61 = vpop.f32.mrb[58].mxu0 }
 0xd1a   : > { %v7715_v62 = vpop.f32.mrb[59].mxu0  ;;  %7725 = vmatmul.mubr.msk.f32.gmra.mrb[64].mxu0 %vm3401_vm9, %v4687_v61 }
 0xd1b   : > { %7733 = vmatprep.mubr.msk.f32.mxu0 %vm8394_vm3, %v8395_v42 }
 0xde5   : > { %v4772_v6 = vpop.f32.mrb[60].mxu0 }
 0xde6   : > { %v7720_v48 = vpop.f32.mrb[61].mxu0 }
 0xde9   : > { %v4777_v4 = vpop.f32.mrb[62].mxu0 }
 0xdea   : > { %v8089_v8 = vpack.c.bf16 %v4777_v4, %v4772_v6  ;;  %v7723_v11 = vpop.f32.mrb[63].mxu0 }
 0xdec   : > { %8090 = vmatpush3.bf16.msra.mxu0 %v8089_v8 }
 0xded   : > { %v4782_v12 = vpop.f32.mrb[64].mxu0  ;;  %7731 = vmatprep.subr.mxu0 %v8395_v42 }
 0xdee   : > { %v7726_v13 = vpop.f32.mrb[65].mxu0 }
 0xdf0   : > { %7732 = vmatpush3.msra.mxu0 %v4782_v12 }
 0xdf1   : > { %7734 = vmatmul.mubr.msk.f32.vlgmr.msra.gmra.mrb[66].mxu0 %vm3770_vm12, %v8948_v1  ;;  %7736 = vmatprep.subr.msk.mxu0 %vm3411_vm8, %v4866_v31  ;;  %v5412_v1 = vpop.permute.xlu0 %5411 }
 0xdf2   : > { %7738 = vmatprep.mubr.msk.f32.mxu0 %vm3401_vm9, %v8970_v16  ;;  %7737 = vmatpush3.msk.msra.mxu0 %vm3411_vm8, %v4866_v31 }
 0xdf3   : > { %7752 = vmatprep.subr.msk.mxu0 %vm3411_vm8, %v5056_v54 }
 0xdf5   : > { %7739 = vmatmul.mubr.msk.f32.vlgmr.msra.gmra.mrb[68].mxu0 %vm3401_vm9, %v8975_v52  ;;  %v4789_v56 = vpop.permute.xlu0 %4788 }
 0xdf6   : > { %7741 = vmatprep.mubr.msk.f32.mxu0 %vm3401_vm9, %v8977_v17  ;;  %7753 = vmatpush3.msk.msra.mxu0 %vm3411_vm8, %v5056_v54 }
 0xdf7   : > { %7768 = vmatprep.subr.msk.mxu0 %vm3411_vm8, %v5234_v14 }
 0xdf9   : > { %7742 = vmatmul.mubr.msk.f32.gmra.mrb[70].mxu0 %vm3401_vm9, %v8984_v55  ;;  %v5605_v59 = vpop.permute.xlu0 %5604 }
 0xdfa   : > { %7754 = vmatprep.mubr.msk.f32.mxu0 %vm3401_vm9, %v8970_v16 }
 0xdfd   : > { %7755 = vmatmul.mubr.msk.f32.vlgmr.msra.gmra.mrb[72].mxu0 %vm3401_vm9, %v8975_v52  ;;  %v5607_v21 = vpop.permute.xlu0 %5606 }
 0xdfe   : > { %7757 = vmatprep.mubr.msk.f32.mxu0 %vm3401_vm9, %v8977_v17  ;;  %7769 = vmatpush3.msk.msra.mxu0 %vm3411_vm8, %v5234_v14 }
 0xdff   : > { %7784 = vmatprep.subr.msk.mxu0 %vm3411_vm8, %v5412_v1 }
 0xe01   : > { %7758 = vmatmul.mubr.msk.f32.gmra.mrb[74].mxu0 %vm3401_vm9, %v8984_v55 }
 0xe02   : > { %7770 = vmatprep.mubr.msk.f32.mxu0 %vm3401_vm9, %v8970_v16 }
 0xe05   : > { %7771 = vmatmul.mubr.msk.f32.vlgmr.msra.gmra.mrb[76].mxu0 %vm3401_vm9, %v8975_v52 }
 0xe06   : > { %7773 = vmatprep.mubr.msk.f32.mxu0 %vm3401_vm9, %v8977_v17  ;;  %7785 = vmatpush3.msk.msra.mxu0 %vm3411_vm8, %v5412_v1 }
 0xe07   : > { %7803 = vmatprep.subr.mxu0 %v8395_v42 }
 0xe09   : > { %7774 = vmatmul.mubr.msk.f32.gmra.mrb[78].mxu0 %vm3401_vm9, %v8984_v55 }
 0xe0a   : > { %7786 = vmatprep.mubr.msk.f32.mxu0 %vm3401_vm9, %v8970_v16  ;;  %v5702_v16 = vld [vmem:[#allocation2 + $0x50] ss:$0 sm:$0xff] }
 0xe0b   : > { %5704 = vrot.lane.b32.xlu1 %v5702_v16, %s8382_s8 }
 0xe0d   : > { %7787 = vmatmul.mubr.msk.f32.vlgmr.msra.gmra.mrb[80].mxu0 %vm3401_vm9, %v8975_v52  ;;  %v5501_v52 = vld [vmem:[#allocation2 + $0x48] sm:$0xff] }
 0xe0e   : > { %7804 = vmatpush3.msra.mxu0 %v3840_v45  ;;  %7789 = vmatprep.mubr.msk.f32.mxu0 %vm3401_vm9, %v8977_v17  ;;  %v9143_v17 = vld [vmem:[#allocation2 + $0x40] sm:$0xff] }
 0xe0f   : > { %7825 = vmatprep.subr.mxu0 %v8395_v42  ;;  %5807 = vrot.lane.b32.xlu0 %v5501_v52, %s8384_s12 }
 0xe10   : > { %5809 = vrot.lane.b32.xlu1 %v9069_v63, %s8384_s12 }
 0xe11   : > { %7790 = vmatmul.mubr.msk.f32.gmra.mrb[82].mxu0 %vm3401_vm9, %v8984_v55  ;;  %v5609_v55 = vpop.permute.xlu0 %5608 }
 0xe12   : > { %7805 = vmatprep.mubr.msk.f32.mxu0 %vm8394_vm3, %v8395_v42 }
 0xe13   : > { %5805 = vrot.lane.b32.xlu0 %v9143_v17, %s8384_s12 }
 0xe14   : > { %5813 = vrot.lane.b32.xlu1 %v5504_v18, %s8384_s12 }
 0xe15   : > { %7806 = vmatmul.mubr.msk.f32.vlgmr.msra.gmra.mrb[84].mxu0 %vm927_vm2, %v5605_v59 }
 0xe16   : > { %7808 = vmatprep.mubr.msk.f32.mxu0 %vm8394_vm3, %v8395_v42 }
 0xe17   : > { %5815 = vrot.lane.b32.xlu0 %v9075_v0, %s8384_s12 }
 0xe18   : > { %5811 = vrot.lane.b32.xlu1 %v9155_v19, %s8384_s12 }
 0xe19   : > { %7809 = vmatmul.mubr.msk.f32.gmra.mrb[86].mxu0 %vm927_vm2, %v5607_v21 }
 0xe1a   : > { %7811 = vmatprep.mubr.msk.f32.mxu0 %vm8394_vm3, %v8395_v42 }
 0xe1b   : > { %5819 = vrot.lane.b32.xlu0 %v5507_v58, %s8384_s12 }
 0xe1c   : > { %5821 = vrot.lane.b32.xlu1 %v9081_v2, %s8384_s12 }
 0xe1d   : > { %7812 = vmatmul.mubr.msk.f32.gmra.mrb[88].mxu0 %vm927_vm2, %v5609_v55 }
 0xe1e   : > { %7827 = vmatprep.mubr.msk.f32.mxu0 %vm8394_vm3, %v8395_v42 }
 0xe1f   : > { %5817 = vrot.lane.b32.xlu0 %v9160_v20, %s8384_s12 }
 0xe20   : > { %5927 = vrot.lane.b32.xlu1 %v9069_v63, %s8384_s12 }
 0xe23   : > { %6019 = vrot.lane.b32.xlu0 %v9069_v63, %s8388_s15 }
 0xe24   : > { %6102 = vrot.lane.b32.xlu1 %v9069_v63, %s8390_s17 }
 0xe27   : > { %6185 = vrot.lane.b32.xlu0 %v9069_v63, %s8392_s19 }
 0xec4   : > { %v4859_v22 = vpop.f32.mrb[66].mxu0 }
 0xec5   : > { %v4860_v23 = vadd.f32 %v4859_v22, %v4789_v56  ;;  %v7735_v24 = vpop.f32.mrb[67].mxu0  ;;  %v5705_v56 = vpop.permute.xlu1 %5704 }
 0xec6   : > { %v9238_v24 = vld [vmem:[#allocation2 + $0x58] sm:$0xff] }
 0xec7   : > { %7793 = vmatpush3.msra.mxu1 %v4860_v23  ;;  %6433 = vrot.lane.b32.xlu0 %v9238_v24, %s8380_s6 }
 0xec8   : > { %v9174_v38 = vpop.f32.mrb[68].mxu0  ;;  %7795 = vmatmul.mubr.msk.f32.vlgmr.msra.gmra.mrb[98].mxu1 %vm927_vm2, %v5513_v51  ;;  %7814 = vmatprep.subr.mxu1 %v8395_v42 }
 0xec9   : > { %v4947_v53 = vpop.f32.mrb[69].mxu0  ;;  %7797 = vmatprep.mubr.msk.f32.mxu1 %vm8394_vm3, %v8395_v42  ;;  %7815 = vmatpush3.msk.msra.mxu1 %vm5716_vm14, %v5705_v56  ;;  %v5810_v18 = vpop.permute.xlu1 %5809 }
 0xeca   : > { %v8092_v57 = vpack.c.bf16 %v9174_v38, %v4947_v53  ;;  %8091 = vmatprep.subr.bf16.mxu1 %v8393_v39  ;;  %6350 = vrot.lane.b32.xlu1 %v9238_v24, %s8379_s5 }
 0xecc   : > { %v9181_v7 = vpop.f32.mrb[70].mxu0  ;;  %7798 = vmatmul.mubr.msk.f32.gmra.mrb[100].mxu1 %vm927_vm2, %v5515_v25 }
 0xecd   : > { %v9184_v10 = vpop.f32.mrb[71].mxu0  ;;  %7800 = vmatprep.mubr.msk.f32.mxu1 %vm8394_vm3, %v8395_v42  ;;  %v9230_v58 = vpop.permute.xlu1 %5813 }
 0xece   : > { %v8095_v43 = vpack.c.bf16 %v9181_v7, %v9184_v10  ;;  %6536 = vrot.lane.b32.xlu1 %v9238_v24, %s8382_s8 }
 0xed0   : > { %v9190_v44 = vpop.f32.mrb[72].mxu0  ;;  %7801 = vmatmul.mubr.msk.f32.gmra.mrb[102].mxu1 %vm927_vm2, %v5517_v27 }
 0xed1   : > { %v9193_v50 = vpop.f32.mrb[73].mxu0  ;;  %7816 = vmatprep.mubr.msk.f32.mxu1 %vm8394_vm3, %v8395_v42  ;;  %v5812_v51 = vpop.permute.xlu1 %5811 }
 0xed2   : > { %v8104_v60 = vpack.c.bf16 %v9190_v44, %v9193_v50  ;;  %v9234_v22 = vsel %vm838_vm1, %v5812_v51, %v9230_v58  ;;  %6540 = vrot.lane.b32.xlu1 %v6518_v36, %s8382_s8 }
 0xed4   : > { %v9199_v61 = vpop.f32.mrb[74].mxu0 }
 0xed5   : > { %v9201_v62 = vpop.f32.mrb[75].mxu0  ;;  %v9236_v23 = vpop.permute.xlu1 %5821 }
 0xed6   : > { %v8107_v2 = vpack.c.bf16 %v9199_v61, %v9201_v62 }
 0xed8   : > { %v9205_v6 = vpop.f32.mrb[76].mxu0 }
 0xed9   : > { %v9207_v48 = vpop.f32.mrb[77].mxu0  ;;  %v5928_v25 = vpop.permute.xlu1 %5927 }
 0xeda   : > { %v8116_v4 = vpack.c.bf16 %v9205_v6, %v9207_v48  ;;  %7826 = vmatpush3.msra.mxu0 %v5928_v25 }
 0xedb   : > { %7836 = vmatprep.subr.mxu0 %v8395_v42 }
 0xedc   : > { %v9211_v8 = vpop.f32.mrb[78].mxu0 }
 0xedd   : > { %v9213_v11 = vpop.f32.mrb[79].mxu0 }
 0xede   : > { %v8119_v31 = vpack.c.bf16 %v9211_v8, %v9213_v11 }
 0xee0   : > { %v9217_v12 = vpop.f32.mrb[80].mxu0 }
 0xee1   : > { %v9219_v13 = vpop.f32.mrb[81].mxu0 }
 0xee2   : > { %v8128_v54 = vpack.c.bf16 %v9217_v12, %v9219_v13 }
 0xee4   : > { %v9223_v14 = vpop.f32.mrb[82].mxu0 }
 0xee5   : > { %v9225_v1 = vpop.f32.mrb[83].mxu0 }
 0xee6   : > { %v8131_v15 = vpack.c.bf16 %v9223_v14, %v9225_v1 }
 0xee8   : > { %v5682_v45 = vpop.f32.mrb[84].mxu0 }
 0xee9   : > { %v7807_v59 = vpop.f32.mrb[85].mxu0 }
 0xeec   : > { %v5687_v21 = vpop.f32.mrb[86].mxu0 }
 0xeed   : > { %v7810_v16 = vpop.f32.mrb[87].mxu0 }
 0xef0   : > { %v5692_v52 = vpop.f32.mrb[88].mxu0 }
 0xef1   : > { %v7813_v55 = vpop.f32.mrb[89].mxu0 }
 0xf9b   : > { %v5590_v38 = vpop.f32.mrb[98].mxu1 }
 0xf9c   : > { %v5683_v53 = vadd.f32 %v5682_v45, %v5590_v38  ;;  %v7796_v7 = vpop.f32.mrb[99].mxu1 }
 0xf9e   : > { %v5699_v10 = vadd.f32 %v5683_v53, %v9143_v17  ;;  %v5808_v17 = vpop.permute.xlu0 %5807 }
 0xf9f   : > { %v5595_v27 = vpop.f32.mrb[100].mxu1 }
 0xfa0   : > { %7817 = vmatmul.mubr.msk.f32.vlgmr.msra.gmra.mrb[104].mxu1 %vm5706_vm15, %v5699_v10  ;;  %v5688_v56 = vadd.f32 %v5687_v21, %v5595_v27  ;;  %v7799_v59 = vpop.f32.mrb[101].mxu1  ;;  %v5824_v21 = vsel %vm838_vm1, %v5808_v17, %v5810_v18 }
 0xfa1   : > { %8093 = vmatpush1.bf16.msra.mxu1 %v8092_v57  ;;  %7819 = vmatprep.mubr.msk.f32.mxu1 %vm8394_vm3, %v8395_v42 }
 0xfa2   : > { %8094 = vmatprep.subr.bf16.mxu1 %v8393_v39  ;;  %v5700_v16 = vadd.f32 %v5688_v56, %v9155_v19  ;;  %v5806_v37 = vpop.permute.xlu0 %5805 }
 0xfa3   : > { %v5600_v55 = vpop.f32.mrb[102].mxu1  ;;  %v5823_v26 = vsel %vm838_vm1, %v5806_v37, %v5808_v17 }
 0xfa4   : > { %v5693_v51 = vadd.f32 %v5692_v52, %v5600_v55  ;;  %7820 = vmatmul.mubr.msk.f32.gmra.mrb[106].mxu1 %vm5706_vm15, %v5700_v16  ;;  %v7802_v45 = vpop.f32.mrb[103].mxu1 }
 0xfa5   : > { %8096 = vmatpush1.bf16.msra.mxu1 %v8095_v43  ;;  %7822 = vmatprep.mubr.msk.f32.mxu1 %vm8394_vm3, %v8395_v42 }
 0xfa6   : > { %8097 = vmatprep.subr.bf16.mxu1 %v8393_v39  ;;  %v5701_v57 = vadd.f32 %v5693_v51, %v9160_v20  ;;  %v5816_v49 = vpop.permute.xlu0 %5815 }
 0xfa7   : > { %v5826_v29 = vsel %vm838_vm1, %v9230_v58, %v5816_v49 }
 0xfa8   : > { %7823 = vmatmul.mubr.msk.f32.gmra.mrb[108].mxu1 %vm5706_vm15, %v5701_v57 }
 0xfa9   : > { %8099 = vmatpush1.bf16.msra.mxu1 %v8098_v28  ;;  %6868 = vmatprep.mubr.msk.f32.mxu1 %vm5832_vm4, %v5824_v21 }
 0xfaa   : > { %8100 = vmatprep.subr.bf16.mxu1 %v8393_v39  ;;  %v5820_v28 = vpop.permute.xlu0 %5819 }
 0xfad   : > { %8102 = vmatpush1.bf16.msra.mxu1 %v8101_v30  ;;  %v5828_v30 = vsel %vm838_vm1, %v5820_v28, %v9236_v23 }
 0xfae   : > { %8103 = vmatprep.subr.bf16.mxu1 %v8393_v39  ;;  %v5818_v5 = vpop.permute.xlu0 %5817 }
 0xfaf   : > { %v5827_v32 = vsel %vm838_vm1, %v5818_v5, %v5820_v28  ;;  %vm6544_vm1 = vcmask 654336  }
 0xfb1   : > { %8105 = vmatpush1.bf16.msra.mxu1 %v8104_v60 }
 0xfb2   : > { %8106 = vmatprep.subr.bf16.mxu1 %v8393_v39 }
 0xfb5   : > { %8108 = vmatpush1.bf16.msra.mxu1 %v8107_v2  ;;  %v6103_v2 = vpop.permute.xlu1 %6102 }
 0xfb6   : > { %8109 = vmatprep.subr.bf16.mxu1 %v8393_v39 }
 0xfb9   : > { %8111 = vmatpush1.bf16.msra.mxu1 %v8110_v33  ;;  %v6020_v33 = vpop.permute.xlu0 %6019  ;;  %v6351_v6 = vpop.permute.xlu1 %6350 }
 0xfba   : > { %8112 = vmatprep.subr.bf16.mxu1 %v8393_v39 }
 0xfbd   : > { %8114 = vmatpush1.bf16.msra.mxu1 %v8113_v40  ;;  %v6186_v34 = vpop.permute.xlu0 %6185  ;;  %v6517_v40 = vld [vmem:[#allocation2 + $0x60] sm:$0xff] }
 0xfbe   : > { %8115 = vmatprep.subr.bf16.mxu1 %v8393_v39  ;;  %6538 = vrot.lane.b32.xlu0 %v6517_v40, %s8382_s8 }
 0xfc1   : > { %8117 = vmatpush1.bf16.msra.mxu1 %v8116_v4  ;;  %v6434_v35 = vpop.permute.xlu0 %6433  ;;  %v8398_v4 = vmov 56  }
 0xfc2   : > { %8118 = vmatprep.subr.bf16.mxu1 %v8393_v39  ;;  %6542 = vrot.lane.b32.xlu0 %v6519_v46, %s8382_s8 }
 0xfc3   : > { %8332 = vset.pattern.permute.xlu1 %v8398_v4  ;;  %8333 = vset.pattern.permute.xlu0 %v8398_v4 }
 0xfc4   : > { %6524 = vperm.xlu1 %8332, %v9069_v63  }
 0xfc5   : > { %8120 = vmatpush1.bf16.msra.mxu1 %v8119_v31 }
 0xfc6   : > { %8121 = vmatprep.subr.bf16.mxu1 %v8393_v39  ;;  %6529 = vperm.xlu0 %8333, %v9075_v0  }
 0xfc9   : > { %8123 = vmatpush1.bf16.msra.mxu1 %v8122_v47 }
 0xfca   : > { %8124 = vmatprep.subr.bf16.mxu1 %v8393_v39 }
 0xfcd   : > { %8126 = vmatpush1.bf16.msra.mxu1 %v8125_v41 }
 0xfce   : > { %8127 = vmatprep.subr.bf16.mxu1 %v8393_v39 }
 0xfd1   : > { %8129 = vmatpush1.bf16.msra.mxu1 %v8128_v54 }
 0xfd2   : > { %8130 = vmatprep.subr.bf16.mxu1 %v8393_v39 }
 0xfd5   : > { %8132 = vmatpush1.bf16.msra.mxu1 %v8131_v15 }
 0xfd6   : > { %7891 = vmatprep.subr.mxu1 %v8395_v42 }
 0xfd8   : > { %5904 = vmatmul.mubr.f32.vlgmr.msra.gmra.mrb[104].mxu1 %v5823_v26 }
 0xfd9   : > { %6869 = vmatprep.mubr.msk.f32.mxu1 %vm5832_vm4, %v5826_v29  ;;  %7892 = vmatpush3.msra.mxu1 %v6434_v35 }
 0xfdc   : > { %5909 = vmatmul.mubr.f32.gmra.mrb[106].mxu1 %v9234_v22 }
 0xfdd   : > { %6870 = vmatprep.mubr.msk.f32.mxu1 %vm5832_vm4, %v5828_v30 }
 0xfe0   : > { %5914 = vmatmul.mubr.f32.gmra.mrb[108].mxu1 %v5827_v32 }
 0xfe1   : > { %7893 = vmatprep.mubr.msk.f32.mxu1 %vm8394_vm3, %v8395_v42 }
0x1030   : > { %v9388_v48 = vpop.permute.xlu0 %6538 }
0x10ab   : > { %v5905_v47 = vpop.f32.mrb[104].mxu1 }
0x10ac   : > { %v5919_v3 = vmul.f32 0.2, %v5905_v47  ;;  %v5907_v9 = vpop.f32.mrb[105].mxu1 }
0x10ae   : > { %v5922_v41 = vmax.f32 %v5905_v47, %v5919_v3 }
0x10af   : > { %v5910_v19 = vpop.f32.mrb[106].mxu1 }
0x10b0   : > { %v5920_v20 = vmul.f32 0.2, %v5910_v19  ;;  %v5912_v43 = vpop.f32.mrb[107].mxu1  ;;  %7828 = vmatmul.mubr.msk.f32.vlgmr.msra.gmra.mrb[90].mxu0 %vm927_vm2, %v5922_v41  ;;  %7894 = vmatmul.mubr.msk.f32.vlgmr.msra.gmra.mrb[110].mxu1 %vm927_vm2, %v5922_v41 }
0x10b1   : > { %7830 = vmatprep.mubr.msk.f32.mxu0 %vm8394_vm3, %v8395_v42  ;;  %7896 = vmatprep.mubr.msk.f32.mxu1 %vm8394_vm3, %v8395_v42  ;;  %v6537_v43 = vpop.permute.xlu1 %6536 }
0x10b2   : > { %v5923_v44 = vmax.f32 %v5910_v19, %v5920_v20  ;;  %7837 = vmatpush3.msra.mxu0 %v6020_v33 }
0x10b3   : > { %v5915_v50 = vpop.f32.mrb[108].mxu1  ;;  %7847 = vmatprep.subr.mxu0 %v8395_v42 }
0x10b4   : > { %v5921_v60 = vmul.f32 0.2, %v5915_v50  ;;  %v5917_v61 = vpop.f32.mrb[109].mxu1  ;;  %7831 = vmatmul.mubr.msk.f32.gmra.mrb[92].mxu0 %vm927_vm2, %v5923_v44  ;;  %7897 = vmatmul.mubr.msk.f32.gmra.mrb[112].mxu1 %vm927_vm2, %v5923_v44 }
0x10b5   : > { %7833 = vmatprep.mubr.msk.f32.mxu0 %vm8394_vm3, %v8395_v42  ;;  %7899 = vmatprep.mubr.msk.f32.mxu1 %vm8394_vm3, %v8395_v42 }
0x10b6   : > { %v5924_v62 = vmax.f32 %v5915_v50, %v5921_v60  ;;  %v6541_v50 = vpop.permute.xlu1 %6540  ;;  %v6543_v60 = vpop.permute.xlu0 %6542 }
0x10b7   : > { %v6546_v61 = vsel %vm6544_vm1, %v6541_v50, %v6543_v60 }
0x10b8   : > { %7834 = vmatmul.mubr.msk.f32.gmra.mrb[94].mxu0 %vm927_vm2, %v5924_v62  ;;  %7900 = vmatmul.mubr.msk.f32.gmra.mrb[114].mxu1 %vm927_vm2, %v5924_v62 }
0x10b9   : > { %7838 = vmatprep.mubr.msk.f32.mxu0 %vm8394_vm3, %v8395_v42 }
0x10bc   : > { %7839 = vmatmul.mubr.msk.f32.vlgmr.msra.gmra.mrb[96].mxu0 %vm927_vm2, %v5922_v41 }
0x10bd   : > { %7841 = vmatprep.mubr.msk.f32.mxu0 %vm8394_vm3, %v8395_v42  ;;  %7848 = vmatpush3.msra.mxu0 %v6103_v2 }
0x10be   : > { %7858 = vmatprep.subr.mxu0 %v8395_v42 }
0x10c0   : > { %7842 = vmatmul.mubr.msk.f32.gmra.mrb[98].mxu0 %vm927_vm2, %v5923_v44 }
0x10c1   : > { %7844 = vmatprep.mubr.msk.f32.mxu0 %vm8394_vm3, %v8395_v42 }
0x10c4   : > { %7845 = vmatmul.mubr.msk.f32.gmra.mrb[100].mxu0 %vm927_vm2, %v5924_v62 }
0x10c5   : > { %7849 = vmatprep.mubr.msk.f32.mxu0 %vm8394_vm3, %v8395_v42 }
0x10c8   : > { %7850 = vmatmul.mubr.msk.f32.vlgmr.msra.gmra.mrb[102].mxu0 %vm927_vm2, %v5922_v41 }
0x10c9   : > { %7852 = vmatprep.mubr.msk.f32.mxu0 %vm8394_vm3, %v8395_v42  ;;  %7859 = vmatpush3.msra.mxu0 %v6186_v34 }
0x10ca   : > { %7869 = vmatprep.subr.mxu0 %v8395_v42 }
0x10cc   : > { %7853 = vmatmul.mubr.msk.f32.gmra.mrb[104].mxu0 %vm927_vm2, %v5923_v44 }
0x10cd   : > { %7855 = vmatprep.mubr.msk.f32.mxu0 %vm8394_vm3, %v8395_v42 }
0x10d0   : > { %7856 = vmatmul.mubr.msk.f32.gmra.mrb[106].mxu0 %vm927_vm2, %v5924_v62 }
0x10d1   : > { %7860 = vmatprep.mubr.msk.f32.mxu0 %vm8394_vm3, %v8395_v42 }
0x10d4   : > { %7861 = vmatmul.mubr.msk.f32.vlgmr.msra.gmra.mrb[108].mxu0 %vm927_vm2, %v5922_v41 }
0x10d5   : > { %7863 = vmatprep.mubr.msk.f32.mxu0 %vm8394_vm3, %v8395_v42  ;;  %7870 = vmatpush3.msra.mxu0 %v9238_v24 }
0x10d6   : > { %7880 = vmatprep.subr.mxu0 %v8395_v42 }
0x10d8   : > { %7864 = vmatmul.mubr.msk.f32.gmra.mrb[110].mxu0 %vm927_vm2, %v5923_v44 }
0x10d9   : > { %7866 = vmatprep.mubr.msk.f32.mxu0 %vm8394_vm3, %v8395_v42 }
0x10dc   : > { %7867 = vmatmul.mubr.msk.f32.gmra.mrb[112].mxu0 %vm927_vm2, %v5924_v62 }
0x10dd   : > { %7871 = vmatprep.mubr.msk.f32.mxu0 %vm8394_vm3, %v8395_v42 }
0x10e0   : > { %7872 = vmatmul.mubr.msk.f32.vlgmr.msra.gmra.mrb[114].mxu0 %vm927_vm2, %v5922_v41 }
0x10e1   : > { %7874 = vmatprep.mubr.msk.f32.mxu0 %vm8394_vm3, %v8395_v42  ;;  %7881 = vmatpush3.msra.mxu0 %v6351_v6  ;;  %v6530_v6 = vpop.permute.xlu0 %6529 }
0x10e2   : > { %8133 = vmatprep.subr.bf16.mxu0 %v8393_v39 }
0x10e4   : > { %7875 = vmatmul.mubr.msk.f32.gmra.mrb[116].mxu0 %vm927_vm2, %v5923_v44 }
0x10e5   : > { %7877 = vmatprep.mubr.msk.f32.mxu0 %vm8394_vm3, %v8395_v42 }
0x10e8   : > { %7878 = vmatmul.mubr.msk.f32.gmra.mrb[118].mxu0 %vm927_vm2, %v5924_v62 }
0x10e9   : > { %7882 = vmatprep.mubr.msk.f32.mxu0 %vm8394_vm3, %v8395_v42 }
0x10ec   : > { %7883 = vmatmul.mubr.msk.f32.vlgmr.msra.gmra.mrb[120].mxu0 %vm927_vm2, %v5922_v41 }
0x10ed   : > { %7885 = vmatprep.mubr.msk.f32.mxu0 %vm8394_vm3, %v8395_v42 }
0x10f0   : > { %7886 = vmatmul.mubr.msk.f32.gmra.mrb[122].mxu0 %vm927_vm2, %v5923_v44  ;;  %v6545_v44 = vsel %vm6544_vm1, %v6537_v43, %v9388_v48 }
0x10f1   : > { %7888 = vmatprep.mubr.msk.f32.mxu0 %vm8394_vm3, %v8395_v42 }
0x10f4   : > { %7889 = vmatmul.mubr.msk.f32.gmra.mrb[124].mxu0 %vm927_vm2, %v5924_v62  ;;  %vm6629_vm2 = vcmask 123904  }
0x10f5   : > { %6892 = vmatprep.mubr.msk.f32.mxu0 %vm4501_vm13, %v9388_v48 }
0x1183   : > { %v6005_v8 = vpop.f32.mrb[90].mxu0  ;;  %v9394_v11 = vpop.f32.mrb[110].mxu1 }
0x1184   : > { %v7829_v31 = vpop.f32.mrb[91].mxu0  ;;  %v7895_v12 = vpop.f32.mrb[111].mxu1 }
0x1187   : > { %v6010_v13 = vpop.f32.mrb[92].mxu0  ;;  %v9396_v54 = vpop.f32.mrb[112].mxu1 }
0x1188   : > { %v8134_v14 = vpack.c.bf16 %v6010_v13, %v6005_v8  ;;  %v8161_v1 = vpack.c.bf16 %v9396_v54, %v9394_v11  ;;  %v7832_v15 = vpop.f32.mrb[93].mxu0  ;;  %v7898_v52 = vpop.f32.mrb[113].mxu1 }
0x118a   : > { %8135 = vmatpush1.bf16.msra.mxu0 %v8134_v14 }
0x118b   : > { %v6015_v18 = vpop.f32.mrb[94].mxu0  ;;  %v9400_v58 = vpop.f32.mrb[114].mxu1  ;;  %8136 = vmatprep.subr.bf16.mxu0 %v8393_v39 }
0x118c   : > { %v7835_v63 = vpop.f32.mrb[95].mxu0  ;;  %v7901_v0 = vpop.f32.mrb[115].mxu1 }
0x118f   : > { %v6088_v22 = vpop.f32.mrb[96].mxu0 }
0x1190   : > { %v8137_v23 = vpack.c.bf16 %v6088_v22, %v6015_v18  ;;  %v7840_v24 = vpop.f32.mrb[97].mxu0 }
0x1192   : > { %8138 = vmatpush1.bf16.msra.mxu0 %v8137_v23 }
0x1193   : > { %v6093_v25 = vpop.f32.mrb[98].mxu0  ;;  %8139 = vmatprep.subr.bf16.mxu0 %v8393_v39 }
0x1194   : > { %v7843_v38 = vpop.f32.mrb[99].mxu0 }
0x1197   : > { %v6098_v53 = vpop.f32.mrb[100].mxu0 }
0x1198   : > { %v8140_v7 = vpack.c.bf16 %v6098_v53, %v6093_v25  ;;  %v7846_v10 = vpop.f32.mrb[101].mxu0 }
0x119a   : > { %8141 = vmatpush1.bf16.msra.mxu0 %v8140_v7 }
0x119b   : > { %v6171_v27 = vpop.f32.mrb[102].mxu0  ;;  %8142 = vmatprep.subr.bf16.mxu0 %v8393_v39 }
0x119c   : > { %v7851_v56 = vpop.f32.mrb[103].mxu0 }
0x119f   : > { %v6176_v59 = vpop.f32.mrb[104].mxu0 }
0x11a0   : > { %v8143_v16 = vpack.c.bf16 %v6176_v59, %v6171_v27  ;;  %v7854_v55 = vpop.f32.mrb[105].mxu0 }
0x11a2   : > { %8144 = vmatpush1.bf16.msra.mxu0 %v8143_v16 }
0x11a3   : > { %v6181_v51 = vpop.f32.mrb[106].mxu0  ;;  %8145 = vmatprep.subr.bf16.mxu0 %v8393_v39 }
0x11a4   : > { %v7857_v45 = vpop.f32.mrb[107].mxu0 }
0x11a7   : > { %v6254_v17 = vpop.f32.mrb[108].mxu0 }
0x11a8   : > { %v8146_v57 = vpack.c.bf16 %v6254_v17, %v6181_v51  ;;  %v7862_v21 = vpop.f32.mrb[109].mxu0 }
0x11aa   : > { %8147 = vmatpush1.bf16.msra.mxu0 %v8146_v57 }
0x11ab   : > { %v6259_v37 = vpop.f32.mrb[110].mxu0  ;;  %8148 = vmatprep.subr.bf16.mxu0 %v8393_v39 }
0x11ac   : > { %v7865_v49 = vpop.f32.mrb[111].mxu0 }
0x11af   : > { %v6264_v28 = vpop.f32.mrb[112].mxu0 }
0x11b0   : > { %v8149_v26 = vpack.c.bf16 %v6264_v28, %v6259_v37  ;;  %v7868_v29 = vpop.f32.mrb[113].mxu0 }
0x11b2   : > { %8150 = vmatpush1.bf16.msra.mxu0 %v8149_v26 }
0x11b3   : > { %v6335_v30 = vpop.f32.mrb[114].mxu0  ;;  %8151 = vmatprep.subr.bf16.mxu0 %v8393_v39 }
0x11b4   : > { %v7873_v5 = vpop.f32.mrb[115].mxu0 }
0x11b7   : > { %v6340_v32 = vpop.f32.mrb[116].mxu0 }
0x11b8   : > { %v8152_v33 = vpack.c.bf16 %v6340_v32, %v6335_v30  ;;  %v7876_v34 = vpop.f32.mrb[117].mxu0 }
0x11ba   : > { %8153 = vmatpush1.bf16.msra.mxu0 %v8152_v33 }
0x11bb   : > { %v6345_v35 = vpop.f32.mrb[118].mxu0  ;;  %8154 = vmatprep.subr.bf16.mxu0 %v8393_v39 }
0x11bc   : > { %v7879_v40 = vpop.f32.mrb[119].mxu0 }
0x11bf   : > { %v6419_v36 = vpop.f32.mrb[120].mxu0 }
0x11c0   : > { %v8155_v46 = vpack.c.bf16 %v6419_v36, %v6345_v35  ;;  %v7884_v47 = vpop.f32.mrb[121].mxu0 }
0x11c2   : > { %8156 = vmatpush1.bf16.msra.mxu0 %v8155_v46 }
0x11c3   : > { %v6424_v3 = vpop.f32.mrb[122].mxu0  ;;  %8157 = vmatprep.subr.bf16.mxu0 %v8393_v39 }
0x11c4   : > { %v7887_v9 = vpop.f32.mrb[123].mxu0 }
0x11c7   : > { %v6429_v41 = vpop.f32.mrb[124].mxu0 }
0x11c8   : > { %v8158_v19 = vpack.c.bf16 %v6429_v41, %v6424_v3  ;;  %v7890_v20 = vpop.f32.mrb[125].mxu0 }
0x11ca   : > { %8159 = vmatpush1.bf16.msra.mxu0 %v8158_v19 }
0x11cb   : > { %8160 = vmatprep.subr.bf16.mxu0 %v8393_v39  ;;  %v6525_v39 = vpop.permute.xlu1 %6524 }
0x11ce   : > { %8162 = vmatpush1.bf16.msra.mxu0 %v8161_v1 }
0x11cf   : > { %6593 = vmatprep.subr.mxu0 %v8395_v42 }
0x11d2   : > { %6594 = vmatpush1.msra.mxu0 %v9400_v58 }
0x11d3   : > { %6618 = vmatmul.mubr.f32.vlgmr.msra.gmra.mrb[126].mxu0 %v6545_v44 }
0x11d4   : > { %6893 = vmatprep.mubr.msk.f32.mxu0 %vm4501_vm13, %v6543_v60 }
0x11d7   : > { %6623 = vmatmul.mubr.f32.gmra.mrb[128].mxu0 %v6546_v61 }
0x12a6   : > { %v6619_v62 = vpop.f32.mrb[126].mxu0 }
0x12a7   : > { %v6620_v2 = vadd.f32 %v6619_v62, %v6525_v39  ;;  %v6621_v42 = vpop.f32.mrb[127].mxu0 }
0x12a9   : > { %6628 = vst.msk [vmem:[%s158_s22] sm:$0xff] %vm163_vm0, %v6620_v2 }
0x12aa   : > { %v6624_v48 = vpop.f32.mrb[128].mxu0 }
0x12ab   : > { %v6625_v4 = vadd.f32 %v6624_v48, %v6530_v6  ;;  %v6626_v8 = vpop.f32.mrb[129].mxu0 }
0x12ad   : > { %6630 = vst.msk [vmem:[%s158_s22 + $0x8] sm:$0x3] %vm6629_vm2, %v6625_v4 }
0x12ae PF: > { %s13_s9 = sadd.s32 1, %s8372_s9  }
0x12af   : > { %p10_p3 = scmp.ge.s32.totalorder %s13_s9, 4  }
0x12b1   :  { %12 = sbr.rel (!%p10_p3) target bundleno = 1 (0x1), region = 63 }
0x12b8   :  { %6652 = vsyncpa [#allocation3], 1 }
0x12b9   :  { %6654 = vsyncpa [#allocation3 + $0x1], 1 }

</bundles_post_ra>
